<compile_context>
chip_gen: v6e
topology: v6e:2x2x1
jax: 0.10.0
libtpu: 0.0.40
codegen_flags: <defaults>
</compile_context>

<pallas_src>
import functools

import jax
import jax.numpy as jnp
import numpy as np
from jax import lax
from jax.experimental import pallas as pl
from jax.experimental.pallas import tpu as pltpu

LANE = 128


def _round_up(x, m):
    return (x + m - 1) // m * m


def _pick_band_h(h, w, target_pixels=512):
    """Largest divisor of h with band_h*w <= target_pixels, preferring >=2 bands."""
    cands = [d for d in range(1, h + 1) if h % d == 0 and d * w <= target_pixels]
    if not cands:
        return 1
    non_full = [d for d in cands if d < h]
    return max(non_full) if non_full else max(cands)


def _conv_bn_silu_kernel(x_ref, w_ref, scale_ref, shift_ref, o_ref,
                         xpad_ref, *col_scratch,
                         K, pad, cin, band_h, packed, kkc):
    """One (batch, H-band, Cout-tile) grid step.

    x_ref:     (1, H, W, Cin)         raw input image (resident across band/cout), bf16
    w_ref:     (KKC, Cout_t)          im2col-flattened conv weights for this Cout tile, bf16
    scale_ref: (1, Cout_t)            fused BN scale, f32
    shift_ref: (1, Cout_t)            fused BN shift, f32
    o_ref:     (1, band_h, W, Cout_t) output tile, bf16 (lane-dense)
    xpad_ref:  (H+2p, W+2p, cin_l)    VMEM scratch: zero-halo padded image (built once/image)
    col_scratch: packed path only ->  (band_h*W, kkc_p) packed im2col band
    """
    b = pl.program_id(1)
    co = pl.program_id(2)
    _, H, W, _ = x_ref.shape
    cin_l = xpad_ref.shape[2]
    cout_t = o_ref.shape[3]
    col_ref = col_scratch[0] if packed else None

    # Build the zero-padded image once per image (band 0 / cout-tile 0).  Safe under
    # megacore: only the batch axis is 'parallel', so every core sees b==co==0 first for
    # each image it owns.  Only halo strips / channel tail get zeroed (interior is fully
    # overwritten) -- no full-scratch zero pass on the store slot.
    @pl.when((b == 0) & (co == 0))
    def _fill_xpad():
        dt = xpad_ref.dtype
        Wp = W + 2 * pad
        if pad > 0:
            xpad_ref[0:pad, :, :] = jnp.zeros((pad, Wp, cin_l), dt)                        # top
            xpad_ref[pad + H:pad + H + pad, :, :] = jnp.zeros((pad, Wp, cin_l), dt)        # bottom
            xpad_ref[pad:pad + H, 0:pad, :] = jnp.zeros((H, pad, cin_l), dt)               # left
            xpad_ref[pad:pad + H, pad + W:pad + W + pad, :] = jnp.zeros((H, pad, cin_l), dt)  # right
        if cin_l > cin:
            xpad_ref[pad:pad + H, pad:pad + W, cin:] = jnp.zeros((H, W, cin_l - cin), dt)  # chan tail
        xpad_ref[pad:pad + H, pad:pad + W, 0:cin] = x_ref[0]                               # interior
        if packed and col_ref.shape[1] > kkc:
            # contraction lane tail beyond K*K*Cin stays zero for the whole kernel
            col_ref[:, kkc:] = jnp.zeros(
                (col_ref.shape[0], col_ref.shape[1] - kkc), col_ref.dtype)

    r0 = pl.multiple_of(b * band_h, band_h)   # first padded row of this band

    if packed:
        # Cin < 128: pack all K*K taps x Cin into ONE 128-lane contraction band -> a single
        # MXU dot per (band, cout-tile), ~K*K fewer MXU passes than per-tap-padded-to-128.
        # col is rebuilt once per band (co == 0) and reused across Cout tiles.
        @pl.when(co == 0)
        def _build_col():
            for kh in range(K):
                for kw in range(K):
                    tap = kh * K + kw
                    win = xpad_ref[pl.ds(r0 + kh, band_h), kw:kw + W, :]
                    col_ref[:, tap * cin:(tap + 1) * cin] = win.reshape(band_h * W, cin)

        acc = jnp.dot(col_ref[...], w_ref[...], preferred_element_type=jnp.float32)
    else:
        # Cin >= 128: per-tap accumulation -- no materialized im2col slab at all.
        acc = jnp.zeros((band_h * W, cout_t), jnp.float32)
        for kh in range(K):
            for kw in range(K):
                tap = kh * K + kw
                win = xpad_ref[pl.ds(r0 + kh, band_h), kw:kw + W, :]
                acc = acc + jnp.dot(win.reshape(band_h * W, cin_l),
                                    w_ref[tap * cin_l:(tap + 1) * cin_l, :],
                                    preferred_element_type=jnp.float32)

    # Fused BatchNorm (eval) + SiLU epilogue in f32; sigmoid runs on the EUP.
    y = acc * scale_ref[...] + shift_ref[...]
    y = y * jax.nn.sigmoid(y)
    o_ref[...] = y.reshape(1, band_h, W, cout_t).astype(o_ref.dtype)


def conv_bn_silu(x_nchw, w_oihw, gamma, beta, running_mean, running_var,
                 *, stride=1, eps=1e-5):
    """Forward of the YOLOv8 `Conv` module (Conv2d no-bias -> BN(eval) -> SiLU)."""
    assert stride == 1, "kernel implements stride=1 ('same') conv, groups=1, dilation=1"
    N, C1, H, W = x_nchw.shape
    C2, C1w, K, K2 = w_oihw.shape
    assert C1 == C1w and K == K2 and K % 2 == 1
    pad = K // 2  # autopad

    packed = C1 < LANE
    if packed:
        cin_l = C1                       # no per-tap 128-lane padding for small Cin
        kkc = K * K * C1
        kkc_p = _round_up(kkc, LANE)     # single packed contraction band
    else:
        cin_l = _round_up(C1, LANE)
        kkc = K * K * cin_l
        kkc_p = kkc
    cout_p = _round_up(C2, LANE)
    # 256-wide Cout tiles keep the 2x256x256 MXU (v6e/v7x) full when C2 >= 256; a 128 tile
    # already matches v5e's 4x128x128 MXU.  TODO(synk): pick per-chip via pltpu.get_tpu_info().
    cout_t = 256 if cout_p % 256 == 0 else LANE
    n_cout = cout_p // cout_t
    band_h = _pick_band_h(H, W)
    n_band = H // band_h

    # Module-boundary layout plumbing (NCHW -> NHWC) + bf16 cast for the MXU operands.
    # TODO(synk): between consecutive Conv blocks keep activations in this bf16 NHWC layout
    # (channel-padded) so these transposes / the channel slice below and the narrow-Cin
    # input DMA only happen at real network boundaries.
    x_nhwc = jnp.transpose(x_nchw, (0, 2, 3, 1)).astype(jnp.bfloat16)

    # Weights: OIHW -> (K,K,Cin,Cout) -> im2col-flattened 2-D slab, bf16.
    w_kkio = jnp.transpose(w_oihw, (2, 3, 1, 0)).astype(jnp.float32)
    if packed:
        w2d = w_kkio.reshape(K * K * C1, C2)
        w2d = jnp.pad(w2d, ((0, kkc_p - K * K * C1), (0, cout_p - C2)))
    else:
        w_kkio = jnp.pad(w_kkio, ((0, 0), (0, 0), (0, cin_l - C1), (0, cout_p - C2)))
        w2d = w_kkio.reshape(kkc_p, cout_p)
    w2d = w2d.astype(jnp.bfloat16)

    # Fold BN (eval mode); padded output channels get scale=shift=0 (sliced off later).
    scale = (gamma / jnp.sqrt(running_var + eps)).astype(jnp.float32)
    shift = (beta - running_mean * scale).astype(jnp.float32)
    scale2d = jnp.pad(scale, (0, cout_p - C2)).reshape(1, cout_p)
    shift2d = jnp.pad(shift, (0, cout_p - C2)).reshape(1, cout_p)

    kernel = functools.partial(_conv_bn_silu_kernel, K=K, pad=pad, cin=C1,
                               band_h=band_h, packed=packed, kkc=kkc)

    scratch = [pltpu.VMEM((H + 2 * pad, W + 2 * pad, cin_l), jnp.bfloat16)]
    if packed:
        scratch.append(pltpu.VMEM((band_h * W, kkc_p), jnp.bfloat16))

    out_nhwc = pl.pallas_call(
        kernel,
        out_shape=jax.ShapeDtypeStruct((N, H, W, cout_p), jnp.bfloat16),
        grid_spec=pltpu.PrefetchScalarGridSpec(
            num_scalar_prefetch=0,
            grid=(N, n_band, n_cout),
            in_specs=[
                # full image per batch, resident across band/cout axes (DMA'd once/image)
                pl.BlockSpec((1, H, W, C1), lambda n, b, co: (n, 0, 0, 0)),
                # weights / BN params: constant over (n, b), streamed over cout tiles.
                # TODO(synk): pipeline_mode=pl.Buffered(1) here to reclaim VMEM on v7x.
                pl.BlockSpec((kkc_p, cout_t), lambda n, b, co: (0, co)),
                pl.BlockSpec((1, cout_t), lambda n, b, co: (0, co)),
                pl.BlockSpec((1, cout_t), lambda n, b, co: (0, co)),
            ],
            out_specs=pl.BlockSpec((1, band_h, W, cout_t),
                                   lambda n, b, co: (n, b, 0, co)),
            scratch_shapes=scratch,
        ),
        compiler_params=pltpu.CompilerParams(
            dimension_semantics=("parallel", "arbitrary", "arbitrary"),
            vmem_limit_bytes=48 * 1024 * 1024,
        ),
    )(x_nhwc, w2d, scale2d, shift2d)

    # Module boundary: drop padded channels, back to NCHW f32 (a real multi-layer net
    # would keep the bf16 NHWC tensor and skip this pass).
    out = jnp.transpose(out_nhwc[..., :C2], (0, 3, 1, 2))
    return out.astype(jnp.float32)


def _reference(x_nchw, w_oihw, gamma, beta, running_mean, running_var,
               *, stride=1, eps=1e-5):
    """Pure-JAX reference.  Inputs rounded to bf16 to mirror the kernel's bf16 MXU
    operands; conv accumulation, BN and SiLU in f32 like the kernel."""
    pad = w_oihw.shape[2] // 2
    xb = x_nchw.astype(jnp.bfloat16).astype(jnp.float32)
    wb = w_oihw.astype(jnp.bfloat16).astype(jnp.float32)
    y = lax.conv_general_dilated(
        xb, wb,
        window_strides=(stride, stride),
        padding=((pad, pad), (pad, pad)),
        dimension_numbers=("NCHW", "OIHW", "NCHW"),
    )
    scale = gamma / jnp.sqrt(running_var + eps)
    shift = beta - running_mean * scale
    y = y * scale[None, :, None, None] + shift[None, :, None, None]
    return y * jax.nn.sigmoid(y)


if __name__ == "__main__":
    # Module config: Conv(c1=4, c2=8, k=3, s=1) -> pad = 1
    N, C1, H, W = 2, 4, 16, 16
    C2, K = 8, 3

    key = jax.random.PRNGKey(0)
    kx, kw, kg, kb, km, kv = jax.random.split(key, 6)

    x = jax.random.normal(kx, (N, C1, H, W), dtype=jnp.float32)
    # Conv2d weight (bias=False): shape (C2, C1, K, K)
    w = jax.random.normal(kw, (C2, C1, K, K), dtype=jnp.float32) * 0.1
    # BatchNorm2d params / running stats (deterministic, non-trivial)
    gamma = 1.0 + 0.1 * jax.random.normal(kg, (C2,), dtype=jnp.float32)
    beta = 0.1 * jax.random.normal(kb, (C2,), dtype=jnp.float32)
    running_mean = 0.1 * jax.random.normal(km, (C2,), dtype=jnp.float32)
    running_var = 1.0 + 0.1 * jax.nn.softplus(
        jax.random.normal(kv, (C2,), dtype=jnp.float32))

    out = conv_bn_silu(x, w, gamma, beta, running_mean, running_var)
    out = jax.block_until_ready(out)

    ref = _reference(x, w, gamma, beta, running_mean, running_var)
    ref = jax.block_until_ready(ref)

    assert out.shape == (N, C2, H, W), out.shape
    # kernel writes its output in bf16 (HBM-traffic optimization) -> compare at bf16-level
    # tolerance against the f32 reference.
    np.testing.assert_allclose(np.asarray(out), np.asarray(ref), rtol=2e-2, atol=2e-2)
    print("KERNEL_OK")
</pallas_src>

<mosaic_0001>
module attributes {stable_mosaic.version = 11 : i64} {
  func.func @_conv_bn_silu_kernel(%arg0: i32, %arg1: i32, %arg2: i32, %arg3: memref<1x16x16x4xbf16, #tpu.memory_space<vmem>>, %arg4: memref<128x128xbf16, #tpu.memory_space<vmem>>, %arg5: memref<1x128xf32, #tpu.memory_space<vmem>>, %arg6: memref<1x128xf32, #tpu.memory_space<vmem>>, %arg7: memref<1x8x16x128xbf16, #tpu.memory_space<vmem>>, %arg8: memref<18x18x4xbf16, #tpu.memory_space<vmem>>, %arg9: memref<128x128xbf16, #tpu.memory_space<vmem>>) attributes {dimension_semantics = [#tpu.dimension_semantics<parallel>, #tpu.dimension_semantics<arbitrary>, #tpu.dimension_semantics<arbitrary>], iteration_bounds = array<i64: 2, 2, 1>, scalar_prefetch = 0 : i64, scratch_operands = 2 : i64, tpu.core_type = #tpu.core_type<tc>, window_params = [{transform_indices = @transform_0, window_bounds = array<i64: 1, 16, 16, 4>}, {transform_indices = @transform_1, window_bounds = array<i64: 128, 128>}, {transform_indices = @transform_2, window_bounds = array<i64: 1, 128>}, {transform_indices = @transform_3, window_bounds = array<i64: 1, 128>}, {transform_indices = @transform_4, window_bounds = array<i64: 1, 8, 16, 128>}]} {
    %c0_i32 = arith.constant 0 : i32
    %0 = arith.cmpi eq, %arg1, %c0_i32 : i32
    %c0_i32_0 = arith.constant 0 : i32
    %1 = arith.cmpi eq, %arg2, %c0_i32_0 : i32
    %2 = arith.andi %0, %1 : i1
    %3 = arith.extui %2 : i1 to i32
    %c0_i32_1 = arith.constant 0 : i32
    %4 = arith.cmpi ne, %3, %c0_i32_1 : i32
    scf.if %4 {
      %cst_16 = arith.constant 0.000000e+00 : bf16
      %28 = vector.broadcast %cst_16 : bf16 to vector<1x18x4xbf16>
      %c0_17 = arith.constant 0 : index
      %c0_18 = arith.constant 0 : index
      %c0_19 = arith.constant 0 : index
      %29 = vector.load %arg8[%c0_17, %c0_18, %c0_19] : memref<18x18x4xbf16, #tpu.memory_space<vmem>>, vector<1x18x4xbf16>
      tpu.vector_store %arg8[%c0_17, %c0_18, %c0_19], %28 {strides = array<i32>} : memref<18x18x4xbf16, #tpu.memory_space<vmem>>, vector<1x18x4xbf16>,
      %cst_20 = arith.constant 0.000000e+00 : bf16
      %30 = vector.broadcast %cst_20 : bf16 to vector<1x18x4xbf16>
      %c17 = arith.constant 17 : index
      %c0_21 = arith.constant 0 : index
      %c0_22 = arith.constant 0 : index
      %31 = vector.load %arg8[%c17, %c0_21, %c0_22] : memref<18x18x4xbf16, #tpu.memory_space<vmem>>, vector<1x18x4xbf16>
      tpu.vector_store %arg8[%c17, %c0_21, %c0_22], %30 {strides = array<i32>} : memref<18x18x4xbf16, #tpu.memory_space<vmem>>, vector<1x18x4xbf16>,
      %cst_23 = arith.constant 0.000000e+00 : bf16
      %32 = vector.broadcast %cst_23 : bf16 to vector<16x1x4xbf16>
      %c1 = arith.constant 1 : index
      %c0_24 = arith.constant 0 : index
      %c0_25 = arith.constant 0 : index
      %33 = vector.load %arg8[%c1, %c0_24, %c0_25] : memref<18x18x4xbf16, #tpu.memory_space<vmem>>, vector<16x1x4xbf16>
      tpu.vector_store %arg8[%c1, %c0_24, %c0_25], %32 {strides = array<i32>} : memref<18x18x4xbf16, #tpu.memory_space<vmem>>, vector<16x1x4xbf16>,
      %cst_26 = arith.constant 0.000000e+00 : bf16
      %34 = vector.broadcast %cst_26 : bf16 to vector<16x1x4xbf16>
      %c1_27 = arith.constant 1 : index
      %c17_28 = arith.constant 17 : index
      %c0_29 = arith.constant 0 : index
      %35 = vector.load %arg8[%c1_27, %c17_28, %c0_29] : memref<18x18x4xbf16, #tpu.memory_space<vmem>>, vector<16x1x4xbf16>
      tpu.vector_store %arg8[%c1_27, %c17_28, %c0_29], %34 {strides = array<i32>} : memref<18x18x4xbf16, #tpu.memory_space<vmem>>, vector<16x1x4xbf16>,
      %c0_30 = arith.constant 0 : index
      %c0_31 = arith.constant 0 : index
      %c0_32 = arith.constant 0 : index
      %c0_33 = arith.constant 0 : index
      %36 = vector.load %arg3[%c0_30, %c0_31, %c0_32, %c0_33] : memref<1x16x16x4xbf16, #tpu.memory_space<vmem>>, vector<1x16x16x4xbf16>
      %37 = vector.shape_cast %36 : vector<1x16x16x4xbf16> to vector<16x16x4xbf16>
      %c1_34 = arith.constant 1 : index
      %c1_35 = arith.constant 1 : index
      %c0_36 = arith.constant 0 : index
      %38 = vector.load %arg8[%c1_34, %c1_35, %c0_36] : memref<18x18x4xbf16, #tpu.memory_space<vmem>>, vector<16x16x4xbf16>
      tpu.vector_store %arg8[%c1_34, %c1_35, %c0_36], %37 {strides = array<i32>} : memref<18x18x4xbf16, #tpu.memory_space<vmem>>, vector<16x16x4xbf16>,
      %cst_37 = arith.constant 0.000000e+00 : bf16
      %39 = vector.broadcast %cst_37 : bf16 to vector<128x92xbf16>
      %c0_38 = arith.constant 0 : index
      %c36 = arith.constant 36 : index
      %40 = vector.load %arg9[%c0_38, %c36] : memref<128x128xbf16, #tpu.memory_space<vmem>>, vector<128x92xbf16>
      tpu.vector_store %arg9[%c0_38, %c36], %39 {strides = array<i32>} : memref<128x128xbf16, #tpu.memory_space<vmem>>, vector<128x92xbf16>,
    } else {
    }
    %c8_i32 = arith.constant 8 : i32
    %5 = arith.muli %arg1, %c8_i32 : i32
    %6 = tpu.assume_multiple %5, 8 : i32
    %c0_i32_2 = arith.constant 0 : i32
    %7 = arith.cmpi eq, %arg2, %c0_i32_2 : i32
    %8 = arith.extui %7 : i1 to i32
    %c0_i32_3 = arith.constant 0 : i32
    %9 = arith.cmpi ne, %8, %c0_i32_3 : i32
    scf.if %9 {
      %c0_i32_16 = arith.constant 0 : i32
      %28 = arith.addi %6, %c0_i32_16 : i32
      %29 = arith.index_cast %28 : i32 to index
      %c0_17 = arith.constant 0 : index
      %c0_18 = arith.constant 0 : index
      %30 = vector.load %arg8[%29, %c0_17, %c0_18] : memref<18x18x4xbf16, #tpu.memory_space<vmem>>, vector<8x16x4xbf16>
      %31 = vector.shape_cast %30 : vector<8x16x4xbf16> to vector<128x4xbf16>
      %c0_19 = arith.constant 0 : index
      %c0_20 = arith.constant 0 : index
      %32 = vector.load %arg9[%c0_19, %c0_20] : memref<128x128xbf16, #tpu.memory_space<vmem>>, vector<128x4xbf16>
      tpu.vector_store %arg9[%c0_19, %c0_20], %31 {strides = array<i32>} : memref<128x128xbf16, #tpu.memory_space<vmem>>, vector<128x4xbf16>,
      %c0_i32_21 = arith.constant 0 : i32
      %33 = arith.addi %6, %c0_i32_21 : i32
      %34 = arith.index_cast %33 : i32 to index
      %c1 = arith.constant 1 : index
      %c0_22 = arith.constant 0 : index
      %35 = vector.load %arg8[%34, %c1, %c0_22] : memref<18x18x4xbf16, #tpu.memory_space<vmem>>, vector<8x16x4xbf16>
      %36 = vector.shape_cast %35 : vector<8x16x4xbf16> to vector<128x4xbf16>
      %c0_23 = arith.constant 0 : index
      %c4 = arith.constant 4 : index
      %37 = vector.load %arg9[%c0_23, %c4] : memref<128x128xbf16, #tpu.memory_space<vmem>>, vector<128x4xbf16>
      tpu.vector_store %arg9[%c0_23, %c4], %36 {strides = array<i32>} : memref<128x128xbf16, #tpu.memory_space<vmem>>, vector<128x4xbf16>,
      %c0_i32_24 = arith.constant 0 : i32
      %38 = arith.addi %6, %c0_i32_24 : i32
      %39 = arith.index_cast %38 : i32 to index
      %c2 = arith.constant 2 : index
      %c0_25 = arith.constant 0 : index
      %40 = vector.load %arg8[%39, %c2, %c0_25] : memref<18x18x4xbf16, #tpu.memory_space<vmem>>, vector<8x16x4xbf16>
      %41 = vector.shape_cast %40 : vector<8x16x4xbf16> to vector<128x4xbf16>
      %c0_26 = arith.constant 0 : index
      %c8 = arith.constant 8 : index
      %42 = vector.load %arg9[%c0_26, %c8] : memref<128x128xbf16, #tpu.memory_space<vmem>>, vector<128x4xbf16>
      tpu.vector_store %arg9[%c0_26, %c8], %41 {strides = array<i32>} : memref<128x128xbf16, #tpu.memory_space<vmem>>, vector<128x4xbf16>,
      %c1_i32 = arith.constant 1 : i32
      %43 = arith.addi %6, %c1_i32 : i32
      %44 = arith.index_cast %43 : i32 to index
      %c0_27 = arith.constant 0 : index
      %c0_28 = arith.constant 0 : index
      %45 = vector.load %arg8[%44, %c0_27, %c0_28] : memref<18x18x4xbf16, #tpu.memory_space<vmem>>, vector<8x16x4xbf16>
      %46 = vector.shape_cast %45 : vector<8x16x4xbf16> to vector<128x4xbf16>
      %c0_29 = arith.constant 0 : index
      %c12 = arith.constant 12 : index
      %47 = vector.load %arg9[%c0_29, %c12] : memref<128x128xbf16, #tpu.memory_space<vmem>>, vector<128x4xbf16>
      tpu.vector_store %arg9[%c0_29, %c12], %46 {strides = array<i32>} : memref<128x128xbf16, #tpu.memory_space<vmem>>, vector<128x4xbf16>,
      %c1_i32_30 = arith.constant 1 : i32
      %48 = arith.addi %6, %c1_i32_30 : i32
      %49 = arith.index_cast %48 : i32 to index
      %c1_31 = arith.constant 1 : index
      %c0_32 = arith.constant 0 : index
      %50 = vector.load %arg8[%49, %c1_31, %c0_32] : memref<18x18x4xbf16, #tpu.memory_space<vmem>>, vector<8x16x4xbf16>
      %51 = vector.shape_cast %50 : vector<8x16x4xbf16> to vector<128x4xbf16>
      %c0_33 = arith.constant 0 : index
      %c16 = arith.constant 16 : index
      %52 = vector.load %arg9[%c0_33, %c16] : memref<128x128xbf16, #tpu.memory_space<vmem>>, vector<128x4xbf16>
      tpu.vector_store %arg9[%c0_33, %c16], %51 {strides = array<i32>} : memref<128x128xbf16, #tpu.memory_space<vmem>>, vector<128x4xbf16>,
      %c1_i32_34 = arith.constant 1 : i32
      %53 = arith.addi %6, %c1_i32_34 : i32
      %54 = arith.index_cast %53 : i32 to index
      %c2_35 = arith.constant 2 : index
      %c0_36 = arith.constant 0 : index
      %55 = vector.load %arg8[%54, %c2_35, %c0_36] : memref<18x18x4xbf16, #tpu.memory_space<vmem>>, vector<8x16x4xbf16>
      %56 = vector.shape_cast %55 : vector<8x16x4xbf16> to vector<128x4xbf16>
      %c0_37 = arith.constant 0 : index
      %c20 = arith.constant 20 : index
      %57 = vector.load %arg9[%c0_37, %c20] : memref<128x128xbf16, #tpu.memory_space<vmem>>, vector<128x4xbf16>
      tpu.vector_store %arg9[%c0_37, %c20], %56 {strides = array<i32>} : memref<128x128xbf16, #tpu.memory_space<vmem>>, vector<128x4xbf16>,
      %c2_i32 = arith.constant 2 : i32
      %58 = arith.addi %6, %c2_i32 : i32
      %59 = arith.index_cast %58 : i32 to index
      %c0_38 = arith.constant 0 : index
      %c0_39 = arith.constant 0 : index
      %60 = vector.load %arg8[%59, %c0_38, %c0_39] : memref<18x18x4xbf16, #tpu.memory_space<vmem>>, vector<8x16x4xbf16>
      %61 = vector.shape_cast %60 : vector<8x16x4xbf16> to vector<128x4xbf16>
      %c0_40 = arith.constant 0 : index
      %c24 = arith.constant 24 : index
      %62 = vector.load %arg9[%c0_40, %c24] : memref<128x128xbf16, #tpu.memory_space<vmem>>, vector<128x4xbf16>
      tpu.vector_store %arg9[%c0_40, %c24], %61 {strides = array<i32>} : memref<128x128xbf16, #tpu.memory_space<vmem>>, vector<128x4xbf16>,
      %c2_i32_41 = arith.constant 2 : i32
      %63 = arith.addi %6, %c2_i32_41 : i32
      %64 = arith.index_cast %63 : i32 to index
      %c1_42 = arith.constant 1 : index
      %c0_43 = arith.constant 0 : index
      %65 = vector.load %arg8[%64, %c1_42, %c0_43] : memref<18x18x4xbf16, #tpu.memory_space<vmem>>, vector<8x16x4xbf16>
      %66 = vector.shape_cast %65 : vector<8x16x4xbf16> to vector<128x4xbf16>
      %c0_44 = arith.constant 0 : index
      %c28 = arith.constant 28 : index
      %67 = vector.load %arg9[%c0_44, %c28] : memref<128x128xbf16, #tpu.memory_space<vmem>>, vector<128x4xbf16>
      tpu.vector_store %arg9[%c0_44, %c28], %66 {strides = array<i32>} : memref<128x128xbf16, #tpu.memory_space<vmem>>, vector<128x4xbf16>,
      %c2_i32_45 = arith.constant 2 : i32
      %68 = arith.addi %6, %c2_i32_45 : i32
      %69 = arith.index_cast %68 : i32 to index
      %c2_46 = arith.constant 2 : index
      %c0_47 = arith.constant 0 : index
      %70 = vector.load %arg8[%69, %c2_46, %c0_47] : memref<18x18x4xbf16, #tpu.memory_space<vmem>>, vector<8x16x4xbf16>
      %71 = vector.shape_cast %70 : vector<8x16x4xbf16> to vector<128x4xbf16>
      %c0_48 = arith.constant 0 : index
      %c32 = arith.constant 32 : index
      %72 = vector.load %arg9[%c0_48, %c32] : memref<128x128xbf16, #tpu.memory_space<vmem>>, vector<128x4xbf16>
      tpu.vector_store %arg9[%c0_48, %c32], %71 {strides = array<i32>} : memref<128x128xbf16, #tpu.memory_space<vmem>>, vector<128x4xbf16>,
    } else {
    }
    %c0 = arith.constant 0 : index
    %c0_4 = arith.constant 0 : index
    %10 = vector.load %arg9[%c0, %c0_4] : memref<128x128xbf16, #tpu.memory_space<vmem>>, vector<128x128xbf16>
    %c0_5 = arith.constant 0 : index
    %c0_6 = arith.constant 0 : index
    %11 = vector.load %arg4[%c0_5, %c0_6] : memref<128x128xbf16, #tpu.memory_space<vmem>>, vector<128x128xbf16>
    %cst = arith.constant dense<0.000000e+00> : vector<128x128xf32>
    %12 = tpu.matmul %10, %11, %cst {dimension_numbers = #tpu.dot_dimension_numbers<[1], [0], [0], [1], [0, 0, 1, 1], [], []>} : vector<128x128xbf16>, vector<128x128xbf16>, vector<128x128xf32> -> vector<128x128xf32>
    %c0_7 = arith.constant 0 : index
    %c0_8 = arith.constant 0 : index
    %13 = vector.load %arg5[%c0_7, %c0_8] : memref<1x128xf32, #tpu.memory_space<vmem>>, vector<1x128xf32>
    %14 = vector.broadcast %13 : vector<1x128xf32> to vector<128x128xf32>
    %15 = arith.mulf %12, %14 : vector<128x128xf32>
    %c0_9 = arith.constant 0 : index
    %c0_10 = arith.constant 0 : index
    %16 = vector.load %arg6[%c0_9, %c0_10] : memref<1x128xf32, #tpu.memory_space<vmem>>, vector<1x128xf32>
    %17 = vector.broadcast %16 : vector<1x128xf32> to vector<128x128xf32>
    %18 = arith.addf %15, %17 : vector<128x128xf32>
    %19 = arith.negf %18 : vector<128x128xf32>
    %20 = math.exp %19 : vector<128x128xf32>
    %cst_11 = arith.constant 1.000000e+00 : f32
    %21 = vector.broadcast %cst_11 : f32 to vector<128x128xf32>
    %22 = arith.addf %21, %20 : vector<128x128xf32>
    %23 = arith.divf %21, %22 : vector<128x128xf32>
    %24 = arith.mulf %18, %23 : vector<128x128xf32>
    %25 = vector.shape_cast %24 : vector<128x128xf32> to vector<1x8x16x128xf32>
    %26 = arith.truncf %25 : vector<1x8x16x128xf32> to vector<1x8x16x128xbf16>
    %c0_12 = arith.constant 0 : index
    %c0_13 = arith.constant 0 : index
    %c0_14 = arith.constant 0 : index
    %c0_15 = arith.constant 0 : index
    %27 = vector.load %arg7[%c0_12, %c0_13, %c0_14, %c0_15] : memref<1x8x16x128xbf16, #tpu.memory_space<vmem>>, vector<1x8x16x128xbf16>
    tpu.vector_store %arg7[%c0_12, %c0_13, %c0_14, %c0_15], %26 {strides = array<i32>} : memref<1x8x16x128xbf16, #tpu.memory_space<vmem>>, vector<1x8x16x128xbf16>,
    return
  }
  func.func @transform_0(%arg0: i32, %arg1: i32, %arg2: i32) -> (i32, i32, i32, i32) {
    %c0_i32 = arith.constant 0 : i32
    %c0_i32_0 = arith.constant 0 : i32
    %c0_i32_1 = arith.constant 0 : i32
    %c0_i32_2 = arith.constant 0 : i32
    return %arg0, %c0_i32, %c0_i32_0, %c0_i32_1 : i32, i32, i32, i32
  }
  func.func @transform_1(%arg0: i32, %arg1: i32, %arg2: i32) -> (i32, i32) {
    %c0_i32 = arith.constant 0 : i32
    %c0_i32_0 = arith.constant 0 : i32
    return %c0_i32, %arg2 : i32, i32
  }
  func.func @transform_2(%arg0: i32, %arg1: i32, %arg2: i32) -> (i32, i32) {
    %c0_i32 = arith.constant 0 : i32
    %c0_i32_0 = arith.constant 0 : i32
    return %c0_i32, %arg2 : i32, i32
  }
  func.func @transform_3(%arg0: i32, %arg1: i32, %arg2: i32) -> (i32, i32) {
    %c0_i32 = arith.constant 0 : i32
    %c0_i32_0 = arith.constant 0 : i32
    return %c0_i32, %arg2 : i32, i32
  }
  func.func @transform_4(%arg0: i32, %arg1: i32, %arg2: i32) -> (i32, i32, i32, i32) {
    %c0_i32 = arith.constant 0 : i32
    %c0_i32_0 = arith.constant 0 : i32
    return %arg0, %arg1, %c0_i32, %arg2 : i32, i32, i32, i32
  }
}

</mosaic_0001>

<bundles_post_ra>
// kernel: tpu_custom_call.1
= control target key start
LH: loop header
LB: loop body
LE: loop exit
PB: predicated region body
PF: predicated region fallthrough
CT: control target
= control target key end

     0   :  { %9 = vsyncpa [#allocation5], 0  ;;  %s4994_s0 = inlined_call_operand.vmem [shape: bf16[2,16,16,4], index: 0, kind: input, shape index: {}]   ;;  %s4995_s1 = inlined_call_operand.vmem [shape: bf16[128,128], index: 1, kind: input, shape index: {}]   ;;  %s4996_s2 = inlined_call_operand.vmem [shape: f32[1,128], index: 2, kind: input, shape index: {}]   ;;  %s4997_s3 = inlined_call_operand.vmem [shape: f32[1,128], index: 3, kind: input, shape index: {}]   ;;  %s4998_s4 = inlined_call_operand.hbm [shape: bf16[2,16,16,128], index: 4, kind: output, shape index: {}]  }
   0x1   :  { %11 = vsyncpa [#allocation5 + $0x1], 0  ;;  %s3726_s15 = smov 0   ;;  %s3728_s16 = smov 0  }
   0x2   :  { %s3730_s17 = smov 0   ;;  %s3732_s18 = smov 0  }
   0x3   :  { %s3734_s19 = smov 0   ;;  %s3736_s20 = smov 0  }
   0x4   :  { %s3738_s21 = smov 0   ;;  %s3740_s22 = smov 0  }
   0x5 LB: > { %s3076_s23 = sadd.s32 4294967295, %s3688_s22   ;;  %s3077_s24 = sadd.s32 4294967294, %s3688_s22   ;;  %s3688_s22 = sphi %s3740_s22, %s17_s22   ;;  %s3684_s21 = sphi %s3738_s21, %s5019_s21   ;;  %s3680_s20 = sphi %s3736_s20, %s5018_s20   ;;  %s3676_s19 = sphi %s3734_s19, %s5017_s19   ;;  %s3672_s18 = sphi %s3732_s18, %s5016_s18   ;;  %s3668_s17 = sphi %s3730_s17, %s5015_s17   ;;  %s3664_s16 = sphi %s3728_s16, %s5014_s16   ;;  %s3660_s15 = sphi %s3726_s15, %s5013_s15  }
   0x6   : > { %s32_s25 = sadd.s32 1, %s3680_s20  ;;  %s36_s26 = sadd.s32 1, %s3684_s21 }
   0x7   : > { %p34_p0 = scmp.ge.s32.totalorder %s32_s25, 2  ;;  %p161_p1 = scmp.ne.s32.totalorder %s3668_s17, %s3664_s16 }
   0x8   : > { %p162_p2 = scmp.eq.s32.totalorder %s3076_s23, 3  ;;  %p167_p5 = scmp.ne.s32.totalorder %s3664_s16, %s3660_s15 }
   0x9   : > { %s5021_s25 = smov (%p34_p0, %s32_s25), 0  ;;  %s5023_s26 = smov (!%p34_p0, %s36_s26), %s3684_s21 }
   0xa   : > { %s145_s27 = ssub.s32 %s3680_s20, %s5021_s25  ;;  %p3777_p3 = por %p162_p2, %p161_p1 }
   0xb   : > { %p38_p4 = scmp.ge.s32.totalorder %s5023_s26, 2  ;;  %p168_p6 = scmp.eq.s32.totalorder %s3077_s24, 3 }
   0xc   : > { %p3083_p7 = scmp.ge.s32.totalorder %s3688_s22, 1  ;;  %p213_p9 = scmp.lt.s32.totalorder %s3688_s22, 5 }
   0xd   : > { %s5025_s26 = smov (%p38_p4, %s5023_s26), 0  ;;  %p3786_p8 = por %p168_p6, %p167_p5 }
   0xe   : > { %s144_s30 = ssub.s32 %s3684_s21, %s5025_s26  ;;  %s151_s5 = sadd.s32 1, %s3668_s17 }
   0xf   : > { %s146_s6 = sor.u32 %s145_s27, %s144_s30  ;;  %p214_p10 = pnand %p3083_p7, %p213_p9 }
  0x10   : > { %p149_p11 = scmp.eq.s32.totalorder %s146_s6, 0  ;;  %s246_s8 = sand.u32 (!%p214_p10), 1, %s3664_s16  }
  0x11   : > { %217 = sbr.rel (%p214_p10) target bundleno = 769 (0x301), region = 36  ;;  %p249_p12 = scmp.lt.s32.totalorder (!%p214_p10), %s3676_s19, 1 }
  0x12   : > { %s3795_s7 = scalar_select %p149_p11, %s3668_s17, %s151_s5  }
  0x13   : > { %s3084_s9 = sshll.u32 (!%p214_p10), %s246_s8, 6  ;;  %p266_p13 = scmp.eq.s32.totalorder (!%p214_p10), %s3672_s18, 0 }
  0x14   : > { %s3808_s23 = scalar_lea.vmem (!%p214_p10), [#allocation4], %s3084_s9 }
  0x16   : > { %s250_s10 = scalar_select %p249_p12, %s3676_s19, 1  ;;  %vm275_vm0 = vcmask (%p266_p13), 24576   ;;  %vm283_vm1 = vsmask.f32 (%p266_p13), 256  ;;  %v285_v0 = vld [vmem:[#allocation2 + $0xc] sm:$0x1] (%p266_p13) }
  0x17   : > { %271 = sbr.rel (!%p266_p13) target bundleno = 124 (0x7c), region = 40  ;;  %vm272_vm2 = vcmask (%p266_p13), 27648   ;;  %vm3812_vm3 = vmand (%p266_p13), %vm275_vm0, %vm283_vm1  ;;  %v288_v2 = vld [vmem:[#allocation2 + $0x18] sm:$0x1] (%p266_p13)  ;;  %v291_v3 = vld [vmem:[#allocation2 + $0x24] sm:$0x1] (%p266_p13) }
  0x18   : > { %s3304_s11 = sshll.u32 %s250_s10, 7  ;;  %vm333_vm4 = vsmask.f32 (%p266_p13), 7938  ;;  %v286_v4 = vsel (%p266_p13), %vm3812_vm3, 0, %v285_v0  ;;  %v289_v5 = vsel (%p266_p13), %vm3812_vm3, 0, %v288_v2  ;;  %v292_v6 = vsel (%p266_p13), %vm3812_vm3, 0, %v291_v3 }
  0x19   : > { %s3806_s14 = scalar_lea.vmem %s4994_s0, %s3304_s11  ;;  %v294_v7 = vld [vmem:[#allocation2 + $0x30] sm:$0x1] (%p266_p13)  ;;  %287 = vst [vmem:[#allocation2 + $0xc] sm:$0x1] (%p266_p13), %v286_v4  ;;  %290 = vst [vmem:[#allocation2 + $0x18] sm:$0x1] (%p266_p13), %v289_v5 }
  0x1a   : > { %293 = vst [vmem:[#allocation2 + $0x24] sm:$0x1] (%p266_p13), %v292_v6  ;;  %v295_v8 = vsel (%p266_p13), %vm3812_vm3, 0, %v294_v7  ;;  %v297_v9 = vld [vmem:[#allocation2 + $0x3c] sm:$0x1] (%p266_p13)  ;;  %v3690_v11 = vmov (%p266_p13), 0   ;;  %vm3864_vm6 = vmand (%p266_p13), %vm275_vm0, %vm333_vm4 }
  0x1b   : > { %v300_v10 = vld [vmem:[#allocation2 + $0x48] sm:$0x1] (%p266_p13)  ;;  %273 = vst.msk [vmem:[#allocation2] sm:$0xf] (%p266_p13), %vm272_vm2, %v3690_v11  ;;  %274 = vst.msk [vmem:[#allocation2 + $0x4] sm:$0xf] (%p266_p13), %vm272_vm2, %v3690_v11 }
  0x1c   : > { %276 = vst.msk [vmem:[#allocation2 + $0x8] sm:$0x1] %vm275_vm0, %v3690_v11  ;;  %280 = vst.msk [vmem:[#allocation2 + $0xd4] sm:$0x1] %vm275_vm0, %v3690_v11  ;;  %vm851_vm5 = vcmask 1043744   ;;  %v298_v12 = vsel %vm3812_vm3, 0, %v297_v9 }
  0x1d   : > { %278 = vst.msk [vmem:[#allocation2 + $0xcc] sm:$0xf] %vm272_vm2, %v3690_v11  ;;  %279 = vst.msk [vmem:[#allocation2 + $0xd0] sm:$0xf] %vm272_vm2, %v3690_v11  ;;  %v301_v13 = vsel %vm3812_vm3, 0, %v300_v10 }
  0x1e   : > { %296 = vst [vmem:[#allocation2 + $0x30] sm:$0x1] %v295_v8  ;;  %v303_v14 = vld [vmem:[#allocation2 + $0x54] sm:$0x1]  ;;  %v306_v15 = vld [vmem:[#allocation2 + $0x60] sm:$0x1]  ;;  %vm3913_vm8 = vmand %vm272_vm2, %vm333_vm4 }
  0x1f   : > { %852 = vst.msk [vmem:[#allocation3] sm:$0xf] %vm851_vm5, %v3690_v11  ;;  %853 = vst.msk [vmem:[#allocation3 + $0x4] sm:$0xf] %vm851_vm5, %v3690_v11  ;;  %v304_v16 = vsel %vm3812_vm3, 0, %v303_v14  ;;  %v307_v17 = vsel %vm3812_vm3, 0, %v306_v15 }
  0x20   : > { %854 = vst.msk [vmem:[#allocation3 + $0x8] sm:$0xf] %vm851_vm5, %v3690_v11  ;;  %855 = vst.msk [vmem:[#allocation3 + $0xc] sm:$0xf] %vm851_vm5, %v3690_v11  ;;  %v309_v18 = vld [vmem:[#allocation2 + $0x6c] sm:$0x1] }
  0x21   : > { %856 = vst.msk [vmem:[#allocation3 + $0x10] sm:$0xf] %vm851_vm5, %v3690_v11  ;;  %857 = vst.msk [vmem:[#allocation3 + $0x14] sm:$0xf] %vm851_vm5, %v3690_v11  ;;  %v312_v19 = vld [vmem:[#allocation2 + $0x78] sm:$0x1] }
  0x22   : > { %858 = vst.msk [vmem:[#allocation3 + $0x18] sm:$0xf] %vm851_vm5, %v3690_v11  ;;  %859 = vst.msk [vmem:[#allocation3 + $0x1c] sm:$0xf] %vm851_vm5, %v3690_v11  ;;  %v310_v20 = vsel %vm3812_vm3, 0, %v309_v18  ;;  %v313_v21 = vsel %vm3812_vm3, 0, %v312_v19 }
  0x23   : > { %860 = vst.msk [vmem:[#allocation3 + $0x20] sm:$0xf] %vm851_vm5, %v3690_v11  ;;  %861 = vst.msk [vmem:[#allocation3 + $0x24] sm:$0xf] %vm851_vm5, %v3690_v11  ;;  %v315_v22 = vld [vmem:[#allocation2 + $0x84] sm:$0x1] }
  0x24   : > { %862 = vst.msk [vmem:[#allocation3 + $0x28] sm:$0xf] %vm851_vm5, %v3690_v11  ;;  %863 = vst.msk [vmem:[#allocation3 + $0x2c] sm:$0xf] %vm851_vm5, %v3690_v11  ;;  %v318_v23 = vld [vmem:[#allocation2 + $0x90] sm:$0x1] }
  0x25   : > { %864 = vst.msk [vmem:[#allocation3 + $0x30] sm:$0xf] %vm851_vm5, %v3690_v11  ;;  %865 = vst.msk [vmem:[#allocation3 + $0x34] sm:$0xf] %vm851_vm5, %v3690_v11  ;;  %v316_v24 = vsel %vm3812_vm3, 0, %v315_v22  ;;  %v319_v25 = vsel %vm3812_vm3, 0, %v318_v23 }
  0x26   : > { %866 = vst.msk [vmem:[#allocation3 + $0x38] sm:$0xf] %vm851_vm5, %v3690_v11  ;;  %867 = vst.msk [vmem:[#allocation3 + $0x3c] sm:$0xf] %vm851_vm5, %v3690_v11  ;;  %v321_v26 = vld [vmem:[#allocation2 + $0x9c] sm:$0x1] }
  0x27   : > { %299 = vst [vmem:[#allocation2 + $0x3c] sm:$0x1] %v298_v12  ;;  %302 = vst [vmem:[#allocation2 + $0x48] sm:$0x1] %v301_v13  ;;  %v324_v27 = vld [vmem:[#allocation2 + $0xa8] sm:$0x1] }
  0x28   : > { %305 = vst [vmem:[#allocation2 + $0x54] sm:$0x1] %v304_v16  ;;  %308 = vst [vmem:[#allocation2 + $0x60] sm:$0x1] %v307_v17  ;;  %v322_v29 = vsel %vm3812_vm3, 0, %v321_v26  ;;  %v325_v30 = vsel %vm3812_vm3, 0, %v324_v27 }
  0x29   : > { %311 = vst [vmem:[#allocation2 + $0x6c] sm:$0x1] %v310_v20  ;;  %314 = vst [vmem:[#allocation2 + $0x78] sm:$0x1] %v313_v21  ;;  %v327_v31 = vld [vmem:[#allocation2 + $0xb4] sm:$0x1] }
  0x2a   : > { %317 = vst [vmem:[#allocation2 + $0x84] sm:$0x1] %v316_v24  ;;  %320 = vst [vmem:[#allocation2 + $0x90] sm:$0x1] %v319_v25  ;;  %v330_v32 = vld [vmem:[#allocation2 + $0xc0] sm:$0x1] }
  0x2b   : > { %323 = vst [vmem:[#allocation2 + $0x9c] sm:$0x1] %v322_v29  ;;  %326 = vst [vmem:[#allocation2 + $0xa8] sm:$0x1] %v325_v30  ;;  %v328_v33 = vsel %vm3812_vm3, 0, %v327_v31  ;;  %v331_v34 = vsel %vm3812_vm3, 0, %v330_v32 }
  0x2c   : > { %v335_v35 = vld [vmem:[#allocation2 + $0x14] sm:$0x1]  ;;  %v338_v36 = vld [vmem:[#allocation2 + $0x20] sm:$0x1]  ;;  %329 = vst [vmem:[#allocation2 + $0xb4] sm:$0x1] %v328_v33 }
  0x2d   : > { %332 = vst [vmem:[#allocation2 + $0xc0] sm:$0x1] %v331_v34  ;;  %v336_v37 = vsel %vm3864_vm6, 0, %v335_v35  ;;  %v339_v38 = vsel %vm3864_vm6, 0, %v338_v36  ;;  %v341_v39 = vld [vmem:[#allocation2 + $0x2c] sm:$0x1] }
  0x2e   : > { %v344_v40 = vld [vmem:[#allocation2 + $0x38] sm:$0x1]  ;;  %337 = vst [vmem:[#allocation2 + $0x14] sm:$0x1] %v336_v37  ;;  %340 = vst [vmem:[#allocation2 + $0x20] sm:$0x1] %v339_v38 }
  0x2f   : > { %v342_v41 = vsel %vm3864_vm6, 0, %v341_v39  ;;  %v345_v42 = vsel %vm3864_vm6, 0, %v344_v40  ;;  %v347_v43 = vld [vmem:[#allocation2 + $0x44] sm:$0x1]  ;;  %v350_v44 = vld [vmem:[#allocation2 + $0x50] sm:$0x1] }
  0x30   : > { %343 = vst [vmem:[#allocation2 + $0x2c] sm:$0x1] %v342_v41  ;;  %346 = vst [vmem:[#allocation2 + $0x38] sm:$0x1] %v345_v42  ;;  %v348_v45 = vsel %vm3864_vm6, 0, %v347_v43  ;;  %v351_v46 = vsel %vm3864_vm6, 0, %v350_v44 }
  0x31   : > { %v353_v47 = vld [vmem:[#allocation2 + $0x5c] sm:$0x1]  ;;  %v356_v48 = vld [vmem:[#allocation2 + $0x68] sm:$0x1]  ;;  %349 = vst [vmem:[#allocation2 + $0x44] sm:$0x1] %v348_v45 }
  0x32   : > { %352 = vst [vmem:[#allocation2 + $0x50] sm:$0x1] %v351_v46  ;;  %v354_v49 = vsel %vm3864_vm6, 0, %v353_v47  ;;  %v357_v50 = vsel %vm3864_vm6, 0, %v356_v48  ;;  %v359_v51 = vld [vmem:[#allocation2 + $0x74] sm:$0x1] }
  0x33   : > { %v362_v52 = vld [vmem:[#allocation2 + $0x80] sm:$0x1]  ;;  %355 = vst [vmem:[#allocation2 + $0x5c] sm:$0x1] %v354_v49  ;;  %358 = vst [vmem:[#allocation2 + $0x68] sm:$0x1] %v357_v50 }
  0x34   : > { %v360_v53 = vsel %vm3864_vm6, 0, %v359_v51  ;;  %v363_v54 = vsel %vm3864_vm6, 0, %v362_v52  ;;  %v365_v55 = vld [vmem:[#allocation2 + $0x8c] sm:$0x1]  ;;  %v368_v56 = vld [vmem:[#allocation2 + $0x98] sm:$0x1] }
  0x35   : > { %361 = vst [vmem:[#allocation2 + $0x74] sm:$0x1] %v360_v53  ;;  %364 = vst [vmem:[#allocation2 + $0x80] sm:$0x1] %v363_v54  ;;  %v366_v57 = vsel %vm3864_vm6, 0, %v365_v55  ;;  %v369_v58 = vsel %vm3864_vm6, 0, %v368_v56 }
  0x36   : > { %v371_v59 = vld [vmem:[#allocation2 + $0xa4] sm:$0x1]  ;;  %v374_v60 = vld [vmem:[#allocation2 + $0xb0] sm:$0x1]  ;;  %367 = vst [vmem:[#allocation2 + $0x8c] sm:$0x1] %v366_v57 }
  0x37   : > { %370 = vst [vmem:[#allocation2 + $0x98] sm:$0x1] %v369_v58  ;;  %v372_v61 = vsel %vm3864_vm6, 0, %v371_v59  ;;  %v375_v62 = vsel %vm3864_vm6, 0, %v374_v60  ;;  %v377_v63 = vld [vmem:[#allocation2 + $0xbc] sm:$0x1] }
  0x38   : > { %v380_v0 = vld [vmem:[#allocation2 + $0xc8] sm:$0x1]  ;;  %373 = vst [vmem:[#allocation2 + $0xa4] sm:$0x1] %v372_v61  ;;  %376 = vst [vmem:[#allocation2 + $0xb0] sm:$0x1] %v375_v62 }
  0x39   : > { %v378_v2 = vsel %vm3864_vm6, 0, %v377_v63  ;;  %v381_v3 = vsel %vm3864_vm6, 0, %v380_v0  ;;  %v383_v4 = vld [vmem:[%s3806_s14] sm:$0xf]  ;;  %v384_v7 = vld [vmem:[%s3806_s14 + $0x4] sm:$0xf] }
  0x3a   : > { %379 = vst [vmem:[#allocation2 + $0xbc] sm:$0x1] %v378_v2  ;;  %382 = vst [vmem:[#allocation2 + $0xc8] sm:$0x1] %v381_v3  ;;  %v418_v5 = vshrl.u32 %v383_v4, 16  ;;  %v421_v6 = vshll.u32 %v383_v4, 16 }
  0x3b   : > { %vm415_vm7 = vsmask.f32 4368  ;;  %v426_v8 = vshrl.u32 %v384_v7, 16  ;;  %v429_v9 = vshll.u32 %v384_v7, 16  ;;  %v385_v10 = vld [vmem:[%s3806_s14 + $0x8] sm:$0xf] }
  0x3c   : > { %v420_v11 = vrot.slane %v418_v5, 7  ;;  %v739_v12 = vld [vmem:[#allocation2 + $0xc] sm:$0xf]  ;;  %v435_v13 = vshrl.u32 %v385_v10, 16  ;;  %v438_v14 = vshll.u32 %v385_v10, 16  ;;  %vm3919_vm9 = vmor %vm283_vm1, %vm415_vm7 }
  0x3d   : > { %v428_v16 = vrot.slane %v426_v8, 7  ;;  %v743_v17 = vld [vmem:[#allocation2 + $0x14] sm:$0x1]  ;;  %v386_v18 = vld [vmem:[%s3806_s14 + $0xc] sm:$0xf] }
  0x3e   : > { %v423_v19 = vor.u32 %v421_v6, %v420_v11  ;;  %v424_v21 = vrot.slane %v420_v11, 4  ;;  %v437_v22 = vrot.slane %v435_v13, 7  ;;  %v443_v23 = vshrl.u32 %v386_v18, 16  ;;  %v387_v24 = vld [vmem:[%s3806_s14 + $0x10] sm:$0xf] }
  0x3f   : > { %v431_v25 = vor.u32 %v429_v9, %v428_v16  ;;  %v433_v26 = vrot.slane %v428_v16, 4  ;;  %v746_v27 = vld [vmem:[#allocation2 + $0x18] sm:$0xf]  ;;  %v446_v28 = vshll.u32 %v386_v18, 16  ;;  %v452_v29 = vshrl.u32 %v387_v24, 16 }
  0x40   : > { %v740_v30 = vsel %vm3913_vm8, %v423_v19, %v739_v12  ;;  %v440_v31 = vor.u32 %v438_v14, %v437_v22  ;;  %v441_v32 = vrot.slane %v437_v22, 4  ;;  %v445_v33 = vrot.slane %v443_v23, 7  ;;  %v388_v34 = vld [vmem:[%s3806_s14 + $0x14] sm:$0xf]  ;;  %v750_v37 = vld [vmem:[#allocation2 + $0x20] sm:$0x1] }
  0x41   : > { %741 = vst [vmem:[#allocation2 + $0xc] sm:$0xf] %v740_v30  ;;  %v432_v35 = vsel %vm3919_vm9, %v424_v21, %v431_v25  ;;  %v744_v36 = vsel %vm3812_vm3, %v433_v26, %v743_v17  ;;  %v454_v38 = vrot.slane %v452_v29, 7  ;;  %v455_v39 = vshll.u32 %v387_v24, 16  ;;  %v389_v40 = vld [vmem:[%s3806_s14 + $0x18] sm:$0xf] }
  0x42   : > { %742 = vst.msk [vmem:[#allocation2 + $0x10] sm:$0xf] %vm272_vm2, %v432_v35  ;;  %745 = vst [vmem:[#allocation2 + $0x14] sm:$0x1] %v744_v36  ;;  %v747_v41 = vsel %vm3913_vm8, %v440_v31, %v746_v27  ;;  %v448_v42 = vor.u32 %v446_v28, %v445_v33  ;;  %v450_v43 = vrot.slane %v445_v33, 4  ;;  %v460_v45 = vshrl.u32 %v388_v34, 16 }
  0x43   : > { %v753_v44 = vld [vmem:[#allocation2 + $0x24] sm:$0xf]  ;;  %v390_v46 = vld [vmem:[%s3806_s14 + $0x1c] sm:$0xf]  ;;  %748 = vst [vmem:[#allocation2 + $0x18] sm:$0xf] %v747_v41  ;;  %v457_v47 = vor.u32 %v455_v39, %v454_v38 }
  0x44   : > { %v458_v48 = vrot.slane %v454_v38, 4  ;;  %v463_v49 = vshll.u32 %v388_v34, 16  ;;  %v469_v50 = vshrl.u32 %v389_v40, 16  ;;  %v391_v51 = vld [vmem:[%s3806_s14 + $0x20] sm:$0xf]  ;;  %v449_v52 = vsel %vm3919_vm9, %v441_v32, %v448_v42 }
  0x45   : > { %v751_v53 = vsel %vm3812_vm3, %v450_v43, %v750_v37  ;;  %v462_v54 = vrot.slane %v460_v45, 7  ;;  %v472_v55 = vshll.u32 %v389_v40, 16  ;;  %v392_v56 = vld [vmem:[%s3806_s14 + $0x24] sm:$0xf]  ;;  %749 = vst.msk [vmem:[#allocation2 + $0x1c] sm:$0xf] %vm272_vm2, %v449_v52  ;;  %v754_v57 = vsel %vm3913_vm8, %v457_v47, %v753_v44 }
  0x46   : > { %752 = vst [vmem:[#allocation2 + $0x20] sm:$0x1] %v751_v53  ;;  %v757_v58 = vld [vmem:[#allocation2 + $0x2c] sm:$0x1]  ;;  %v471_v59 = vrot.slane %v469_v50, 7  ;;  %v477_v60 = vshrl.u32 %v390_v46, 16 }
  0x47   : > { %v480_v61 = vshll.u32 %v390_v46, 16  ;;  %755 = vst [vmem:[#allocation2 + $0x24] sm:$0xf] %v754_v57  ;;  %v465_v62 = vor.u32 %v463_v49, %v462_v54  ;;  %v467_v63 = vrot.slane %v462_v54, 4  ;;  %v760_v0 = vld [vmem:[#allocation2 + $0x30] sm:$0xf] }
  0x48   : > { %v486_v2 = vshrl.u32 %v391_v51, 16  ;;  %v489_v3 = vshll.u32 %v391_v51, 16  ;;  %v474_v4 = vor.u32 %v472_v55, %v471_v59  ;;  %v475_v5 = vrot.slane %v471_v59, 4  ;;  %v393_v8 = vld [vmem:[%s3806_s14 + $0x28] sm:$0xf] }
  0x49   : > { %v479_v6 = vrot.slane %v477_v60, 7  ;;  %v494_v7 = vshrl.u32 %v392_v56, 16  ;;  %v466_v9 = vsel %vm3919_vm9, %v458_v48, %v465_v62  ;;  %v758_v10 = vsel %vm3812_vm3, %v467_v63, %v757_v58  ;;  %v764_v11 = vld [vmem:[#allocation2 + $0x38] sm:$0x1]  ;;  %v767_v13 = vld [vmem:[#allocation2 + $0x3c] sm:$0xf] }
  0x4a   : > { %v488_v12 = vrot.slane %v486_v2, 7  ;;  %v497_v14 = vshll.u32 %v392_v56, 16  ;;  %756 = vst.msk [vmem:[#allocation2 + $0x28] sm:$0xf] %vm272_vm2, %v466_v9  ;;  %759 = vst [vmem:[#allocation2 + $0x2c] sm:$0x1] %v758_v10  ;;  %v761_v16 = vsel %vm3913_vm8, %v474_v4, %v760_v0 }
  0x4b   : > { %v482_v17 = vor.u32 %v480_v61, %v479_v6  ;;  %v484_v18 = vrot.slane %v479_v6, 4  ;;  %v496_v19 = vrot.slane %v494_v7, 7  ;;  %v771_v21 = vld [vmem:[#allocation2 + $0x44] sm:$0x1]  ;;  %v394_v22 = vld [vmem:[%s3806_s14 + $0x2c] sm:$0xf] }
  0x4c   : > { %762 = vst [vmem:[#allocation2 + $0x30] sm:$0xf] %v761_v16  ;;  %v491_v23 = vor.u32 %v489_v3, %v488_v12  ;;  %v492_v24 = vrot.slane %v488_v12, 4  ;;  %v503_v25 = vshrl.u32 %v393_v8, 16  ;;  %v506_v26 = vshll.u32 %v393_v8, 16 }
  0x4d   : > { %v395_v27 = vld [vmem:[%s3806_s14 + $0x30] sm:$0xf]  ;;  %v483_v28 = vsel %vm3919_vm9, %v475_v5, %v482_v17  ;;  %v765_v29 = vsel %vm3812_vm3, %v484_v18, %v764_v11  ;;  %v499_v30 = vor.u32 %v497_v14, %v496_v19  ;;  %v501_v31 = vrot.slane %v496_v19, 4  ;;  %v396_v32 = vld [vmem:[%s3806_s14 + $0x34] sm:$0xf] }
  0x4e   : > { %763 = vst.msk [vmem:[#allocation2 + $0x34] sm:$0xf] %vm272_vm2, %v483_v28  ;;  %766 = vst [vmem:[#allocation2 + $0x38] sm:$0x1] %v765_v29  ;;  %v768_v33 = vsel %vm3913_vm8, %v491_v23, %v767_v13  ;;  %v505_v34 = vrot.slane %v503_v25, 7  ;;  %v511_v35 = vshrl.u32 %v394_v22, 16 }
  0x4f   : > { %v514_v36 = vshll.u32 %v394_v22, 16  ;;  %v397_v37 = vld [vmem:[%s3806_s14 + $0x38] sm:$0xf]  ;;  %769 = vst [vmem:[#allocation2 + $0x3c] sm:$0xf] %v768_v33  ;;  %v500_v38 = vsel %vm3919_vm9, %v492_v24, %v499_v30  ;;  %v772_v39 = vsel %vm3812_vm3, %v501_v31, %v771_v21  ;;  %v520_v41 = vshrl.u32 %v395_v27, 16 }
  0x50   : > { %v774_v40 = vld [vmem:[#allocation2 + $0x48] sm:$0xf]  ;;  %v523_v42 = vshll.u32 %v395_v27, 16  ;;  %770 = vst.msk [vmem:[#allocation2 + $0x40] sm:$0xf] %vm272_vm2, %v500_v38  ;;  %v508_v43 = vor.u32 %v506_v26, %v505_v34  ;;  %v509_v44 = vrot.slane %v505_v34, 4 }
  0x51   : > { %773 = vst [vmem:[#allocation2 + $0x44] sm:$0x1] %v772_v39  ;;  %v513_v45 = vrot.slane %v511_v35, 7  ;;  %v528_v46 = vshrl.u32 %v396_v32, 16  ;;  %v398_v47 = vld [vmem:[%s3806_s14 + $0x3c] sm:$0xf] }
  0x52   : > { %v778_v48 = vld [vmem:[#allocation2 + $0x50] sm:$0x1]  ;;  %v522_v49 = vrot.slane %v520_v41, 7  ;;  %v531_v50 = vshll.u32 %v396_v32, 16  ;;  %v537_v51 = vshrl.u32 %v397_v37, 16  ;;  %v540_v52 = vshll.u32 %v397_v37, 16 }
  0x53   : > { %v775_v53 = vsel %vm3913_vm8, %v508_v43, %v774_v40  ;;  %v516_v54 = vor.u32 %v514_v36, %v513_v45  ;;  %v518_v55 = vrot.slane %v513_v45, 4  ;;  %v781_v56 = vld [vmem:[#allocation2 + $0x54] sm:$0xf]  ;;  %v530_v57 = vrot.slane %v528_v46, 7  ;;  %v785_v58 = vld [vmem:[#allocation2 + $0x5c] sm:$0x1] }
  0x54   : > { %776 = vst [vmem:[#allocation2 + $0x48] sm:$0xf] %v775_v53  ;;  %v525_v59 = vor.u32 %v523_v42, %v522_v49  ;;  %v526_v60 = vrot.slane %v522_v49, 4  ;;  %v539_v61 = vrot.slane %v537_v51, 7  ;;  %v545_v62 = vshrl.u32 %v398_v47, 16 }
  0x55   : > { %v399_v63 = vld [vmem:[%s3806_s14 + $0x40] sm:$0xf]  ;;  %v517_v0 = vsel %vm3919_vm9, %v509_v44, %v516_v54  ;;  %v779_v2 = vsel %vm3812_vm3, %v518_v55, %v778_v48  ;;  %v533_v3 = vor.u32 %v531_v50, %v530_v57  ;;  %v535_v4 = vrot.slane %v530_v57, 4  ;;  %v400_v6 = vld [vmem:[%s3806_s14 + $0x44] sm:$0xf] }
  0x56   : > { %v788_v5 = vld [vmem:[#allocation2 + $0x60] sm:$0xf]  ;;  %777 = vst.msk [vmem:[#allocation2 + $0x4c] sm:$0xf] %vm272_vm2, %v517_v0  ;;  %780 = vst [vmem:[#allocation2 + $0x50] sm:$0x1] %v779_v2  ;;  %v782_v7 = vsel %vm3913_vm8, %v525_v59, %v781_v56  ;;  %v542_v8 = vor.u32 %v540_v52, %v539_v61 }
  0x57   : > { %v543_v9 = vrot.slane %v539_v61, 4  ;;  %v547_v10 = vrot.slane %v545_v62, 7  ;;  %v401_v11 = vld [vmem:[%s3806_s14 + $0x48] sm:$0xf]  ;;  %783 = vst [vmem:[#allocation2 + $0x54] sm:$0xf] %v782_v7  ;;  %v534_v12 = vsel %vm3919_vm9, %v526_v60, %v533_v3  ;;  %v786_v13 = vsel %vm3812_vm3, %v535_v4, %v785_v58 }
  0x58   : > { %v548_v14 = vshll.u32 %v398_v47, 16  ;;  %v792_v16 = vld [vmem:[#allocation2 + $0x68] sm:$0x1]  ;;  %v554_v17 = vshrl.u32 %v399_v63, 16  ;;  %v402_v18 = vld [vmem:[%s3806_s14 + $0x4c] sm:$0xf]  ;;  %v789_v19 = vsel %vm3913_vm8, %v542_v8, %v788_v5 }
  0x59   : > { %784 = vst.msk [vmem:[#allocation2 + $0x58] sm:$0xf] %vm272_vm2, %v534_v12  ;;  %787 = vst [vmem:[#allocation2 + $0x5c] sm:$0x1] %v786_v13  ;;  %v552_v21 = vrot.slane %v547_v10, 4  ;;  %v557_v22 = vshll.u32 %v399_v63, 16 }
  0x5a   : > { %v562_v23 = vshrl.u32 %v400_v6, 16  ;;  %790 = vst [vmem:[#allocation2 + $0x60] sm:$0xf] %v789_v19  ;;  %v550_v24 = vor.u32 %v548_v14, %v547_v10  ;;  %v556_v25 = vrot.slane %v554_v17, 7  ;;  %v795_v26 = vld [vmem:[#allocation2 + $0x6c] sm:$0xf] }
  0x5b   : > { %v565_v27 = vshll.u32 %v400_v6, 16  ;;  %v571_v28 = vshrl.u32 %v401_v11, 16  ;;  %v793_v29 = vsel %vm3812_vm3, %v552_v21, %v792_v16  ;;  %v574_v31 = vshll.u32 %v401_v11, 16  ;;  %v403_v33 = vld [vmem:[%s3806_s14 + $0x50] sm:$0xf] }
  0x5c   : > { %v564_v30 = vrot.slane %v562_v23, 7  ;;  %v579_v32 = vshrl.u32 %v402_v18, 16  ;;  %v551_v34 = vsel %vm3919_vm9, %v543_v9, %v550_v24  ;;  %794 = vst [vmem:[#allocation2 + $0x68] sm:$0x1] %v793_v29  ;;  %v559_v35 = vor.u32 %v557_v22, %v556_v25  ;;  %v799_v37 = vld [vmem:[#allocation2 + $0x74] sm:$0x1] }
  0x5d   : > { %v560_v36 = vrot.slane %v556_v25, 4  ;;  %v573_v38 = vrot.slane %v571_v28, 7  ;;  %v802_v39 = vld [vmem:[#allocation2 + $0x78] sm:$0xf]  ;;  %791 = vst.msk [vmem:[#allocation2 + $0x64] sm:$0xf] %vm272_vm2, %v551_v34 }
  0x5e   : > { %v567_v40 = vor.u32 %v565_v27, %v564_v30  ;;  %v569_v41 = vrot.slane %v564_v30, 4  ;;  %v581_v42 = vrot.slane %v579_v32, 7  ;;  %v582_v43 = vshll.u32 %v402_v18, 16  ;;  %v404_v44 = vld [vmem:[%s3806_s14 + $0x54] sm:$0xf] }
  0x5f   : > { %v796_v45 = vsel %vm3913_vm8, %v559_v35, %v795_v26  ;;  %v576_v46 = vor.u32 %v574_v31, %v573_v38  ;;  %v577_v47 = vrot.slane %v573_v38, 4  ;;  %v806_v48 = vld [vmem:[#allocation2 + $0x80] sm:$0x1]  ;;  %v588_v49 = vshrl.u32 %v403_v33, 16  ;;  %v405_v50 = vld [vmem:[%s3806_s14 + $0x58] sm:$0xf] }
  0x60   : > { %797 = vst [vmem:[#allocation2 + $0x6c] sm:$0xf] %v796_v45  ;;  %v568_v51 = vsel %vm3919_vm9, %v560_v36, %v567_v40  ;;  %v800_v52 = vsel %vm3812_vm3, %v569_v41, %v799_v37  ;;  %v584_v53 = vor.u32 %v582_v43, %v581_v42  ;;  %v586_v54 = vrot.slane %v581_v42, 4  ;;  %v406_v55 = vld [vmem:[%s3806_s14 + $0x5c] sm:$0xf] }
  0x61   : > { %798 = vst.msk [vmem:[#allocation2 + $0x70] sm:$0xf] %vm272_vm2, %v568_v51  ;;  %801 = vst [vmem:[#allocation2 + $0x74] sm:$0x1] %v800_v52  ;;  %v803_v56 = vsel %vm3913_vm8, %v576_v46, %v802_v39  ;;  %v590_v57 = vrot.slane %v588_v49, 7  ;;  %v591_v58 = vshll.u32 %v403_v33, 16 }
  0x62   : > { %v596_v59 = vshrl.u32 %v404_v44, 16  ;;  %v407_v60 = vld [vmem:[%s3806_s14 + $0x60] sm:$0xf]  ;;  %804 = vst [vmem:[#allocation2 + $0x78] sm:$0xf] %v803_v56  ;;  %v585_v61 = vsel %vm3919_vm9, %v577_v47, %v584_v53  ;;  %v807_v62 = vsel %vm3812_vm3, %v586_v54, %v806_v48  ;;  %v599_v0 = vshll.u32 %v404_v44, 16 }
  0x63   : > { %v809_v63 = vld [vmem:[#allocation2 + $0x84] sm:$0xf]  ;;  %v605_v2 = vshrl.u32 %v405_v50, 16  ;;  %805 = vst.msk [vmem:[#allocation2 + $0x7c] sm:$0xf] %vm272_vm2, %v585_v61  ;;  %v593_v3 = vor.u32 %v591_v58, %v590_v57  ;;  %v594_v4 = vrot.slane %v590_v57, 4 }
  0x64   : > { %808 = vst [vmem:[#allocation2 + $0x80] sm:$0x1] %v807_v62  ;;  %v598_v5 = vrot.slane %v596_v59, 7  ;;  %v813_v6 = vld [vmem:[#allocation2 + $0x8c] sm:$0x1]  ;;  %v608_v7 = vshll.u32 %v405_v50, 16 }
  0x65   : > { %v607_v8 = vrot.slane %v605_v2, 7  ;;  %v613_v9 = vshrl.u32 %v406_v55, 16  ;;  %v616_v10 = vshll.u32 %v406_v55, 16  ;;  %v622_v11 = vshrl.u32 %v407_v60, 16  ;;  %v408_v12 = vld [vmem:[%s3806_s14 + $0x64] sm:$0xf] }
  0x66   : > { %v810_v13 = vsel %vm3913_vm8, %v593_v3, %v809_v63  ;;  %v601_v14 = vor.u32 %v599_v0, %v598_v5  ;;  %v603_v16 = vrot.slane %v598_v5, 4  ;;  %v816_v17 = vld [vmem:[#allocation2 + $0x90] sm:$0xf]  ;;  %v820_v18 = vld [vmem:[#allocation2 + $0x98] sm:$0x1]  ;;  %v625_v19 = vshll.u32 %v407_v60, 16 }
  0x67   : > { %811 = vst [vmem:[#allocation2 + $0x84] sm:$0xf] %v810_v13  ;;  %v610_v21 = vor.u32 %v608_v7, %v607_v8  ;;  %v611_v22 = vrot.slane %v607_v8, 4  ;;  %v615_v23 = vrot.slane %v613_v9, 7  ;;  %v624_v24 = vrot.slane %v622_v11, 7 }
  0x68   : > { %v409_v25 = vld [vmem:[%s3806_s14 + $0x68] sm:$0xf]  ;;  %v602_v26 = vsel %vm3919_vm9, %v594_v4, %v601_v14  ;;  %v814_v27 = vsel %vm3812_vm3, %v603_v16, %v813_v6  ;;  %v823_v28 = vld [vmem:[#allocation2 + $0x9c] sm:$0xf]  ;;  %v630_v29 = vshrl.u32 %v408_v12, 16  ;;  %v633_v30 = vshll.u32 %v408_v12, 16 }
  0x69   : > { %v410_v31 = vld [vmem:[%s3806_s14 + $0x6c] sm:$0xf]  ;;  %812 = vst.msk [vmem:[#allocation2 + $0x88] sm:$0xf] %vm272_vm2, %v602_v26  ;;  %815 = vst [vmem:[#allocation2 + $0x8c] sm:$0x1] %v814_v27  ;;  %v817_v32 = vsel %vm3913_vm8, %v610_v21, %v816_v17  ;;  %v618_v33 = vor.u32 %v616_v10, %v615_v23  ;;  %v627_v35 = vor.u32 %v625_v19, %v624_v24 }
  0x6a   : > { %v620_v34 = vrot.slane %v615_v23, 4  ;;  %v411_v36 = vld [vmem:[%s3806_s14 + $0x70] sm:$0xf]  ;;  %818 = vst [vmem:[#allocation2 + $0x90] sm:$0xf] %v817_v32  ;;  %v628_v37 = vrot.slane %v624_v24, 4 }
  0x6b   : > { %v632_v38 = vrot.slane %v630_v29, 7  ;;  %v639_v39 = vshrl.u32 %v409_v25, 16  ;;  %v642_v40 = vshll.u32 %v409_v25, 16  ;;  %v412_v41 = vld [vmem:[%s3806_s14 + $0x74] sm:$0xf]  ;;  %v619_v42 = vsel %vm3919_vm9, %v611_v22, %v618_v33 }
  0x6c   : > { %v821_v43 = vsel %vm3812_vm3, %v620_v34, %v820_v18  ;;  %v824_v44 = vsel %vm3913_vm8, %v627_v35, %v823_v28  ;;  %v827_v45 = vld [vmem:[#allocation2 + $0xa4] sm:$0x1]  ;;  %v647_v46 = vshrl.u32 %v410_v31, 16  ;;  %819 = vst.msk [vmem:[#allocation2 + $0x94] sm:$0xf] %vm272_vm2, %v619_v42  ;;  %v650_v51 = vshll.u32 %v410_v31, 16 }
  0x6d   : > { %822 = vst [vmem:[#allocation2 + $0x98] sm:$0x1] %v821_v43  ;;  %825 = vst [vmem:[#allocation2 + $0x9c] sm:$0xf] %v824_v44  ;;  %v635_v47 = vor.u32 %v633_v30, %v632_v38  ;;  %v637_v48 = vrot.slane %v632_v38, 4  ;;  %v641_v49 = vrot.slane %v639_v39, 7 }
  0x6e   : > { %v830_v50 = vld [vmem:[#allocation2 + $0xa8] sm:$0xf]  ;;  %v649_v52 = vrot.slane %v647_v46, 7  ;;  %v656_v53 = vshrl.u32 %v411_v36, 16  ;;  %v659_v54 = vshll.u32 %v411_v36, 16  ;;  %v664_v55 = vshrl.u32 %v412_v41, 16 }
  0x6f   : > { %v413_v56 = vld [vmem:[%s3806_s14 + $0x78] sm:$0xf]  ;;  %v636_v57 = vsel %vm3919_vm9, %v628_v37, %v635_v47  ;;  %v828_v58 = vsel %vm3812_vm3, %v637_v48, %v827_v45  ;;  %v644_v59 = vor.u32 %v642_v40, %v641_v49  ;;  %v645_v60 = vrot.slane %v641_v49, 4  ;;  %v834_v61 = vld [vmem:[#allocation2 + $0xb0] sm:$0x1] }
  0x70   : > { %826 = vst.msk [vmem:[#allocation2 + $0xa0] sm:$0xf] %vm272_vm2, %v636_v57  ;;  %829 = vst [vmem:[#allocation2 + $0xa4] sm:$0x1] %v828_v58  ;;  %v652_v62 = vor.u32 %v650_v51, %v649_v52  ;;  %v654_v63 = vrot.slane %v649_v52, 4  ;;  %v658_v0 = vrot.slane %v656_v53, 7 }
  0x71   : > { %v666_v2 = vrot.slane %v664_v55, 7  ;;  %v414_v3 = vld [vmem:[%s3806_s14 + $0x7c] sm:$0xf]  ;;  %v831_v4 = vsel %vm3913_vm8, %v644_v59, %v830_v50  ;;  %v837_v5 = vld [vmem:[#allocation2 + $0xb4] sm:$0xf]  ;;  %v667_v6 = vshll.u32 %v412_v41, 16 }
  0x72   : > { %v673_v7 = vshrl.u32 %v413_v56, 16  ;;  %v676_v8 = vshll.u32 %v413_v56, 16  ;;  %832 = vst [vmem:[#allocation2 + $0xa8] sm:$0xf] %v831_v4  ;;  %v653_v9 = vsel %vm3919_vm9, %v645_v60, %v652_v62  ;;  %v835_v10 = vsel %vm3812_vm3, %v654_v63, %v834_v61  ;;  %v841_v13 = vld [vmem:[#allocation2 + $0xbc] sm:$0x1] }
  0x73   : > { %v661_v11 = vor.u32 %v659_v54, %v658_v0  ;;  %v662_v12 = vrot.slane %v658_v0, 4  ;;  %833 = vst.msk [vmem:[#allocation2 + $0xac] sm:$0xf] %vm272_vm2, %v653_v9  ;;  %836 = vst [vmem:[#allocation2 + $0xb0] sm:$0x1] %v835_v10  ;;  %v669_v14 = vor.u32 %v667_v6, %v666_v2  ;;  %v671_v16 = vrot.slane %v666_v2, 4 }
  0x74   : > { %v675_v17 = vrot.slane %v673_v7, 7  ;;  %v681_v18 = vshrl.u32 %v414_v3, 16  ;;  %v844_v21 = vld [vmem:[#allocation2 + $0xc0] sm:$0xf]  ;;  %v684_v22 = vshll.u32 %v414_v3, 16 }
  0x75   : > { %v838_v19 = vsel %vm3913_vm8, %v661_v11, %v837_v5  ;;  %v670_v23 = vsel %vm3919_vm9, %v662_v12, %v669_v14  ;;  %v842_v24 = vsel %vm3812_vm3, %v671_v16, %v841_v13  ;;  %v848_v29 = vld [vmem:[#allocation2 + $0xc8] sm:$0x1] }
  0x76   : > { %839 = vst [vmem:[#allocation2 + $0xb4] sm:$0xf] %v838_v19  ;;  %v678_v25 = vor.u32 %v676_v8, %v675_v17  ;;  %840 = vst.msk [vmem:[#allocation2 + $0xb8] sm:$0xf] %vm272_vm2, %v670_v23  ;;  %v679_v26 = vrot.slane %v675_v17, 4  ;;  %v683_v27 = vrot.slane %v681_v18, 7 }
  0x77   : > { %843 = vst [vmem:[#allocation2 + $0xbc] sm:$0x1] %v842_v24 }
  0x78   : > { %v845_v28 = vsel %vm3913_vm8, %v678_v25, %v844_v21  ;;  %v686_v30 = vor.u32 %v684_v22, %v683_v27  ;;  %v688_v31 = vrot.slane %v683_v27, 4 }
  0x79   : > { %846 = vst [vmem:[#allocation2 + $0xc0] sm:$0xf] %v845_v28 }
  0x7a   : > { %v687_v32 = vsel %vm3919_vm9, %v679_v26, %v686_v30  ;;  %v849_v33 = vsel %vm3812_vm3, %v688_v31, %v848_v29 }
  0x7b   : > { %847 = vst.msk [vmem:[#allocation2 + $0xc4] sm:$0xf] %vm272_vm2, %v687_v32  ;;  %850 = vst [vmem:[#allocation2 + $0xc8] sm:$0x1] %v849_v33 }
  0x7c PF: > { %s3306_s24 = smul.u32 96, %s3672_s18  ;;  %vm932_vm10 = vsmask.f32 3328  ;;  %vm933_vm11 = vsmask.f32 7440  ;;  %s3691_s30 = smov 4  }
  0x7d   : > { %vm4075_vm12 = vmor %vm932_vm10, %vm933_vm11  ;;  %vm1240_vm13 = vcmask 1042432   ;;  %vm1241_vm14 = vcmask 1046532   ;;  %s3692_s5 = smov 8   ;;  %s3693_s6 = smov 12   ;;  %vm891_vm0 = vcmask 27648   ;;  %vm1175_vm1 = vcmask 60448  }
  0x7e   : > { %s4064_s27 = scalar_lea.vmem [#allocation2], %s3306_s24  ;;  %vm4108_vm15 = vmor %vm1240_vm13, %vm1241_vm14  ;;  %s3694_s9 = smov 16   ;;  %vm1347_vm2 = vcmask 93248   ;;  %vm1448_vm3 = vcmask 126048   ;;  %vm1729_vm4 = vcmask 158848   ;;  %vm1898_vm5 = vcmask 191648  }
  0x7f   : > { %s3695_s10 = smov 20   ;;  %s3696_s11 = smov 24   ;;  %vm1999_vm6 = vcmask 224448   ;;  %vm2280_vm7 = vcmask 257248   ;;  %vm2449_vm8 = vcmask 290048  }
  0x80   : > { %s3697_s14 = smov 28   ;;  %s3698_s12 = smov 32  }
  0x82   : > { %v920_v15 = vld [vmem:[%s4064_s27 + $0x30] sm:$0xf]  ;;  %v921_v20 = vld [vmem:[%s4064_s27 + $0x34] sm:$0xf]  ;;  %v908_v1 = vld [vmem:[%s4064_s27] sm:$0xf] }
  0x83   : > { %v1032_v34 = vshrl.u32 %v920_v15, 16  ;;  %v1035_v35 = vshll.u32 %v920_v15, 16  ;;  %v1041_v36 = vshll.u32 %v921_v20, 16  ;;  %v1045_v37 = vshrl.u32 %v921_v20, 16  ;;  %v909_v38 = vld [vmem:[%s4064_s27 + $0x4] sm:$0xf] }
  0x84   : > { %v936_v39 = vshrl.u32 %v908_v1, 16  ;;  %v939_v40 = vshll.u32 %v908_v1, 16  ;;  %v945_v41 = vshll.u32 %v909_v38, 16  ;;  %v949_v42 = vshrl.u32 %v909_v38, 16  ;;  %v922_v43 = vld [vmem:[%s4064_s27 + $0x38] sm:$0x1] }
  0x85   : > { %v1034_v44 = vrot.slane %v1032_v34, 4  ;;  %v1037_v45 = vrot.slane %v1035_v35, 5  ;;  %v1043_v46 = vrot.slane %v1041_v36, 5  ;;  %v1047_v47 = vrot.slane %v1045_v37, 4  ;;  %v910_v48 = vld [vmem:[%s4064_s27 + $0x8] sm:$0x1] }
  0x86   : > { %v938_v49 = vrot.slane %v936_v39, 4  ;;  %v941_v50 = vrot.slane %v939_v40, 5  ;;  %v947_v51 = vrot.slane %v945_v41, 5  ;;  %v951_v52 = vrot.slane %v949_v42, 4  ;;  %v912_v53 = vld [vmem:[%s4064_s27 + $0x10] sm:$0xf] }
  0x87   : > { %v1038_v54 = vor.u32 %v1037_v45, %v1034_v44  ;;  %v1048_v55 = vor.u32 %v1047_v47, %v1043_v46  ;;  %v1051_v56 = vshll.u32 %v922_v43, 16  ;;  %v955_v57 = vshll.u32 %v910_v48, 16  ;;  %v913_v61 = vld [vmem:[%s4064_s27 + $0x14] sm:$0x1]  ;;  %v911_v0 = vld [vmem:[%s4064_s27 + $0xc] sm:$0xf] }
  0x88   : > { %v942_v59 = vor.u32 %v941_v50, %v938_v49  ;;  %v952_v60 = vor.u32 %v951_v52, %v947_v51  ;;  %v969_v62 = vshll.u32 %v912_v53, 16  ;;  %v973_v63 = vshrl.u32 %v912_v53, 16  ;;  %v924_v10 = vld [vmem:[%s4064_s27 + $0x40] sm:$0xf]  ;;  %v925_v16 = vld [vmem:[%s4064_s27 + $0x44] sm:$0x1] }
  0x89   : > { %v1039_v2 = vrot.slane %v1038_v54, 4  ;;  %v1049_v3 = vrot.slane %v1048_v55, 4  ;;  %v1053_v4 = vrot.slane %v1051_v56, 5  ;;  %v957_v5 = vrot.slane %v955_v57, 5  ;;  %v923_v17 = vld [vmem:[%s4064_s27 + $0x3c] sm:$0xf] }
  0x8a   : > { %v943_v6 = vrot.slane %v942_v59, 4  ;;  %v953_v7 = vrot.slane %v952_v60, 4  ;;  %v971_v8 = vrot.slane %v969_v62, 5  ;;  %v975_v9 = vrot.slane %v973_v63, 4  ;;  %v1193_v27 = vld [vmem:[%s4064_s27 + $0x4] sm:$0xf] }
  0x8b   : > { %v1044_v11 = vsel %vm4075_vm12, %v1039_v2, %v1043_v46  ;;  %v1054_v12 = vsel %vm4075_vm12, %v1049_v3, %v1053_v4  ;;  %v979_v13 = vshll.u32 %v913_v61, 16  ;;  %v960_v14 = vshrl.u32 %v911_v0, 16  ;;  %v1194_v40 = vld [vmem:[%s4064_s27 + $0x8] sm:$0x1]  ;;  %v1205_v41 = vld [vmem:[%s4064_s27 + $0x34] sm:$0xf] }
  0x8c   : > { %1143 = vrot.lane.b32.xlu1 %v1044_v11, %s3691_s30  ;;  %v948_v18 = vsel %vm4075_vm12, %v943_v6, %v947_v51  ;;  %v958_v19 = vsel %vm4075_vm12, %v953_v7, %v957_v5  ;;  %v976_v21 = vor.u32 %v975_v9, %v971_v8  ;;  %v963_v22 = vshll.u32 %v911_v0, 16  ;;  %v1192_v44 = vld [vmem:[%s4064_s27] sm:$0xe]  ;;  %v1206_v53 = vld [vmem:[%s4064_s27 + $0x38] sm:$0x1] }
  0x8d   : > { %1127 = vrot.lane.b32.xlu0 %v948_v18, %s3691_s30  ;;  %v981_v23 = vrot.slane %v979_v13, 5  ;;  %v962_v24 = vrot.slane %v960_v14, 4  ;;  %v1065_v25 = vshll.u32 %v924_v10, 16  ;;  %v1069_v26 = vshrl.u32 %v924_v10, 16  ;;  %v1196_v54 = vld [vmem:[%s4064_s27 + $0x10] sm:$0xf] }
  0x8e   : > { %v977_v28 = vrot.slane %v976_v21, 4  ;;  %v965_v29 = vrot.slane %v963_v22, 5  ;;  %v1075_v30 = vshll.u32 %v925_v16, 16  ;;  %v1056_v31 = vshrl.u32 %v923_v17, 16  ;;  %v1204_v56 = vld [vmem:[%s4064_s27 + $0x30] sm:$0xe] }
  0x8f   : > { %v1067_v32 = vrot.slane %v1065_v25, 5  ;;  %v1071_v33 = vrot.slane %v1069_v26, 4  ;;  %v1059_v15 = vshll.u32 %v923_v17, 16  ;;  %v1245_v34 = vrot.slane %v1193_v27, 5  ;;  %v1197_v0 = vld [vmem:[%s4064_s27 + $0x14] sm:$0x1] }
  0x90   : > { %1145 = vrot.lane.b32.xlu1 %v1054_v12, %s3691_s30  ;;  %v966_v20 = vor.u32 %v965_v29, %v962_v24  ;;  %v1058_v1 = vrot.slane %v1056_v31, 4  ;;  %v982_v35 = vsel %vm4075_vm12, %v977_v28, %v981_v23  ;;  %v1077_v37 = vrot.slane %v1075_v30, 5  ;;  %v1208_v2 = vld [vmem:[%s4064_s27 + $0x40] sm:$0xf]  ;;  %v1195_v3 = vld [vmem:[%s4064_s27 + $0xc] sm:$0xe] }
  0x91   : > { %1129 = vrot.lane.b32.xlu0 %v958_v19, %s3691_s30  ;;  %v1072_v36 = vor.u32 %v1071_v33, %v1067_v32  ;;  %v1061_v38 = vrot.slane %v1059_v15, 5  ;;  %v1247_v46 = vrot.slane %v1245_v34, 4  ;;  %v1248_v49 = vrot.slane %v1194_v40, 5  ;;  %v1209_v10 = vld [vmem:[%s4064_s27 + $0x44] sm:$0x1] }
  0x92   : > { %v967_v39 = vrot.slane %v966_v20, 4  ;;  %v1273_v50 = vrot.slane %v1205_v41, 5  ;;  %v3091_v52 = vrot.slane %v1192_v44, 9  ;;  %v1276_v60 = vrot.slane %v1206_v53, 5  ;;  %v1207_v11 = vld [vmem:[%s4064_s27 + $0x3c] sm:$0xe] }
  0x93   : > { %v1073_v42 = vrot.slane %v1072_v36, 4  ;;  %v1062_v43 = vor.u32 %v1061_v38, %v1058_v1  ;;  %v1249_v57 = vsel %vm4108_vm15, %v1247_v46, %v1248_v49  ;;  %v1252_v61 = vrot.slane %v1196_v54, 5  ;;  %v3118_v18 = vld [vmem:[%s4064_s27 + $0x10] sm:$0xf]  ;;  %v3117_v21 = vld [vmem:[%s4064_s27 + $0xc] sm:$0xf] }
  0x94   : > { %1133 = vrot.lane.b32.xlu1 %v982_v35, %s3691_s30  ;;  %v972_v45 = vsel %vm4075_vm12, %v967_v39, %v971_v8  ;;  %v1275_v59 = vrot.slane %v1273_v50, 4  ;;  %v1246_v62 = vsel %vm4108_vm15, %v3091_v52, %v1245_v34  ;;  %v3095_v63 = vrot.slane %v1204_v56, 9  ;;  %v3130_v27 = vld [vmem:[%s4064_s27 + $0x40] sm:$0xf]  ;;  %v3102_v28 = vld [vmem:[%s4064_s27 + $0x10] sm:$0xf] }
  0x95   : > { %1131 = vrot.lane.b32.xlu0 %v972_v45, %s3691_s30  ;;  %v1078_v47 = vsel %vm4075_vm12, %v1073_v42, %v1077_v37  ;;  %v1063_v48 = vrot.slane %v1062_v43, 4  ;;  %v1254_v5 = vrot.slane %v1252_v61, 4  ;;  %v1255_v6 = vrot.slane %v1197_v0, 5  ;;  %v3101_v29 = vld [vmem:[%s4064_s27 + $0xc] sm:$0xf] }
  0x96   : > { %v1277_v4 = vsel %vm4108_vm15, %v1275_v59, %v1276_v60  ;;  %v1280_v7 = vrot.slane %v1208_v2, 5  ;;  %v1274_v8 = vsel %vm4108_vm15, %v3095_v63, %v1273_v50  ;;  %v3092_v9 = vrot.slane %v1195_v3, 9  ;;  %v3129_v30 = vld [vmem:[%s4064_s27 + $0x3c] sm:$0xf]  ;;  %v3119_v33 = vld [vmem:[%s4064_s27 + $0x14] sm:$0x1] }
  0x97   : > { %v1068_v55 = vsel %vm4075_vm12, %v1063_v48, %v1067_v32  ;;  %v1256_v12 = vsel %vm4108_vm15, %v1254_v5, %v1255_v6  ;;  %v1283_v14 = vrot.slane %v1209_v10, 5  ;;  %v3096_v17 = vrot.slane %v1207_v11, 9  ;;  %v3110_v35 = vld [vmem:[%s4064_s27 + $0x40] sm:$0xf]  ;;  %v3121_v38 = vld [vmem:[%s4064_s27 + $0x1c] sm:$0xf] }
  0x98   : > { %1149 = vrot.lane.b32.xlu1 %v1078_v47, %s3691_s30  ;;  %v1282_v13 = vrot.slane %v1280_v7, 4  ;;  %v1253_v16 = vsel %vm4108_vm15, %v3092_v9, %v1252_v61  ;;  %v1499_v23 = vshll.u32 %v3118_v18, 16  ;;  %v1503_v24 = vshrl.u32 %v3118_v18, 16  ;;  %v3109_v39 = vld [vmem:[%s4064_s27 + $0x3c] sm:$0xf] }
  0x99   : > { %1147 = vrot.lane.b32.xlu0 %v1068_v55, %s3691_s30  ;;  %v1281_v22 = vsel %vm4108_vm15, %v3096_v17, %v1280_v7  ;;  %v1490_v25 = vshrl.u32 %v3117_v21, 16  ;;  %v1493_v26 = vshll.u32 %v3117_v21, 16  ;;  %v1595_v32 = vshll.u32 %v3130_v27, 16  ;;  %v3120_v42 = vld [vmem:[%s4064_s27 + $0x18] sm:$0xf] }
  0x9a   : > { %v1284_v19 = vsel %vm4108_vm15, %v1282_v13, %v1283_v14  ;;  %v4154_v31 = vrot.slane %v1499_v23, 5  ;;  %v1505_v15 = vrot.slane %v1503_v24, 4  ;;  %v1599_v34 = vshrl.u32 %v3130_v27, 16  ;;  %v3131_v45 = vld [vmem:[%s4064_s27 + $0x44] sm:$0x1] }
  0x9b   : > { %v1492_v20 = vrot.slane %v1490_v25, 4  ;;  %v1495_v1 = vrot.slane %v1493_v26, 5  ;;  %v1586_v36 = vshrl.u32 %v3129_v30, 16  ;;  %v1589_v37 = vshll.u32 %v3129_v30, 16  ;;  %v3104_v48 = vld [vmem:[%s4064_s27 + $0x1c] sm:$0xf] }
  0x9c   : > { %1301 = vrot.lane.b32.xlu1 %v1249_v57, %s3692_s5  ;;  %v1509_v40 = vshll.u32 %v3119_v33, 16  ;;  %v4162_v41 = vrot.slane %v1595_v32, 5  ;;  %v1506_v43 = vor.u32 %v1505_v15, %v4154_v31  ;;  %v1601_v46 = vrot.slane %v1599_v34, 4  ;;  %v3103_v53 = vld [vmem:[%s4064_s27 + $0x18] sm:$0xf] }
  0x9d   : > { %1299 = vrot.lane.b32.xlu0 %v1246_v62, %s3692_s5  ;;  %v1496_v44 = vor.u32 %v1495_v1, %v1492_v20  ;;  %v1523_v47 = vshll.u32 %v3121_v38, 16  ;;  %v1588_v49 = vrot.slane %v1586_v36, 4  ;;  %v1591_v50 = vrot.slane %v1589_v37, 5  ;;  %v3133_v56 = vld [vmem:[%s4064_s27 + $0x4c] sm:$0xf] }
  0x9e   : > { %v1527_v52 = vshrl.u32 %v3121_v38, 16  ;;  %v1514_v54 = vshrl.u32 %v3120_v42, 16  ;;  %v1517_v55 = vshll.u32 %v3120_v42, 16  ;;  %v1511_v57 = vrot.slane %v1509_v40, 5  ;;  %v3132_v60 = vld [vmem:[%s4064_s27 + $0x48] sm:$0xf] }
  0x9f   : > { %v1605_v59 = vshll.u32 %v3131_v45, 16  ;;  %v3112_v61 = vld [vmem:[%s4064_s27 + $0x4c] sm:$0xf]  ;;  %v1507_v62 = vrot.slane %v1506_v43, 4  ;;  %v1497_v63 = vrot.slane %v1496_v44, 4  ;;  %v1602_v0 = vor.u32 %v1601_v46, %v4162_v41 }
  0xa0   : > { %1317 = vrot.lane.b32.xlu1 %v1277_v4, %s3692_s5  ;;  %v4176_v2 = vrot.slane %v1523_v47, 5  ;;  %v1592_v3 = vor.u32 %v1591_v50, %v1588_v49  ;;  %v3122_v4 = vld [vmem:[%s4064_s27 + $0x20] sm:$0x1]  ;;  %v1529_v5 = vrot.slane %v1527_v52, 4  ;;  %v1619_v6 = vshll.u32 %v3133_v56, 16 }
  0xa1   : > { %1315 = vrot.lane.b32.xlu0 %v1274_v8, %s3692_s5  ;;  %v1623_v7 = vshrl.u32 %v3133_v56, 16  ;;  %v3111_v8 = vld [vmem:[%s4064_s27 + $0x48] sm:$0xf]  ;;  %v1516_v9 = vrot.slane %v1514_v54, 4  ;;  %v1519_v10 = vrot.slane %v1517_v55, 5  ;;  %v1610_v11 = vshrl.u32 %v3132_v60, 16 }
  0xa2   : > { %v1512_v13 = vsel %vm4075_vm12, %v1507_v62, %v1511_v57  ;;  %v1603_v14 = vrot.slane %v1602_v0, 4  ;;  %v1533_v17 = vshll.u32 %v3122_v4, 16  ;;  %v1502_v18 = vsel %vm4075_vm12, %v1497_v63, %v4154_v31  ;;  %v3134_v21 = vld [vmem:[%s4064_s27 + $0x50] sm:$0x1]  ;;  %v884_v36 = vld [vmem:[%s4064_s27 + $0x34] sm:$0xf] }
  0xa3   : > { %v1625_v23 = vrot.slane %v1623_v7, 4  ;;  %v1593_v24 = vrot.slane %v1592_v3, 4  ;;  %v1520_v25 = vor.u32 %v1519_v10, %v1516_v9  ;;  %v1612_v26 = vrot.slane %v1610_v11, 4  ;;  %901 = vst.msk [vmem:[#allocation3 + $0x24] sm:$0xf] %vm891_vm0, %v884_v36 }
  0xa4   : > { %1305 = vrot.lane.b32.xlu1 %v1256_v12, %s3692_s5  ;;  %v1613_v12 = vshll.u32 %v3132_v60, 16  ;;  %v1535_v30 = vrot.slane %v1533_v17, 5  ;;  %v1629_v15 = vshll.u32 %v3134_v21, 16  ;;  %v876_v37 = vld [vmem:[%s4064_s27 + $0x4] sm:$0xf] }
  0xa5   : > { %1303 = vrot.lane.b32.xlu0 %v1253_v16, %s3692_s5  ;;  %v1607_v16 = vrot.slane %v1605_v59, 5  ;;  %v1598_v20 = vsel %vm4075_vm12, %v1593_v24, %v4162_v41  ;;  %v1521_v1 = vrot.slane %v1520_v25, 4  ;;  %893 = vst.msk [vmem:[#allocation3 + $0x4] sm:$0xf] %vm891_vm0, %v876_v37  ;;  %v3143_v44 = vld [vmem:[%s4064_s27 + $0x14] sm:$0x1] }
  0xa6   : > { %v1615_v27 = vrot.slane %v1613_v12, 5  ;;  %v1631_v40 = vrot.slane %v1629_v15, 5  ;;  %v3154_v45 = vld [vmem:[%s4064_s27 + $0x40] sm:$0xf]  ;;  %v3141_v46 = vld [vmem:[%s4064_s27 + $0xc] sm:$0xe] }
  0xa7   : > { %v1608_v31 = vsel %vm4075_vm12, %v1603_v14, %v1607_v16  ;;  %v1526_v42 = vsel %vm4075_vm12, %v1521_v1, %v4176_v2  ;;  %v878_v47 = vld [vmem:[%s4064_s27 + $0x10] sm:$0xf]  ;;  %v1799_v52 = vrot.slane %v3143_v44, 5  ;;  %v3165_v55 = vrot.slane %v3141_v46, 9  ;;  %v3155_v56 = vld [vmem:[%s4064_s27 + $0x44] sm:$0x1] }
  0xa8   : > { %1321 = vrot.lane.b32.xlu1 %v1284_v19, %s3692_s5  ;;  %v1530_v19 = vor.u32 %v1529_v5, %v4176_v2  ;;  %v1616_v34 = vor.u32 %v1615_v27, %v1612_v26  ;;  %895 = vst.msk [vmem:[#allocation3 + $0xc] sm:$0xf] %vm891_vm0, %v878_v47  ;;  %v3145_v57 = vld [vmem:[%s4064_s27 + $0x1c] sm:$0xf]  ;;  %v886_v60 = vld [vmem:[%s4064_s27 + $0x40] sm:$0xf] }
  0xa9   : > { %1319 = vrot.lane.b32.xlu0 %v1281_v22, %s3692_s5  ;;  %v1621_v22 = vrot.slane %v1619_v6, 5  ;;  %v3153_v59 = vld [vmem:[%s4064_s27 + $0x3c] sm:$0xe]  ;;  %903 = vst.msk [vmem:[#allocation3 + $0x2c] sm:$0xf] %vm891_vm0, %v886_v60  ;;  %v1827_v0 = vrot.slane %v3155_v56, 5 }
  0xaa   : > { %v1531_v32 = vrot.slane %v1530_v19, 4  ;;  %v1617_v43 = vrot.slane %v1616_v34, 4  ;;  %v1803_v2 = vrot.slane %v3145_v57, 5  ;;  %v3169_v4 = vrot.slane %v3153_v59, 9  ;;  %v3146_v5 = vld [vmem:[%s4064_s27 + $0x20] sm:$0x1] }
  0xab   : > { %v1626_v33 = vor.u32 %v1625_v23, %v1621_v22  ;;  %v3157_v6 = vld [vmem:[%s4064_s27 + $0x4c] sm:$0xf]  ;;  %v3144_v7 = vld [vmem:[%s4064_s27 + $0x18] sm:$0xe]  ;;  %v1806_v10 = vrot.slane %v3146_v5, 5 }
  0xac   : > { %1402 = vrot.lane.b32.xlu1 %v3102_v28, %s3693_s6  ;;  %v883_v28 = vld [vmem:[%s4064_s27 + $0x30] sm:$0xf]  ;;  %v1536_v38 = vsel %vm4075_vm12, %v1531_v32, %v1535_v30  ;;  %v1622_v54 = vsel %vm4075_vm12, %v1617_v43, %v1621_v22  ;;  %v1805_v9 = vrot.slane %v1803_v2, 4  ;;  %v1831_v11 = vrot.slane %v3157_v6, 5  ;;  %v3156_v16 = vld [vmem:[%s4064_s27 + $0x48] sm:$0xe] }
  0xad   : > { %1400 = vrot.lane.b32.xlu0 %v3101_v29, %s3693_s6  ;;  %900 = vst.msk [vmem:[#allocation3 + $0x20] sm:$0xf] %vm891_vm0, %v883_v28  ;;  %v875_v29 = vld [vmem:[%s4064_s27] sm:$0xf]  ;;  %v3158_v14 = vld [vmem:[%s4064_s27 + $0x50] sm:$0x1] }
  0xae   : > { %892 = vst.msk [vmem:[#allocation3] sm:$0xf] %vm891_vm0, %v875_v29  ;;  %v1807_v17 = vsel %vm4108_vm15, %v1805_v9, %v1806_v10  ;;  %v1834_v19 = vrot.slane %v3158_v14, 5  ;;  %v3170_v22 = vrot.slane %v3156_v16, 9  ;;  %v3192_v23 = vld [vmem:[%s4064_s27 + $0x1c] sm:$0xf] }
  0xaf   : > { %v3191_v26 = vld [vmem:[%s4064_s27 + $0x18] sm:$0xf]  ;;  %v2050_v27 = vshll.u32 %v3192_v23, 16  ;;  %v3176_v28 = vld [vmem:[%s4064_s27 + $0x1c] sm:$0xf]  ;;  %v2054_v29 = vshrl.u32 %v3192_v23, 16 }
  0xb0   : > { %1418 = vrot.lane.b32.xlu1 %v3110_v35, %s3693_s6  ;;  %v3142_v35 = vld [vmem:[%s4064_s27 + $0x10] sm:$0xf]  ;;  %v1832_v25 = vsel %vm4108_vm15, %v3170_v22, %v1831_v11  ;;  %v2041_v30 = vshrl.u32 %v3191_v26, 16  ;;  %v3204_v32 = vld [vmem:[%s4064_s27 + $0x4c] sm:$0xf]  ;;  %v3516_v23 = vld [vmem:[%s4995_s1 + $0x38] sm:$0xff]  }
  0xb1   : > { %1416 = vrot.lane.b32.xlu0 %v3109_v39, %s3693_s6  ;;  %v1627_v39 = vrot.slane %v1626_v33, 4  ;;  %v1796_v41 = vrot.slane %v3142_v35, 5  ;;  %v3203_v33 = vld [vmem:[%s4064_s27 + $0x48] sm:$0xf]  ;;  %v3175_v15 = vld [vmem:[%s4064_s27 + $0x18] sm:$0xf]  ;;  %3387 = vmatprep.subr.bf16.mxu0 %v3516_v23 }
  0xb2   : > { %v3193_v1 = vld [vmem:[%s4064_s27 + $0x20] sm:$0x1]  ;;  %v2056_v34 = vrot.slane %v2054_v29, 4  ;;  %v2146_v35 = vshll.u32 %v3204_v32, 16  ;;  %v2150_v36 = vshrl.u32 %v3204_v32, 16  ;;  %v2137_v37 = vshrl.u32 %v3203_v33, 16  ;;  %3419 = vmatprep.subr.bf16.mxu1 %v3516_v23  ;;  %3388 = vmatpush3.bf16.msra.mxu0 %v3516_v23 }
  0xb3   : > { %v1632_v49 = vsel %vm4075_vm12, %v1627_v39, %v1631_v40  ;;  %v1798_v50 = vrot.slane %v1796_v41, 4  ;;  %v1797_v3 = vsel %vm4108_vm15, %v3165_v55, %v1796_v41  ;;  %v2043_v39 = vrot.slane %v2041_v30, 4  ;;  %v3195_v43 = vld [vmem:[%s4064_s27 + $0x28] sm:$0xf]  ;;  %v3194_v46 = vld [vmem:[%s4064_s27 + $0x24] sm:$0xf]  ;;  %3427 = vmatpush3.bf16.msra.mxu1 %v3516_v23 }
  0xb4   : > { %1406 = vrot.lane.b32.xlu1 %v3104_v48, %s3693_s6  ;;  %v877_v48 = vld [vmem:[%s4064_s27 + $0xc] sm:$0xf]  ;;  %v2140_v41 = vshll.u32 %v3203_v33, 16  ;;  %v3178_v44 = vld [vmem:[%s4064_s27 + $0x28] sm:$0xf]  ;;  %v2074_v55 = vshll.u32 %v3195_v43, 16 }
  0xb5   : > { %1404 = vrot.lane.b32.xlu0 %v3103_v53, %s3693_s6  ;;  %v1824_v53 = vrot.slane %v3154_v45, 5  ;;  %894 = vst.msk [vmem:[#allocation3 + $0x8] sm:$0xf] %vm891_vm0, %v877_v48  ;;  %v1800_v62 = vsel %vm4108_vm15, %v1798_v50, %v1799_v52  ;;  %v2060_v45 = vshll.u32 %v3193_v1, 16  ;;  %v3205_v48 = vld [vmem:[%s4064_s27 + $0x50] sm:$0x1] }
  0xb6   : > { %v2152_v50 = vrot.slane %v2150_v36, 4  ;;  %v2139_v52 = vrot.slane %v2137_v37, 4  ;;  %v2078_v56 = vshrl.u32 %v3195_v43, 16  ;;  %v3207_v57 = vld [vmem:[%s4064_s27 + $0x58] sm:$0xf]  ;;  %v2065_v60 = vshrl.u32 %v3194_v46, 16 }
  0xb7   : > { %v1826_v63 = vrot.slane %v1824_v53, 4  ;;  %v1825_v12 = vsel %vm4108_vm15, %v3169_v4, %v1824_v53  ;;  %v3177_v59 = vld [vmem:[%s4064_s27 + $0x24] sm:$0xf]  ;;  %v2170_v5 = vshll.u32 %v3207_v57, 16  ;;  %v2174_v6 = vshrl.u32 %v3207_v57, 16  ;;  %v3517_v1 = vld [vmem:[%s4995_s1 + $0x30] sm:$0xff]  }
  0xb8   : > { %1422 = vrot.lane.b32.xlu1 %v3112_v61, %s3693_s6  ;;  %v885_v61 = vld [vmem:[%s4064_s27 + $0x3c] sm:$0xf]  ;;  %v4294_v10 = vrot.slane %v2074_v55, 5  ;;  %3389 = vmatprep.subr.bf16.mxu0 %v3517_v1  ;;  %v914_v43 = vld [vmem:[%s4064_s27 + $0x18] sm:$0xf] }
  0xb9   : > { %1420 = vrot.lane.b32.xlu0 %v3111_v8, %s3693_s6  ;;  %902 = vst.msk [vmem:[#allocation3 + $0x28] sm:$0xf] %vm891_vm0, %v885_v61  ;;  %v1828_v8 = vsel %vm4108_vm15, %v1826_v63, %v1827_v0  ;;  %v2068_v61 = vshll.u32 %v3194_v46, 16  ;;  %v2156_v63 = vshll.u32 %v3205_v48, 16  ;;  %v3206_v0 = vld [vmem:[%s4064_s27 + $0x54] sm:$0xf]  ;;  %3420 = vmatprep.subr.bf16.mxu1 %v3517_v1 }
  0xba   : > { %v2161_v16 = vshrl.u32 %v3206_v0, 16  ;;  %v2176_v22 = vrot.slane %v2174_v6, 4  ;;  %3390 = vmatpush3.bf16.msra.mxu0 %v3517_v1  ;;  %3428 = vmatpush3.bf16.msra.mxu1 %v3517_v1  ;;  %v3215_v46 = vld [vmem:[%s4064_s27 + $0x18] sm:$0xe]  ;;  %v984_v57 = vshrl.u32 %v914_v43, 16 }
  0xbb   : > { %v2070_v14 = vrot.slane %v2068_v61, 5  ;;  %v4387_v1 = vld [vmem:[%s4064_s27 + $0x2c] sm:$0x1] }
  0xbc   : > { %1683 = vrot.lane.b32.xlu1 %v1512_v13, %s3694_s9  ;;  %v3166_v13 = vrot.slane %v3144_v7, 9  ;;  %v3185_v7 = vld [vmem:[%s4064_s27 + $0x54] sm:$0xf] }
  0xbd   : > { %1681 = vrot.lane.b32.xlu0 %v1502_v18, %s3694_s9  ;;  %v1833_v18 = vrot.slane %v1831_v11, 4  ;;  %v2080_v11 = vrot.slane %v2078_v56, 4  ;;  %v4343_v56 = vld [vmem:[%s4064_s27 + $0x4c] sm:$0xf] }
  0xbe   : > { %v1804_v21 = vsel %vm4108_vm15, %v3166_v13, %v1803_v2  ;;  %v3186_v2 = vld [vmem:[%s4064_s27 + $0x58] sm:$0xf]  ;;  %v2067_v13 = vrot.slane %v2065_v60, 4 }
  0xbf   : > { %v1835_v24 = vsel %vm4108_vm15, %v1833_v18, %v1834_v19  ;;  %v2158_v19 = vrot.slane %v2156_v63, 5  ;;  %v3229_v63 = vld [vmem:[%s4064_s27 + $0x50] sm:$0x1] }
  0xc0   : > { %1699 = vrot.lane.b32.xlu1 %v1608_v31, %s3694_s9  ;;  %v2044_v31 = vshll.u32 %v3191_v26, 16  ;;  %v2081_v26 = vor.u32 %v2080_v11, %v4294_v10  ;;  %v2071_v30 = vor.u32 %v2070_v14, %v2067_v13  ;;  %v916_v13 = vld [vmem:[%s4064_s27 + $0x20] sm:$0x1]  ;;  %v986_v14 = vrot.slane %v984_v57, 4  ;;  %v880_v57 = vld [vmem:[%s4064_s27 + $0x1c] sm:$0xf] }
  0xc1   : > { %1697 = vrot.lane.b32.xlu0 %v1598_v20, %s3694_s9  ;;  %v4270_v20 = vrot.slane %v2050_v27, 5  ;;  %897 = vst.msk [vmem:[#allocation3 + $0x14] sm:$0xf] %vm891_vm0, %v880_v57 }
  0xc2   : > { %v2046_v40 = vrot.slane %v2044_v31, 5  ;;  %v2163_v31 = vrot.slane %v2161_v16, 4 }
  0xc3   : > { %v2057_v47 = vor.u32 %v2056_v34, %v4270_v20 }
  0xc4   : > { %1687 = vrot.lane.b32.xlu1 %v1536_v38, %s3694_s9  ;;  %v3184_v38 = vld [vmem:[%s4064_s27 + $0x4c] sm:$0xf]  ;;  %v2047_v53 = vor.u32 %v2046_v40, %v2043_v39  ;;  %v915_v40 = vld [vmem:[%s4064_s27 + $0x1c] sm:$0xf] }
  0xc5   : > { %1685 = vrot.lane.b32.xlu0 %v1526_v42, %s3694_s9  ;;  %v3183_v42 = vld [vmem:[%s4064_s27 + $0x48] sm:$0xf] }
  0xc8   : > { %1703 = vrot.lane.b32.xlu1 %v1632_v49, %s3694_s9  ;;  %v4283_v49 = vrot.slane %v2146_v35, 5  ;;  %v2082_v35 = vrot.slane %v2081_v26, 4 }
  0xc9   : > { %1701 = vrot.lane.b32.xlu0 %v1622_v54, %s3694_s9  ;;  %v2142_v54 = vrot.slane %v2140_v41, 5  ;;  %v3217_v41 = vld [vmem:[%s4064_s27 + $0x20] sm:$0x1] }
  0xca   : > { %v2153_v4 = vor.u32 %v2152_v50, %v4283_v49  ;;  %v997_v50 = vshrl.u32 %v915_v40, 16  ;;  %v2350_v61 = vrot.slane %v3217_v41, 5 }
  0xcb   : > { %v2143_v9 = vor.u32 %v2142_v54, %v2139_v52  ;;  %v927_v52 = vld [vmem:[%s4064_s27 + $0x4c] sm:$0xf] }
  0xcc   : > { %1852 = vrot.lane.b32.xlu1 %v1800_v62, %s3695_s10  ;;  %v2062_v62 = vrot.slane %v2060_v45, 5 }
  0xcd   : > { %1850 = vrot.lane.b32.xlu0 %v1797_v3, %s3695_s10  ;;  %v2058_v3 = vrot.slane %v2057_v47, 4  ;;  %v2144_v29 = vrot.slane %v2143_v9, 4  ;;  %v3518_v47 = vld [vmem:[%s4995_s1 + $0x28] sm:$0xff]  }
  0xce   : > { %3391 = vmatprep.subr.bf16.mxu0 %v3518_v47  ;;  %3421 = vmatprep.subr.bf16.mxu1 %v3518_v47 }
  0xcf   : > { %v2063_v18 = vsel %vm4075_vm12, %v2058_v3, %v2062_v62  ;;  %v2149_v37 = vsel %vm4075_vm12, %v2144_v29, %v4283_v49  ;;  %v993_v49 = vshll.u32 %v915_v40, 16  ;;  %v3239_v62 = vrot.slane %v3215_v46, 9  ;;  %3392 = vmatpush3.bf16.msra.mxu0 %v3518_v47  ;;  %3429 = vmatpush3.bf16.msra.mxu1 %v3518_v47  ;;  %v917_v47 = vld [vmem:[%s4064_s27 + $0x24] sm:$0xf] }
  0xd0   : > { %1868 = vrot.lane.b32.xlu1 %v1828_v8, %s3695_s10  ;;  %v2048_v8 = vrot.slane %v2047_v53, 4  ;;  %v926_v53 = vld [vmem:[%s4064_s27 + $0x48] sm:$0xf]  ;;  %v1093_v3 = vshrl.u32 %v927_v52, 16  ;;  %v2357_v46 = vrot.slane %v4387_v1, 5 }
  0xd1   : > { %1866 = vrot.lane.b32.xlu0 %v1825_v12, %s3695_s10  ;;  %v3196_v12 = vld [vmem:[%s4064_s27 + $0x2c] sm:$0x1]  ;;  %v4357_v9 = vrot.slane %v993_v49, 5 }
  0xd2   : > { %v2084_v27 = vshll.u32 %v3196_v12, 16  ;;  %v2378_v12 = vrot.slane %v3229_v63, 5  ;;  %v1008_v63 = vshrl.u32 %v917_v47, 16 }
  0xd4   : > { %1856 = vrot.lane.b32.xlu1 %v1807_v17, %s3695_s10  ;;  %v2164_v17 = vshll.u32 %v3206_v0, 16  ;;  %v2086_v36 = vrot.slane %v2084_v27, 5  ;;  %v3519_v0 = vld [vmem:[%s4995_s1 + $0x20] sm:$0xff]   ;;  %v1003_v27 = vshll.u32 %v916_v13, 16 }
  0xd5   : > { %1854 = vrot.lane.b32.xlu0 %v1804_v21, %s3695_s10  ;;  %v4300_v21 = vrot.slane %v2170_v5, 5  ;;  %v1083_v5 = vshll.u32 %v926_v53, 16  ;;  %3393 = vmatprep.subr.bf16.mxu0 %v3519_v0 }
  0xd6   : > { %v2166_v32 = vrot.slane %v2164_v17, 5  ;;  %v2087_v48 = vsel %vm4075_vm12, %v2082_v35, %v2086_v36  ;;  %3422 = vmatprep.subr.bf16.mxu1 %v3519_v0  ;;  %v928_v17 = vld [vmem:[%s4064_s27 + $0x50] sm:$0x1]  ;;  %3394 = vmatpush3.bf16.msra.mxu0 %v3519_v0 }
  0xd7   : > { %v2177_v33 = vor.u32 %v2176_v22, %v4300_v21  ;;  %3430 = vmatpush3.bf16.msra.mxu1 %v3519_v0  ;;  %v1085_v23 = vrot.slane %v1083_v5, 5  ;;  %v1011_v0 = vshll.u32 %v917_v47, 16  ;;  %v3230_v5 = vld [vmem:[%s4064_s27 + $0x54] sm:$0xe]  ;;  %v882_v47 = vld [vmem:[%s4064_s27 + $0x28] sm:$0xf] }
  0xd8   : > { %1872 = vrot.lane.b32.xlu1 %v1835_v24, %s3695_s10  ;;  %v2053_v24 = vsel %vm4075_vm12, %v2048_v8, %v4270_v20  ;;  %v4314_v20 = vld [vmem:[%s4064_s27 + $0x1c] sm:$0xf]  ;;  %v2167_v39 = vor.u32 %v2166_v32, %v2163_v31  ;;  %v3227_v8 = vld [vmem:[%s4064_s27 + $0x48] sm:$0xe]  ;;  %v1099_v32 = vshll.u32 %v928_v17, 16 }
  0xd9   : > { %1870 = vrot.lane.b32.xlu0 %v1832_v25, %s3695_s10  ;;  %v2154_v25 = vrot.slane %v2153_v4, 4  ;;  %v1080_v4 = vshrl.u32 %v926_v53, 16  ;;  %899 = vst.msk [vmem:[#allocation3 + $0x1c] sm:$0xf] %vm891_vm0, %v882_v47 }
  0xda   : > { %v2168_v55 = vrot.slane %v2167_v39, 4 }
  0xdb   : > { %v2159_v34 = vsel %vm4075_vm12, %v2154_v25, %v2158_v19  ;;  %v1095_v19 = vrot.slane %v1093_v3, 4  ;;  %v1082_v22 = vrot.slane %v1080_v4, 4 }
  0xdc   : > { %1953 = vrot.lane.b32.xlu1 %v3176_v28, %s3696_s11  ;;  %v3208_v28 = vld [vmem:[%s4064_s27 + $0x5c] sm:$0x1]  ;;  %v2173_v11 = vsel %vm4075_vm12, %v2168_v55, %v4300_v21 }
  0xdd   : > { %1951 = vrot.lane.b32.xlu0 %v3175_v15, %s3696_s11  ;;  %v2180_v15 = vshll.u32 %v3208_v28, 16  ;;  %v3520_v21 = vld [vmem:[%s4995_s1 + $0x18] sm:$0xff]   ;;  %v4375_v28 = vld [vmem:[%s4064_s27 + $0x28] sm:$0xf] }
  0xde   : > { %3395 = vmatprep.subr.bf16.mxu0 %v3520_v21  ;;  %3423 = vmatprep.subr.bf16.mxu1 %v3520_v21 }
  0xdf   : > { %v2182_v45 = vrot.slane %v2180_v15, 5  ;;  %3396 = vmatpush3.bf16.msra.mxu0 %v3520_v21  ;;  %3431 = vmatpush3.bf16.msra.mxu1 %v3520_v21 }
  0xe0   : > { %1969 = vrot.lane.b32.xlu1 %v3184_v38, %s3696_s11  ;;  %v2072_v38 = vrot.slane %v2071_v30, 4  ;;  %v3243_v30 = vrot.slane %v3227_v8, 9 }
  0xe1   : > { %1967 = vrot.lane.b32.xlu0 %v3183_v42, %s3696_s11  ;;  %v2347_v42 = vrot.slane %v4314_v20, 5  ;;  %v1086_v20 = vor.u32 %v1085_v23, %v1082_v22  ;;  %v1013_v22 = vrot.slane %v1011_v0, 5  ;;  %v1198_v0 = vld [vmem:[%s4064_s27 + $0x18] sm:$0xe] }
  0xe2   : > { %v2077_v54 = vsel %vm4075_vm12, %v2072_v38, %v4294_v10  ;;  %v999_v10 = vrot.slane %v997_v50, 4  ;;  %v4394_v38 = vld [vmem:[%s4064_s27 + $0x24] sm:$0xe] }
  0xe3   : > { %v2349_v60 = vrot.slane %v2347_v42, 4  ;;  %v2348_v29 = vsel %vm4108_vm15, %v3239_v62, %v2347_v42  ;;  %v4398_v42 = vrot.slane %v1099_v32, 5  ;;  %v1087_v50 = vrot.slane %v1086_v20, 4  ;;  %v4424_v62 = vld [vmem:[%s4064_s27 + $0x5c] sm:$0x1] }
  0xe4   : > { %1957 = vrot.lane.b32.xlu1 %v3178_v44, %s3696_s11  ;;  %v2178_v44 = vrot.slane %v2177_v33, 4  ;;  %v1000_v26 = vor.u32 %v999_v10, %v4357_v9  ;;  %v3522_v33 = vld [vmem:[%s4995_s1 + $0x10] sm:$0xff]   ;;  %v3240_v53 = vrot.slane %v4394_v38, 9  ;;  %v919_v10 = vld [vmem:[%s4064_s27 + $0x2c] sm:$0x1] }
  0xe5   : > { %1955 = vrot.lane.b32.xlu0 %v3177_v59, %s3696_s11  ;;  %v987_v59 = vshll.u32 %v914_v43, 16  ;;  %3397 = vmatprep.subr.bf16.mxu0 %v3522_v33  ;;  %v4401_v43 = vld [vmem:[%s4064_s27 + $0x58] sm:$0xf] }
  0xe6   : > { %v2183_v6 = vsel %vm4075_vm12, %v2178_v44, %v2182_v45  ;;  %v1001_v36 = vrot.slane %v1000_v26, 4  ;;  %v918_v44 = vld [vmem:[%s4064_s27 + $0x28] sm:$0xf]  ;;  %3424 = vmatprep.subr.bf16.mxu1 %v3522_v33  ;;  %3398 = vmatpush3.bf16.msra.mxu0 %v3522_v33  ;;  %v2382_v4 = vrot.slane %v4401_v43, 5 }
  0xe7   : > { %v989_v16 = vrot.slane %v987_v59, 5  ;;  %3432 = vmatpush3.bf16.msra.mxu1 %v3522_v33  ;;  %v1017_v55 = vshll.u32 %v918_v44, 16  ;;  %v879_v59 = vld [vmem:[%s4064_s27 + $0x18] sm:$0xf] }
  0xe8   : > { %1973 = vrot.lane.b32.xlu1 %v3186_v2, %s3696_s11  ;;  %v1089_v2 = vshll.u32 %v927_v52, 16  ;;  %896 = vst.msk [vmem:[#allocation3 + $0x10] sm:$0xf] %vm891_vm0, %v879_v59 }
  0xe9   : > { %1971 = vrot.lane.b32.xlu0 %v3185_v7, %s3696_s11  ;;  %v2375_v7 = vrot.slane %v4343_v56, 5  ;;  %v990_v31 = vor.u32 %v989_v16, %v986_v14  ;;  %v1021_v56 = vshrl.u32 %v918_v44, 16  ;;  %v888_v16 = vld [vmem:[%s4064_s27 + $0x4c] sm:$0xf] }
  0xea   : > { %905 = vst.msk [vmem:[#allocation3 + $0x34] sm:$0xf] %vm891_vm0, %v888_v16 }
  0xeb   : > { %v2377_v25 = vrot.slane %v2375_v7, 4  ;;  %v2376_v40 = vsel %vm4108_vm15, %v3243_v30, %v2375_v7  ;;  %v991_v41 = vrot.slane %v990_v31, 4  ;;  %v3525_v7 = vld [vmem:[%s4995_s1] sm:$0xff]   ;;  %v2384_v30 = vrot.slane %v2382_v4, 4 }
  0xec   : > { %2234 = vrot.lane.b32.xlu1 %v2063_v18, %s3697_s14  ;;  %v4365_v18 = vrot.slane %v1089_v2, 5  ;;  %v930_v2 = vld [vmem:[%s4064_s27 + $0x58] sm:$0xf] }
  0xed   : > { %2232 = vrot.lane.b32.xlu0 %v2053_v24, %s3697_s14  ;;  %v2351_v24 = vsel %vm4108_vm15, %v2349_v60, %v2350_v61  ;;  %v2379_v35 = vsel %vm4108_vm15, %v2377_v25, %v2378_v12  ;;  %v996_v61 = vsel %vm4075_vm12, %v991_v41, %v4357_v9  ;;  %v1023_v12 = vrot.slane %v1021_v56, 4  ;;  %v889_v56 = vld [vmem:[%s4064_s27 + $0x54] sm:$0xf] }
  0xee   : > { %v1096_v15 = vor.u32 %v1095_v19, %v4365_v18  ;;  %v1092_v9 = vsel %vm4075_vm12, %v1087_v50, %v4365_v18  ;;  %v1113_v13 = vshll.u32 %v930_v2, 16  ;;  %v1117_v14 = vshrl.u32 %v930_v2, 16  ;;  %v890_v50 = vld [vmem:[%s4064_s27 + $0x58] sm:$0xf]  ;;  %906 = vst.msk [vmem:[#allocation3 + $0x38] sm:$0xf] %vm891_vm0, %v889_v56 }
  0xef   : > { %v1010_v19 = vrot.slane %v1008_v63, 4  ;;  %v2385_v25 = vrot.slane %v4424_v62, 5  ;;  %907 = vst.msk [vmem:[#allocation3 + $0x3c] sm:$0xf] %vm891_vm0, %v890_v50  ;;  %v1211_v62 = vld [vmem:[%s4064_s27 + $0x4c] sm:$0xf] }
  0xf0   : > { %2250 = vrot.lane.b32.xlu1 %v2159_v34, %s3697_s14  ;;  %v2354_v34 = vrot.slane %v4375_v28, 5  ;;  %v1097_v49 = vrot.slane %v1096_v15, 4  ;;  %v4462_v32 = vrot.slane %v1113_v13, 5  ;;  %v1119_v33 = vrot.slane %v1117_v14, 4  ;;  %v3136_v50 = vld [vmem:[%s4064_s27 + $0x58] sm:$0xf] }
  0xf1   : > { %2248 = vrot.lane.b32.xlu0 %v2149_v37, %s3697_s14  ;;  %v1005_v37 = vrot.slane %v1003_v27, 5  ;;  %v3244_v27 = vrot.slane %v3230_v5, 9  ;;  %v1014_v1 = vor.u32 %v1013_v22, %v1010_v19  ;;  %v1287_v5 = vrot.slane %v1211_v62, 5 }
  0xf2   : > { %v2356_v52 = vrot.slane %v2354_v34, 4  ;;  %v1102_v8 = vsel %vm4075_vm12, %v1097_v49, %v4398_v42  ;;  %v2355_v20 = vsel %vm4108_vm15, %v3240_v53, %v2354_v34  ;;  %v2386_v34 = vsel %vm4108_vm15, %v2384_v30, %v2385_v25  ;;  %v1201_v25 = vld [vmem:[%s4064_s27 + $0x24] sm:$0xe] }
  0xf3   : > { %v1120_v41 = vor.u32 %v1119_v33, %v4462_v32  ;;  %v2383_v44 = vsel %vm4108_vm15, %v3244_v27, %v2382_v4  ;;  %v1289_v14 = vrot.slane %v1287_v5, 4  ;;  %v3094_v33 = vrot.slane %v1201_v25, 9 }
  0xf4   : > { %2238 = vrot.lane.b32.xlu1 %v2087_v48, %s3697_s14  ;;  %v3524_v48 = vld [vmem:[%s4995_s1 + $0x8] sm:$0xff]   ;;  %v2358_v26 = vsel %vm4108_vm15, %v2356_v52, %v2357_v46 }
  0xf5   : > { %2236 = vrot.lane.b32.xlu0 %v2077_v54, %s3697_s14  ;;  %v1006_v54 = vsel %vm4075_vm12, %v1001_v36, %v1005_v37  ;;  %3399 = vmatprep.subr.bf16.mxu0 %v3524_v48  ;;  %v1121_v53 = vrot.slane %v1120_v41, 4  ;;  %v3124_v41 = vld [vmem:[%s4064_s27 + $0x28] sm:$0xf] }
  0xf6   : > { %3425 = vmatprep.subr.bf16.mxu1 %v3524_v48  ;;  %3400 = vmatpush3.bf16.msra.mxu0 %v3524_v48  ;;  %v1551_v47 = vshrl.u32 %v3124_v41, 16 }
  0xf7   : > { %3433 = vmatpush3.bf16.msra.mxu1 %v3524_v48  ;;  %3401 = vmatprep.subr.bf16.mxu0 %v3525_v7  ;;  %v881_v48 = vld [vmem:[%s4064_s27 + $0x24] sm:$0xf] }
  0xf8   : > { %2254 = vrot.lane.b32.xlu1 %v2183_v6, %s3697_s14  ;;  %v929_v6 = vld [vmem:[%s4064_s27 + $0x54] sm:$0xf]  ;;  %3426 = vmatprep.subr.bf16.mxu1 %v3525_v7  ;;  %898 = vst.msk [vmem:[#allocation3 + $0x18] sm:$0xf] %vm891_vm0, %v881_v48  ;;  %v1553_v62 = vrot.slane %v1551_v47, 4 }
  0xf9   : > { %2252 = vrot.lane.b32.xlu0 %v2173_v11, %s3697_s14  ;;  %v4446_v11 = vrot.slane %v1017_v55, 5  ;;  %v1104_v23 = vshrl.u32 %v929_v6, 16  ;;  %v1107_v21 = vshll.u32 %v929_v6, 16 }
  0xfa   : > { %3402 = vmatpush3.bf16.msra.mxu0 %v3525_v7 }
  0xfb   : > { %3434 = vmatpush3.bf16.msra.mxu1 %v3525_v7  ;;  %v1024_v31 = vor.u32 %v1023_v12, %v4446_v11  ;;  %v1106_v36 = vrot.slane %v1104_v23, 4  ;;  %v1109_v37 = vrot.slane %v1107_v21, 5  ;;  %v1210_v12 = vld [vmem:[%s4064_s27 + $0x48] sm:$0xe]  ;;  %v1203_v21 = vld [vmem:[%s4064_s27 + $0x2c] sm:$0x1] }
  0xfc   : > { %2403 = vrot.lane.b32.xlu1 %v2351_v24, %s3698_s12  ;;  %v887_v24 = vld [vmem:[%s4064_s27 + $0x48] sm:$0xf]  ;;  %v3097_v23 = vrot.slane %v1210_v12, 9 }
  0xfd   : > { %2401 = vrot.lane.b32.xlu0 %v2348_v29, %s3698_s12  ;;  %904 = vst.msk [vmem:[#allocation3 + $0x30] sm:$0xf] %vm891_vm0, %v887_v24  ;;  %v1027_v29 = vshll.u32 %v919_v10, 16  ;;  %v1025_v38 = vrot.slane %v1024_v31, 4  ;;  %v1110_v46 = vor.u32 %v1109_v37, %v1106_v36  ;;  %v1202_v10 = vld [vmem:[%s4064_s27 + $0x28] sm:$0xf] }
  0xfe   : > { %v1144_v39 = vpop.permute.xlu1 %1143  ;;  %v1214_v24 = vld [vmem:[%s4064_s27 + $0x58] sm:$0xf] }
  0xff   : > { %1184 = vst.msk [vmem:[#allocation3 + $0x20] sm:$0xf] %vm1175_vm1, %v1144_v39  ;;  %v1128_v45 = vpop.permute.xlu0 %1127  ;;  %v1029_v28 = vrot.slane %v1027_v29, 5  ;;  %v1269_v29 = vrot.slane %v1203_v21, 5  ;;  %v1294_v30 = vrot.slane %v1214_v24, 5 }
 0x100   : > { %1176 = vst.msk [vmem:[#allocation3] sm:$0xf] %vm1175_vm1, %v1128_v45  ;;  %2419 = vrot.lane.b32.xlu1 %v2379_v35, %s3698_s12  ;;  %v931_v35 = vld [vmem:[%s4064_s27 + $0x5c] sm:$0x1]  ;;  %v1015_v45 = vrot.slane %v1014_v1, 4 }
 0x101   : > { %2417 = vrot.lane.b32.xlu0 %v2376_v40, %s3698_s12  ;;  %v1199_v40 = vld [vmem:[%s4064_s27 + $0x1c] sm:$0xf]  ;;  %v1123_v42 = vshll.u32 %v931_v35, 16  ;;  %v1030_v52 = vsel %vm4075_vm12, %v1025_v38, %v1029_v28  ;;  %v1213_v1 = vld [vmem:[%s4064_s27 + $0x54] sm:$0xe]  ;;  %v1296_v36 = vrot.slane %v1294_v30, 4 }
 0x102   : > { %v1146_v60 = vpop.permute.xlu1 %1145  ;;  %v1259_v55 = vrot.slane %v1199_v40, 5  ;;  %v1020_v59 = vsel %vm4075_vm12, %v1015_v45, %v4446_v11  ;;  %v3098_v40 = vrot.slane %v1213_v1, 9 }
 0x103   : > { %1185 = vst.msk [vmem:[#allocation3 + $0x24] sm:$0xf] %vm1175_vm1, %v1146_v60  ;;  %v1130_v3 = vpop.permute.xlu0 %1129  ;;  %v1111_v60 = vrot.slane %v1110_v46, 4  ;;  %v1547_v46 = vshll.u32 %v3124_v41, 16 }
 0x104   : > { %1177 = vst.msk [vmem:[#allocation3 + $0x4] sm:$0xf] %vm1175_vm1, %v1130_v3  ;;  %1137 = vrot.lane.b32.xlu1 %v1006_v54, %s3691_s30  ;;  %v1125_v54 = vrot.slane %v1123_v42, 5  ;;  %v1261_v3 = vrot.slane %v1259_v55, 4  ;;  %v3123_v42 = vld [vmem:[%s4064_s27 + $0x24] sm:$0xf] }
 0x105   : > { %1135 = vrot.lane.b32.xlu0 %v996_v61, %s3691_s30  ;;  %v1200_v61 = vld [vmem:[%s4064_s27 + $0x20] sm:$0x1]  ;;  %v1116_v7 = vsel %vm4075_vm12, %v1111_v60, %v4462_v32  ;;  %v1288_v32 = vsel %vm4108_vm15, %v3097_v23, %v1287_v5  ;;  %v1538_v48 = vshrl.u32 %v3123_v42, 16  ;;  %v3125_v60 = vld [vmem:[%s4064_s27 + $0x2c] sm:$0x1] }
 0x106   : > { %v1134_v17 = vpop.permute.xlu1 %1133  ;;  %v1126_v2 = vsel %vm4075_vm12, %v1121_v53, %v1125_v54  ;;  %v1262_v4 = vrot.slane %v1200_v61, 5  ;;  %v3105_v54 = vld [vmem:[%s4064_s27 + $0x24] sm:$0xf]  ;;  %v4564_v61 = vrot.slane %v1547_v46, 5  ;;  %v3127_v5 = vld [vmem:[%s4064_s27 + $0x34] sm:$0xf] }
 0x107   : > { %1179 = vst.msk [vmem:[#allocation3 + $0xc] sm:$0xf] %vm1175_vm1, %v1134_v17  ;;  %v1132_v18 = vpop.permute.xlu0 %1131  ;;  %v1266_v17 = vrot.slane %v1202_v10, 5  ;;  %v1575_v21 = vshrl.u32 %v3127_v5, 16 }
 0x108   : > { %1178 = vst.msk [vmem:[#allocation3 + $0x8] sm:$0xf] %vm1175_vm1, %v1132_v18  ;;  %1153 = vrot.lane.b32.xlu1 %v1102_v8, %s3691_s30  ;;  %v3093_v8 = vrot.slane %v1198_v0, 9  ;;  %v1263_v13 = vsel %vm4108_vm15, %v1261_v3, %v1262_v4  ;;  %v1554_v12 = vor.u32 %v1553_v62, %v4564_v61 }
 0x109   : > { %1151 = vrot.lane.b32.xlu0 %v1092_v9, %s3691_s30  ;;  %v1212_v9 = vld [vmem:[%s4064_s27 + $0x50] sm:$0x1]  ;;  %v1268_v27 = vrot.slane %v1266_v17, 4  ;;  %v1267_v28 = vsel %vm4108_vm15, %v3094_v33, %v1266_v17  ;;  %v1571_v17 = vshll.u32 %v3127_v5, 16  ;;  %v3116_v33 = vld [vmem:[%s4064_s27 + $0x64] sm:$0xf] }
 0x10a   : > { %v1150_v15 = vpop.permute.xlu1 %1149  ;;  %v1290_v16 = vrot.slane %v1212_v9, 5  ;;  %v1260_v22 = vsel %vm4108_vm15, %v3093_v8, %v1259_v55  ;;  %v3135_v55 = vld [vmem:[%s4064_s27 + $0x54] sm:$0xf]  ;;  %v1557_v9 = vshll.u32 %v3125_v60, 16 }
 0x10b   : > { %1187 = vst.msk [vmem:[#allocation3 + $0x2c] sm:$0xf] %vm1175_vm1, %v1150_v15  ;;  %v1148_v39 = vpop.permute.xlu0 %1147  ;;  %v1215_v15 = vld [vmem:[%s4064_s27 + $0x5c] sm:$0x1]  ;;  %v1270_v35 = vsel %vm4108_vm15, %v1268_v27, %v1269_v29  ;;  %v1634_v3 = vshrl.u32 %v3135_v55, 16  ;;  %v1637_v4 = vshll.u32 %v3135_v55, 16 }
 0x10c   : > { %1186 = vst.msk [vmem:[#allocation3 + $0x28] sm:$0xf] %vm1175_vm1, %v1148_v39  ;;  %2407 = vrot.lane.b32.xlu1 %v2358_v26, %s3698_s12  ;;  %v1291_v26 = vsel %vm4108_vm15, %v1289_v14, %v1290_v16  ;;  %v1297_v37 = vrot.slane %v1215_v15, 5  ;;  %v3137_v14 = vld [vmem:[%s4064_s27 + $0x5c] sm:$0x1]  ;;  %v1555_v15 = vrot.slane %v1554_v12, 4 }
 0x10d   : > { %2405 = vrot.lane.b32.xlu0 %v2355_v20, %s3698_s12  ;;  %v1639_v23 = vrot.slane %v1637_v4, 5  ;;  %v3139_v27 = vld [vmem:[%s4064_s27 + $0x64] sm:$0xf] }
 0x10e   : > { %v1302_v43 = vpop.permute.xlu1 %1301  ;;  %v1298_v38 = vsel %vm4108_vm15, %v1296_v36, %v1297_v37  ;;  %v3128_v37 = vld [vmem:[%s4064_s27 + $0x38] sm:$0x1] }
 0x10f   : > { %1349 = vst.msk [vmem:[#allocation3 + $0x4] sm:$0xf] %vm1347_vm2, %v1302_v43  ;;  %v1300_v49 = vpop.permute.xlu0 %1299 }
 0x110   : > { %1348 = vst.msk [vmem:[#allocation3] sm:$0xf] %vm1347_vm2, %v1300_v49  ;;  %2423 = vrot.lane.b32.xlu1 %v2386_v34, %s3698_s12  ;;  %v1541_v49 = vshll.u32 %v3123_v42, 16 }
 0x111   : > { %2421 = vrot.lane.b32.xlu0 %v2383_v44, %s3698_s12  ;;  %v1295_v44 = vsel %vm4108_vm15, %v3098_v40, %v1294_v30  ;;  %v1559_v30 = vrot.slane %v1557_v9, 5  ;;  %v1671_v40 = vshrl.u32 %v3139_v27, 16  ;;  %v3148_v9 = vld [vmem:[%s4064_s27 + $0x28] sm:$0xf] }
 0x112   : > { %v1318_v57 = vpop.permute.xlu1 %1317  ;;  %v1543_v0 = vrot.slane %v1541_v49, 5  ;;  %v1581_v49 = vshll.u32 %v3128_v37, 16 }
 0x113   : > { %1357 = vst.msk [vmem:[#allocation3 + $0x24] sm:$0xf] %vm1347_vm2, %v1318_v57  ;;  %v1316_v63 = vpop.permute.xlu0 %1315  ;;  %v1643_v57 = vshll.u32 %v3136_v50, 16  ;;  %v1560_v46 = vsel %vm4075_vm12, %v1555_v15, %v1559_v30 }
 0x114   : > { %1356 = vst.msk [vmem:[#allocation3 + $0x20] sm:$0xf] %vm1347_vm2, %v1316_v63  ;;  %1141 = vrot.lane.b32.xlu1 %v1030_v52, %s3691_s30  ;;  %v3106_v52 = vld [vmem:[%s4064_s27 + $0x28] sm:$0xf]  ;;  %v1540_v63 = vrot.slane %v1538_v48, 4 }
 0x115   : > { %1139 = vrot.lane.b32.xlu0 %v1020_v59, %s3691_s30  ;;  %v1647_v59 = vshrl.u32 %v3136_v50, 16  ;;  %v4571_v10 = vrot.slane %v1643_v57, 5 }
 0x116   : > { %v1306_v6 = vpop.permute.xlu1 %1305 }
 0x117   : > { %1351 = vst.msk [vmem:[#allocation3 + $0xc] sm:$0xf] %vm1347_vm2, %v1306_v6  ;;  %v1304_v11 = vpop.permute.xlu0 %1303  ;;  %v1649_v16 = vrot.slane %v1647_v59, 4  ;;  %v3140_v59 = vld [vmem:[%s4064_s27 + $0x68] sm:$0x1] }
 0x118   : > { %1350 = vst.msk [vmem:[#allocation3 + $0x8] sm:$0xf] %vm1347_vm2, %v1304_v11  ;;  %1157 = vrot.lane.b32.xlu1 %v1126_v2, %s3691_s30  ;;  %v3114_v2 = vld [vmem:[%s4064_s27 + $0x58] sm:$0xf]  ;;  %v3126_v11 = vld [vmem:[%s4064_s27 + $0x30] sm:$0xf] }
 0x119   : > { %1155 = vrot.lane.b32.xlu0 %v1116_v7, %s3691_s30  ;;  %v3113_v7 = vld [vmem:[%s4064_s27 + $0x54] sm:$0xf]  ;;  %v1562_v25 = vshrl.u32 %v3126_v11, 16  ;;  %v1650_v1 = vor.u32 %v1649_v16, %v4571_v10  ;;  %v1677_v4 = vshll.u32 %v3140_v59, 16 }
 0x11a   : > { %v1322_v19 = vpop.permute.xlu1 %1321 }
 0x11b   : > { %1359 = vst.msk [vmem:[#allocation3 + $0x2c] sm:$0xf] %vm1347_vm2, %v1322_v19  ;;  %v1320_v18 = vpop.permute.xlu0 %1319  ;;  %v3108_v19 = vld [vmem:[%s4064_s27 + $0x34] sm:$0xf]  ;;  %v1564_v41 = vrot.slane %v1562_v25, 4  ;;  %v1651_v47 = vrot.slane %v1650_v1, 4 }
 0x11c   : > { %1358 = vst.msk [vmem:[#allocation3 + $0x28] sm:$0xf] %vm1347_vm2, %v1320_v18  ;;  %1309 = vrot.lane.b32.xlu1 %v1263_v13, %s3692_s5  ;;  %v1544_v13 = vor.u32 %v1543_v0, %v1540_v63  ;;  %v3107_v18 = vld [vmem:[%s4064_s27 + $0x30] sm:$0xf] }
 0x11d   : > { %1307 = vrot.lane.b32.xlu0 %v1260_v22, %s3692_s5  ;;  %v1636_v22 = vrot.slane %v1634_v3, 4 }
 0x11e   : > { %v1403_v31 = vpop.permute.xlu1 %1402 }
 0x11f   : > { %1450 = vst.msk [vmem:[#allocation3 + $0x4] sm:$0xf] %vm1448_vm3, %v1403_v31  ;;  %v1401_v20 = vpop.permute.xlu0 %1400  ;;  %v1653_v31 = vshll.u32 %v3137_v14, 16  ;;  %v1640_v36 = vor.u32 %v1639_v23, %v1636_v22  ;;  %v1810_v14 = vrot.slane %v3148_v9, 5  ;;  %v3149_v22 = vld [vmem:[%s4064_s27 + $0x2c] sm:$0x1] }
 0x120   : > { %1449 = vst.msk [vmem:[#allocation3] sm:$0xf] %vm1448_vm3, %v1401_v20  ;;  %1325 = vrot.lane.b32.xlu1 %v1291_v26, %s3692_s5  ;;  %v1565_v26 = vshll.u32 %v3126_v11, 16  ;;  %v1545_v20 = vrot.slane %v1544_v13, 4  ;;  %v3160_v23 = vld [vmem:[%s4064_s27 + $0x58] sm:$0xf] }
 0x121   : > { %1323 = vrot.lane.b32.xlu0 %v1288_v32, %s3692_s5  ;;  %v3138_v32 = vld [vmem:[%s4064_s27 + $0x60] sm:$0xf]  ;;  %v1655_v48 = vrot.slane %v1653_v31, 5  ;;  %v1812_v25 = vrot.slane %v1810_v14, 4  ;;  %v3180_v9 = vld [vmem:[%s4064_s27 + $0x34] sm:$0xf] }
 0x122   : > { %v1419_v39 = vpop.permute.xlu1 %1418  ;;  %v1567_v42 = vrot.slane %v1565_v26, 5  ;;  %v1550_v50 = vsel %vm4075_vm12, %v1545_v20, %v4564_v61  ;;  %v1813_v26 = vrot.slane %v3149_v22, 5  ;;  %v3159_v20 = vld [vmem:[%s4064_s27 + $0x54] sm:$0xe] }
 0x123   : > { %1458 = vst.msk [vmem:[#allocation3 + $0x24] sm:$0xf] %vm1448_vm3, %v1419_v39  ;;  %v1417_v34 = vpop.permute.xlu0 %1416  ;;  %v1577_v39 = vrot.slane %v1575_v21, 4  ;;  %v1656_v61 = vsel %vm4075_vm12, %v1651_v47, %v1655_v48 }
 0x124   : > { %1457 = vst.msk [vmem:[#allocation3 + $0x20] sm:$0xf] %vm1448_vm3, %v1417_v34  ;;  %1313 = vrot.lane.b32.xlu1 %v1270_v35, %s3692_s5  ;;  %v4588_v35 = vrot.slane %v1571_v17, 5  ;;  %v1568_v57 = vor.u32 %v1567_v42, %v1564_v41  ;;  %v1814_v1 = vsel %vm4108_vm15, %v1812_v25, %v1813_v26  ;;  %v3150_v42 = vld [vmem:[%s4064_s27 + $0x30] sm:$0xe] }
 0x125   : > { %1311 = vrot.lane.b32.xlu0 %v1267_v28, %s3692_s5  ;;  %v1667_v28 = vshll.u32 %v3139_v27, 16  ;;  %v1838_v27 = vrot.slane %v3160_v23, 5 }
 0x126   : > { %v1407_v43 = vpop.permute.xlu1 %1406 }
 0x127   : > { %1452 = vst.msk [vmem:[#allocation3 + $0xc] sm:$0xf] %vm1448_vm3, %v1407_v43  ;;  %v1405_v45 = vpop.permute.xlu0 %1404  ;;  %v1658_v43 = vshrl.u32 %v3138_v32, 16 }
 0x128   : > { %1451 = vst.msk [vmem:[#allocation3 + $0x8] sm:$0xf] %vm1448_vm3, %v1405_v45  ;;  %1329 = vrot.lane.b32.xlu1 %v1298_v38, %s3692_s5  ;;  %v3115_v38 = vld [vmem:[%s4064_s27 + $0x60] sm:$0xf] }
 0x129   : > { %1327 = vrot.lane.b32.xlu0 %v1295_v44, %s3692_s5  ;;  %v1661_v44 = vshll.u32 %v3138_v32, 16  ;;  %v1660_v60 = vrot.slane %v1658_v43, 4  ;;  %v3161_v32 = vld [vmem:[%s4064_s27 + $0x5c] sm:$0x1] }
 0x12a   : > { %v1423_v53 = vpop.permute.xlu1 %1422 }
 0x12b   : > { %1460 = vst.msk [vmem:[#allocation3 + $0x2c] sm:$0xf] %vm1448_vm3, %v1423_v53  ;;  %v1421_v56 = vpop.permute.xlu0 %1420  ;;  %v1669_v53 = vrot.slane %v1667_v28, 5  ;;  %v1663_v62 = vrot.slane %v1661_v44, 5 }
 0x12c   : > { %1459 = vst.msk [vmem:[#allocation3 + $0x28] sm:$0xf] %vm1448_vm3, %v1421_v56  ;;  %1410 = vrot.lane.b32.xlu1 %v3106_v52, %s3693_s6  ;;  %v1578_v52 = vor.u32 %v1577_v39, %v4588_v35  ;;  %v1641_v56 = vrot.slane %v1640_v36, 4  ;;  %v1841_v36 = vrot.slane %v3161_v32, 5 }
 0x12d   : > { %1408 = vrot.lane.b32.xlu0 %v3105_v54, %s3693_s6  ;;  %v1673_v54 = vrot.slane %v1671_v40, 4  ;;  %v3171_v40 = vrot.slane %v3159_v20, 9 }
 0x12e   : > { %v1684_v6 = vpop.permute.xlu1 %1683  ;;  %v1579_v0 = vrot.slane %v1578_v52, 4 }
 0x12f   : > { %1731 = vst.msk [vmem:[#allocation3 + $0x4] sm:$0xf] %vm1729_vm4, %v1684_v6  ;;  %v1682_v8 = vpop.permute.xlu0 %1681  ;;  %v1674_v3 = vor.u32 %v1673_v54, %v1669_v53  ;;  %v1646_v6 = vsel %vm4075_vm12, %v1641_v56, %v4571_v10  ;;  %v1679_v10 = vrot.slane %v1677_v4, 5  ;;  %v1839_v48 = vsel %vm4108_vm15, %v3171_v40, %v1838_v27 }
 0x130   : > { %1730 = vst.msk [vmem:[#allocation3] sm:$0xf] %vm1729_vm4, %v1682_v8  ;;  %1426 = vrot.lane.b32.xlu1 %v3114_v2, %s3693_s6  ;;  %v1583_v2 = vrot.slane %v1581_v49, 5  ;;  %v1664_v8 = vor.u32 %v1663_v62, %v1660_v60  ;;  %v3168_v49 = vrot.slane %v3150_v42, 9 }
 0x131   : > { %1424 = vrot.lane.b32.xlu0 %v3113_v7, %s3693_s6  ;;  %v1569_v7 = vrot.slane %v1568_v57, 4  ;;  %v1675_v13 = vrot.slane %v1674_v3, 4 }
 0x132   : > { %v1700_v24 = vpop.permute.xlu1 %1699  ;;  %v1584_v12 = vsel %vm4075_vm12, %v1579_v0, %v1583_v2  ;;  %v3197_v0 = vld [vmem:[%s4064_s27 + $0x30] sm:$0xf] }
 0x133   : > { %1739 = vst.msk [vmem:[#allocation3 + $0x24] sm:$0xf] %vm1729_vm4, %v1700_v24  ;;  %v1698_v29 = vpop.permute.xlu0 %1697  ;;  %v1574_v17 = vsel %vm4075_vm12, %v1569_v7, %v4588_v35  ;;  %v3147_v24 = vld [vmem:[%s4064_s27 + $0x24] sm:$0xe]  ;;  %v1840_v35 = vrot.slane %v1838_v27, 4  ;;  %v2089_v7 = vshrl.u32 %v3197_v0, 16 }
 0x134   : > { %1738 = vst.msk [vmem:[#allocation3 + $0x20] sm:$0xf] %vm1729_vm4, %v1698_v29  ;;  %1414 = vrot.lane.b32.xlu1 %v3108_v19, %s3693_s6  ;;  %v1665_v19 = vrot.slane %v1664_v8, 4  ;;  %v3167_v31 = vrot.slane %v3147_v24, 9  ;;  %v2092_v8 = vshll.u32 %v3197_v0, 16 }
 0x135   : > { %1412 = vrot.lane.b32.xlu0 %v3107_v18, %s3693_s6  ;;  %v1680_v18 = vsel %vm4075_vm12, %v1675_v13, %v1679_v10  ;;  %v1842_v43 = vsel %vm4108_vm15, %v1840_v35, %v1841_v36  ;;  %v3179_v13 = vld [vmem:[%s4064_s27 + $0x30] sm:$0xf]  ;;  %v3209_v10 = vld [vmem:[%s4064_s27 + $0x60] sm:$0xf]  ;;  %v2091_v22 = vrot.slane %v2089_v7, 4 }
 0x136   : > { %v1688_v34 = vpop.permute.xlu1 %1687  ;;  %v1670_v30 = vsel %vm4075_vm12, %v1665_v19, %v1669_v53  ;;  %v1811_v28 = vsel %vm4108_vm15, %v3167_v31, %v1810_v14  ;;  %v3162_v53 = vld [vmem:[%s4064_s27 + $0x60] sm:$0xe]  ;;  %v3199_v19 = vld [vmem:[%s4064_s27 + $0x38] sm:$0x1]  ;;  %v2094_v23 = vrot.slane %v2092_v8, 5  ;;  %v2185_v25 = vshrl.u32 %v3209_v10, 16 }
 0x137   : > { %1733 = vst.msk [vmem:[#allocation3 + $0xc] sm:$0xf] %vm1729_vm4, %v1688_v34  ;;  %v1686_v45 = vpop.permute.xlu0 %1685  ;;  %v3152_v34 = vld [vmem:[%s4064_s27 + $0x38] sm:$0x1]  ;;  %v3172_v60 = vrot.slane %v3162_v53, 9  ;;  %v2188_v26 = vshll.u32 %v3209_v10, 16 }
 0x138   : > { %1732 = vst.msk [vmem:[#allocation3 + $0x8] sm:$0xf] %vm1729_vm4, %v1686_v45  ;;  %1430 = vrot.lane.b32.xlu1 %v3116_v33, %s3693_s6  ;;  %v3151_v33 = vld [vmem:[%s4064_s27 + $0x34] sm:$0xf]  ;;  %v1820_v45 = vrot.slane %v3152_v34, 5  ;;  %v2095_v20 = vor.u32 %v2094_v23, %v2091_v22 }
 0x139   : > { %1428 = vrot.lane.b32.xlu0 %v3115_v38, %s3693_s6  ;;  %v1817_v37 = vrot.slane %v3151_v33, 5  ;;  %v3163_v38 = vld [vmem:[%s4064_s27 + $0x64] sm:$0xf]  ;;  %v3201_v27 = vld [vmem:[%s4064_s27 + $0x40] sm:$0xf]  ;;  %v2108_v33 = vshll.u32 %v3199_v19, 16 }
 0x13a   : > { %v1704_v55 = vpop.permute.xlu1 %1703  ;;  %v2190_v40 = vrot.slane %v2188_v26, 5  ;;  %v2126_v34 = vshrl.u32 %v3201_v27, 16  ;;  %v3214_v19 = vld [vmem:[%s4064_s27 + $0x74] sm:$0x1]  ;;  %s3699_s6 = smov [#allocation4]  }
 0x13b   : > { %1741 = vst.msk [vmem:[#allocation3 + $0x2c] sm:$0xf] %vm1729_vm4, %v1704_v55  ;;  %v1702_v63 = vpop.permute.xlu0 %1701  ;;  %v1819_v44 = vrot.slane %v1817_v37, 4  ;;  %v1818_v59 = vsel %vm4108_vm15, %v3168_v49, %v1817_v37  ;;  %v2122_v37 = vshll.u32 %v3201_v27, 16  ;;  %v3190_v49 = vld [vmem:[%s4064_s27 + $0x70] sm:$0xf] }
 0x13c   : > { %1740 = vst.msk [vmem:[#allocation3 + $0x28] sm:$0xf] %vm1729_vm4, %v1702_v63  ;;  %1691 = vrot.lane.b32.xlu1 %v1560_v46, %s3694_s9  ;;  %v1845_v46 = vrot.slane %v3163_v38, 5  ;;  %v3198_v63 = vld [vmem:[%s4064_s27 + $0x34] sm:$0xf]  ;;  %v2228_v26 = vshll.u32 %v3214_v19, 16 }
 0x13d   : > { %1689 = vrot.lane.b32.xlu0 %v1550_v50, %s3694_s9  ;;  %v3164_v50 = vld [vmem:[%s4064_s27 + $0x68] sm:$0x1]  ;;  %v1821_v54 = vsel %vm4108_vm15, %v1819_v44, %v1820_v45  ;;  %v3213_v44 = vld [vmem:[%s4064_s27 + $0x70] sm:$0xf] }
 0x13e   : > { %v1853_v5 = vpop.permute.xlu1 %1852  ;;  %v1847_v55 = vrot.slane %v1845_v46, 4  ;;  %v1848_v56 = vrot.slane %v3164_v50, 5  ;;  %v1846_v3 = vsel %vm4108_vm15, %v3172_v60, %v1845_v46  ;;  %v2110_v46 = vrot.slane %v2108_v33, 5 }
 0x13f   : > { %1900 = vst.msk [vmem:[#allocation3 + $0x4] sm:$0xf] %vm1898_vm5, %v1853_v5  ;;  %v1851_v11 = vpop.permute.xlu0 %1850  ;;  %v2098_v5 = vshll.u32 %v3198_v63, 16  ;;  %v2222_v60 = vshrl.u32 %v3213_v44, 16 }
 0x140   : > { %1899 = vst.msk [vmem:[#allocation3] sm:$0xf] %vm1898_vm5, %v1851_v11  ;;  %1707 = vrot.lane.b32.xlu1 %v1656_v61, %s3694_s9  ;;  %v1849_v61 = vsel %vm4108_vm15, %v1847_v55, %v1848_v56  ;;  %v3210_v11 = vld [vmem:[%s4064_s27 + $0x64] sm:$0xf] }
 0x141   : > { %1705 = vrot.lane.b32.xlu0 %v1646_v6, %s3694_s9  ;;  %v2102_v6 = vshrl.u32 %v3198_v63, 16  ;;  %v2198_v24 = vshrl.u32 %v3210_v11, 16  ;;  %v3202_v56 = vld [vmem:[%s4064_s27 + $0x44] sm:$0x1]  ;;  %v3189_v63 = vld [vmem:[%s4064_s27 + $0x6c] sm:$0xf] }
 0x142   : > { %v1869_v16 = vpop.permute.xlu1 %1868  ;;  %v2132_v8 = vshll.u32 %v3202_v56, 16 }
 0x143   : > { %1908 = vst.msk [vmem:[#allocation3 + $0x24] sm:$0xf] %vm1898_vm5, %v1869_v16  ;;  %v1867_v21 = vpop.permute.xlu0 %1866  ;;  %v4685_v16 = vrot.slane %v2098_v5, 5  ;;  %v2200_v36 = vrot.slane %v2198_v24, 4 }
 0x144   : > { %1907 = vst.msk [vmem:[#allocation3 + $0x20] sm:$0xf] %vm1898_vm5, %v1867_v21  ;;  %1695 = vrot.lane.b32.xlu1 %v1584_v12, %s3694_s9  ;;  %v2194_v21 = vshll.u32 %v3210_v11, 16 }
 0x145   : > { %1693 = vrot.lane.b32.xlu0 %v1574_v17, %s3694_s9  ;;  %v2104_v17 = vrot.slane %v2102_v6, 4 }
 0x146   : > { %v1857_v29 = vpop.permute.xlu1 %1856  ;;  %v4700_v35 = vrot.slane %v2194_v21, 5 }
 0x147   : > { %1902 = vst.msk [vmem:[#allocation3 + $0xc] sm:$0xf] %vm1898_vm5, %v1857_v29  ;;  %v1855_v15 = vpop.permute.xlu0 %1854  ;;  %v2105_v32 = vor.u32 %v2104_v17, %v4685_v16 }
 0x148   : > { %1901 = vst.msk [vmem:[#allocation3 + $0x8] sm:$0xf] %vm1898_vm5, %v1855_v15  ;;  %1711 = vrot.lane.b32.xlu1 %v1680_v18, %s3694_s9  ;;  %v3188_v18 = vld [vmem:[%s4064_s27 + $0x64] sm:$0xf]  ;;  %v3200_v15 = vld [vmem:[%s4064_s27 + $0x3c] sm:$0xf]  ;;  %v2201_v53 = vor.u32 %v2200_v36, %v4700_v35 }
 0x149   : > { %1709 = vrot.lane.b32.xlu0 %v1670_v30, %s3694_s9  ;;  %v3187_v30 = vld [vmem:[%s4064_s27 + $0x60] sm:$0xf]  ;;  %v2113_v42 = vshrl.u32 %v3200_v15, 16  ;;  %v2106_v50 = vrot.slane %v2105_v32, 4  ;;  %v3222_v32 = vld [vmem:[%s4064_s27 + $0x34] sm:$0xf] }
 0x14a   : > { %v1873_v39 = vpop.permute.xlu1 %1872  ;;  %v2361_v36 = vrot.slane %v3222_v32, 5  ;;  %s3600_s9 = sshll.u32 %s3699_s6, 4  ;;  %s3601_s9 = int_to_ptr.vmem [resolvable:$false] %s3600_s9 }
 0x14b   : > { %1910 = vst.msk [vmem:[#allocation3 + $0x2c] sm:$0xf] %vm1898_vm5, %v1873_v39  ;;  %v1871_v41 = vpop.permute.xlu0 %1870  ;;  %v3182_v39 = vld [vmem:[%s4064_s27 + $0x40] sm:$0xf]  ;;  %v2111_v5 = vsel %vm4075_vm12, %v2106_v50, %v2110_v46 }
 0x14c   : > { %1909 = vst.msk [vmem:[#allocation3 + $0x28] sm:$0xf] %vm1898_vm5, %v1871_v41  ;;  %1860 = vrot.lane.b32.xlu1 %v1814_v1, %s3695_s10  ;;  %v3211_v1 = vld [vmem:[%s4064_s27 + $0x68] sm:$0x1]  ;;  %v3181_v41 = vld [vmem:[%s4064_s27 + $0x3c] sm:$0xf] }
 0x14d   : > { %1858 = vrot.lane.b32.xlu0 %v1811_v28, %s3695_s10  ;;  %v2187_v28 = vrot.slane %v2185_v25, 4  ;;  %v3225_v50 = vld [vmem:[%s4064_s27 + $0x40] sm:$0xf] }
 0x14e   : > { %v1954_v47 = vpop.permute.xlu1 %1953 }
 0x14f   : > { %2001 = vst.msk [vmem:[#allocation3 + $0x4] sm:$0xf] %vm1999_vm6, %v1954_v47  ;;  %v1952_v52 = vpop.permute.xlu0 %1951  ;;  %v2204_v47 = vshll.u32 %v3211_v1, 16  ;;  %v2191_v55 = vor.u32 %v2190_v40, %v2187_v28  ;;  %v2230_v1 = vrot.slane %v2228_v26, 5  ;;  %v3221_v40 = vld [vmem:[%s4064_s27 + $0x30] sm:$0xe] }
 0x150   : > { %2000 = vst.msk [vmem:[#allocation3] sm:$0xf] %vm1999_vm6, %v1952_v52  ;;  %1876 = vrot.lane.b32.xlu1 %v1842_v43, %s3695_s10  ;;  %v2116_v43 = vshll.u32 %v3200_v15, 16  ;;  %v2096_v52 = vrot.slane %v2095_v20, 4 }
 0x151   : > { %1874 = vrot.lane.b32.xlu0 %v1839_v48, %s3695_s10  ;;  %v3212_v48 = vld [vmem:[%s4064_s27 + $0x6c] sm:$0xf]  ;;  %v2206_v7 = vrot.slane %v2204_v47, 5 }
 0x152   : > { %v1970_v57 = vpop.permute.xlu1 %1969  ;;  %v2118_v0 = vrot.slane %v2116_v43, 5  ;;  %v2101_v6 = vsel %vm4075_vm12, %v2096_v52, %v4685_v16  ;;  %v2134_v16 = vrot.slane %v2132_v8, 5  ;;  %v2363_v43 = vrot.slane %v2361_v36, 4 }
 0x153   : > { %2009 = vst.msk [vmem:[#allocation3 + $0x24] sm:$0xf] %vm1999_vm6, %v1970_v57  ;;  %v1968_v62 = vpop.permute.xlu0 %1967  ;;  %v2128_v57 = vrot.slane %v2126_v34, 4  ;;  %v3234_v34 = vld [vmem:[%s4064_s27 + $0x64] sm:$0xf] }
 0x154   : > { %2008 = vst.msk [vmem:[#allocation3 + $0x20] sm:$0xf] %vm1999_vm6, %v1968_v62  ;;  %1864 = vrot.lane.b32.xlu1 %v1821_v54, %s3695_s10  ;;  %v4712_v54 = vrot.slane %v2122_v37, 5  ;;  %v2389_v46 = vrot.slane %v3234_v34, 5 }
 0x155   : > { %1862 = vrot.lane.b32.xlu0 %v1818_v59, %s3695_s10  ;;  %v2218_v59 = vshll.u32 %v3213_v44, 16  ;;  %v3241_v44 = vrot.slane %v3221_v40, 9 }
 0x156   : > { %v1958_v2 = vpop.permute.xlu1 %1957  ;;  %v2129_v11 = vor.u32 %v2128_v57, %v4712_v54  ;;  %v2368_v57 = vrot.slane %v3225_v50, 5 }
 0x157   : > { %2003 = vst.msk [vmem:[#allocation3 + $0xc] sm:$0xf] %vm1999_vm6, %v1958_v2  ;;  %v1956_v4 = vpop.permute.xlu0 %1955  ;;  %v2209_v2 = vshrl.u32 %v3212_v48, 16 }
 0x158   : > { %2002 = vst.msk [vmem:[#allocation3 + $0x8] sm:$0xf] %vm1999_vm6, %v1956_v4  ;;  %1880 = vrot.lane.b32.xlu1 %v1849_v61, %s3695_s10  ;;  %v2115_v61 = vrot.slane %v2113_v42, 4 }
 0x159   : > { %1878 = vrot.lane.b32.xlu0 %v1846_v3, %s3695_s10  ;;  %v2212_v3 = vshll.u32 %v3212_v48, 16  ;;  %v2211_v22 = vrot.slane %v2209_v2, 4  ;;  %v3224_v2 = vld [vmem:[%s4064_s27 + $0x3c] sm:$0xe]  ;;  %s3323_s10 = sshll.u32 %s3672_s18, 4 }
 0x15a   : > { %v1974_v12 = vpop.permute.xlu1 %1973  ;;  %v2119_v17 = vor.u32 %v2118_v0, %v2115_v61 }
 0x15b   : > { %2011 = vst.msk [vmem:[#allocation3 + $0x2c] sm:$0xf] %vm1999_vm6, %v1974_v12  ;;  %v1972_v14 = vpop.permute.xlu0 %1971  ;;  %v2220_v12 = vrot.slane %v2218_v59, 5  ;;  %v2214_v23 = vrot.slane %v2212_v3, 5 }
 0x15c   : > { %2010 = vst.msk [vmem:[#allocation3 + $0x28] sm:$0xf] %vm1999_vm6, %v1972_v14  ;;  %1961 = vrot.lane.b32.xlu1 %v3180_v9, %s3696_s11  ;;  %v2202_v9 = vrot.slane %v2201_v53, 4  ;;  %v2192_v14 = vrot.slane %v2191_v55, 4  ;;  %v2391_v55 = vrot.slane %v2389_v46, 4 }
 0x15d   : > { %1959 = vrot.lane.b32.xlu0 %v3179_v13, %s3696_s11  ;;  %v2224_v13 = vrot.slane %v2222_v60, 4  ;;  %v2362_v60 = vsel %vm4108_vm15, %v3241_v44, %v2361_v36 }
 0x15e   : > { %v2235_v29 = vpop.permute.xlu1 %2234  ;;  %v2207_v24 = vsel %vm4075_vm12, %v2202_v9, %v2206_v7  ;;  %v3242_v9 = vrot.slane %v3224_v2, 9 }
 0x15f   : > { %2282 = vst.msk [vmem:[#allocation3 + $0x4] sm:$0xf] %vm2280_vm7, %v2235_v29  ;;  %v2233_v31 = vpop.permute.xlu0 %2232  ;;  %v2225_v25 = vor.u32 %v2224_v13, %v2220_v12  ;;  %v2197_v29 = vsel %vm4075_vm12, %v2192_v14, %v4700_v35  ;;  %v3223_v35 = vld [vmem:[%s4064_s27 + $0x38] sm:$0x1]  ;;  %v3236_v13 = vld [vmem:[%s4064_s27 + $0x6c] sm:$0xe] }
 0x160   : > { %2281 = vst.msk [vmem:[#allocation3] sm:$0xf] %vm2280_vm7, %v2233_v31  ;;  %1977 = vrot.lane.b32.xlu1 %v3188_v18, %s3696_s11  ;;  %v2130_v18 = vrot.slane %v2129_v11, 4  ;;  %v2215_v31 = vor.u32 %v2214_v23, %v2211_v22  ;;  %v3238_v11 = vld [vmem:[%s4064_s27 + $0x74] sm:$0x1]  ;;  %v2369_v22 = vsel %vm4108_vm15, %v3242_v9, %v2368_v57  ;;  %v3246_v23 = vrot.slane %v3236_v13, 9 }
 0x161   : > { %1975 = vrot.lane.b32.xlu0 %v3187_v30, %s3696_s11  ;;  %v2120_v30 = vrot.slane %v2119_v17, 4  ;;  %v2226_v20 = vrot.slane %v2225_v25, 4  ;;  %v2399_v17 = vrot.slane %v3238_v11, 5 }
 0x162   : > { %v2251_v38 = vpop.permute.xlu1 %2250  ;;  %v2135_v15 = vsel %vm4075_vm12, %v2130_v18, %v2134_v16  ;;  %v2216_v28 = vrot.slane %v2215_v31, 4 }
 0x163   : > { %2290 = vst.msk [vmem:[#allocation3 + $0x24] sm:$0xf] %vm2280_vm7, %v2251_v38  ;;  %v2249_v45 = vpop.permute.xlu0 %2248  ;;  %v2231_v42 = vsel %vm4075_vm12, %v2226_v20, %v2230_v1 }
 0x164   : > { %2289 = vst.msk [vmem:[#allocation3 + $0x20] sm:$0xf] %vm2280_vm7, %v2249_v45  ;;  %1965 = vrot.lane.b32.xlu1 %v3182_v39, %s3696_s11  ;;  %v2125_v39 = vsel %vm4075_vm12, %v2120_v30, %v4712_v54  ;;  %v3235_v45 = vld [vmem:[%s4064_s27 + $0x68] sm:$0x1]  ;;  %v2221_v48 = vsel %vm4075_vm12, %v2216_v28, %v2220_v12 }
 0x165   : > { %1963 = vrot.lane.b32.xlu0 %v3181_v41, %s3696_s11  ;;  %v2364_v41 = vrot.slane %v3223_v35, 5  ;;  %v2392_v54 = vrot.slane %v3235_v45, 5 }
 0x166   : > { %v2239_v62 = vpop.permute.xlu1 %2238 }
 0x167   : > { %2284 = vst.msk [vmem:[#allocation3 + $0xc] sm:$0xf] %vm2280_vm7, %v2239_v62  ;;  %v2237_v4 = vpop.permute.xlu0 %2236  ;;  %v2365_v58 = vsel %vm4108_vm15, %v2363_v43, %v2364_v41  ;;  %v3226_v62 = vld [vmem:[%s4064_s27 + $0x44] sm:$0x1]  ;;  %v2393_v3 = vsel %vm4108_vm15, %v2391_v55, %v2392_v54 }
 0x168   : > { %2283 = vst.msk [vmem:[#allocation3 + $0x8] sm:$0xf] %vm2280_vm7, %v2237_v4  ;;  %1981 = vrot.lane.b32.xlu1 %v3190_v49, %s3696_s11  ;;  %v3233_v49 = vld [vmem:[%s4064_s27 + $0x60] sm:$0xe]  ;;  %v2370_v4 = vrot.slane %v2368_v57, 4 }
 0x169   : > { %1979 = vrot.lane.b32.xlu0 %v3189_v63, %s3696_s11  ;;  %v3245_v56 = vrot.slane %v3233_v49, 9  ;;  %v3237_v63 = vld [vmem:[%s4064_s27 + $0x70] sm:$0xf]  ;;  %s3300_s11 = sshll.u32 %s3676_s19, 5  ;;  %s2947_s19 = sshll.u32 %s3808_s23, 4  ;;  %s4936_s19 = int_to_ptr.vmem [resolvable:$true] %s2947_s19 }
 0x16a   : > { %v2255_v10 = vpop.permute.xlu1 %2254  ;;  %s4942_s27 = scalar_lea.sflag [#allocation5], %s246_s8  ;;  %s3596_s5 = scalar_lea.vmem %s4936_s19, 1024 }
 0x16b   : > { %2292 = vst.msk [vmem:[#allocation3 + $0x2c] sm:$0xf] %vm2280_vm7, %v2255_v10  ;;  %v2253_v21 = vpop.permute.xlu0 %2252  ;;  %v2390_v8 = vsel %vm4108_vm15, %v3245_v56, %v2389_v46  ;;  %p3597_p0 = scmp.ne.s32.totalorder %s4936_s19, %s3596_s5  ;;  %p3603_p4 = scmp.lt.s32.totalorder %s4936_s19, %s3601_s9 }
 0x16c   : > { %2291 = vst.msk [vmem:[#allocation3 + $0x28] sm:$0xf] %vm2280_vm7, %v2253_v21  ;;  %2242 = vrot.lane.b32.xlu1 %v2111_v5, %s3697_s14  ;;  %v2371_v5 = vrot.slane %v3226_v62, 5 }
 0x16d   : > { %2240 = vrot.lane.b32.xlu0 %v2101_v6, %s3697_s14  ;;  %v2396_v6 = vrot.slane %v3237_v63, 5  ;;  %p3598_p1 = pnand %p3597_p0, %p3777_p3 }
 0x16e   : > { %v2404_v27 = vpop.permute.xlu1 %2403  ;;  %v2372_v10 = vsel %vm4108_vm15, %v2370_v4, %v2371_v5 }
 0x16f   : > { %2451 = vst.msk [vmem:[#allocation3 + $0x4] sm:$0xf] %vm2449_vm8, %v2404_v27  ;;  %v2402_v33 = vpop.permute.xlu0 %2401  ;;  %v2398_v14 = vrot.slane %v2396_v6, 4  ;;  %v2397_v18 = vsel %vm4108_vm15, %v3246_v23, %v2396_v6  ;;  %p3599_p2 = pneg %p3598_p1 }
 0x170   : > { %2450 = vst.msk [vmem:[#allocation3] sm:$0xf] %vm2449_vm8, %v2402_v33  ;;  %2258 = vrot.lane.b32.xlu1 %v2207_v24, %s3697_s14 }
 0x171   : > { %2256 = vrot.lane.b32.xlu0 %v2197_v29, %s3697_s14  ;;  %v2400_v16 = vsel %vm4108_vm15, %v2398_v14, %v2399_v17 }
 0x172   : > { %v2420_v37 = vpop.permute.xlu1 %2419 }
 0x173   : > { %2459 = vst.msk [vmem:[#allocation3 + $0x24] sm:$0xf] %vm2449_vm8, %v2420_v37  ;;  %v2418_v38 = vpop.permute.xlu0 %2417 }
 0x174   : > { %2458 = vst.msk [vmem:[#allocation3 + $0x20] sm:$0xf] %vm2449_vm8, %v2418_v38  ;;  %2246 = vrot.lane.b32.xlu1 %v2135_v15, %s3697_s14 }
 0x175   : > { %2244 = vrot.lane.b32.xlu0 %v2125_v39, %s3697_s14 }
 0x176   : > { %v1138_v47 = vpop.permute.xlu1 %1137 }
 0x177   : > { %1181 = vst.msk [vmem:[#allocation3 + $0x14] sm:$0xf] %vm1175_vm1, %v1138_v47  ;;  %v1136_v52 = vpop.permute.xlu0 %1135  ;;  %v3521_v53 = vld [vmem:[#allocation3] sm:$0xff]  }
 0x178   : > { %1180 = vst.msk [vmem:[#allocation3 + $0x10] sm:$0xf] %vm1175_vm1, %v1136_v52  ;;  %2262 = vrot.lane.b32.xlu1 %v2231_v42, %s3697_s14  ;;  %3403 = vmatprep.mubr.bf16.mxu0 %v3521_v53 }
 0x179   : > { %2260 = vrot.lane.b32.xlu0 %v2221_v48, %s3697_s14  ;;  %s2944_s14 = sadd.s32 %s3323_s10, %s3300_s11  ;;  %s3602_s10 = scalar_lea.vmem %s3601_s9, 2048 }
 0x17a   : > { %v1154_v59 = vpop.permute.xlu1 %1153  ;;  %s3301_s18 = sshll.u32 %s2944_s14, 6  ;;  %p3604_p5 = scmp.lt.s32.totalorder %s3602_s10, %s3596_s5 }
 0x17b   : > { %1189 = vst.msk [vmem:[#allocation3 + $0x34] sm:$0xf] %vm1175_vm1, %v1154_v59  ;;  %v1152_v61 = vpop.permute.xlu0 %1151  ;;  %v3523_v0 = vld [vmem:[#allocation3 + $0x20] sm:$0xff]   ;;  %s4934_s24 = scalar_lea.hbm %s4998_s4, %s3301_s18 }
 0x17c   : > { %1188 = vst.msk [vmem:[#allocation3 + $0x30] sm:$0xf] %vm1175_vm1, %v1152_v61  ;;  %2411 = vrot.lane.b32.xlu1 %v2365_v58, %s3698_s12  ;;  %3411 = vmatprep.mubr.bf16.mxu1 %v3523_v0  ;;  %p3605_p6 = por %p3604_p5, %p3603_p4 }
 0x17d   : > { %2409 = vrot.lane.b32.xlu0 %v2362_v60, %s3698_s12 }
 0x17e   : > { %v2408_v7 = vpop.permute.xlu1 %2407  ;;  %p3606_p7 = pnand %p3605_p6, %p3599_p2 }
 0x17f   : > { %2453 = vst.msk [vmem:[#allocation3 + $0xc] sm:$0xf] %vm2449_vm8, %v2408_v7  ;;  %v2406_v12 = vpop.permute.xlu0 %2405 }
 0x180   : > { %2452 = vst.msk [vmem:[#allocation3 + $0x8] sm:$0xf] %vm2449_vm8, %v2406_v12  ;;  %2427 = vrot.lane.b32.xlu1 %v2393_v3, %s3698_s12 }
 0x181   : > { %2425 = vrot.lane.b32.xlu0 %v2390_v8, %s3698_s12 }
 0x182   : > { %v2424_v19 = vpop.permute.xlu1 %2423 }
 0x183   : > { %2461 = vst.msk [vmem:[#allocation3 + $0x2c] sm:$0xf] %vm2449_vm8, %v2424_v19  ;;  %v2422_v21 = vpop.permute.xlu0 %2421 }
 0x184   : > { %2460 = vst.msk [vmem:[#allocation3 + $0x28] sm:$0xf] %vm2449_vm8, %v2422_v21  ;;  %2415 = vrot.lane.b32.xlu1 %v2372_v10, %s3698_s12 }
 0x185   : > { %2413 = vrot.lane.b32.xlu0 %v2369_v22, %s3698_s12 }
 0x186   : > { %v1142_v24 = vpop.permute.xlu1 %1141 }
 0x187   : > { %1183 = vst.msk [vmem:[#allocation3 + $0x1c] sm:$0xf] %vm1175_vm1, %v1142_v24  ;;  %v1140_v25 = vpop.permute.xlu0 %1139  ;;  %v3526_v26 = vld [vmem:[#allocation3 + $0x8] sm:$0xff]  }
 0x188   : > { %1182 = vst.msk [vmem:[#allocation3 + $0x18] sm:$0xf] %vm1175_vm1, %v1140_v25  ;;  %2431 = vrot.lane.b32.xlu1 %v2400_v16, %s3698_s12  ;;  %3404 = vmatmul.mubr.bf16.vlgmr.msra.gmra.mxu0 %v3526_v26  ;;  %v4863_v26 = vld [vmem:[%s4996_s2] ss:$0 sm:$0xff] }
 0x189   : > { %2429 = vrot.lane.b32.xlu0 %v2397_v18, %s3698_s12 }
 0x18a   : > { %v1158_v27 = vpop.permute.xlu1 %1157 }
 0x18b   : > { %1191 = vst.msk [vmem:[#allocation3 + $0x3c] sm:$0xf] %vm1175_vm1, %v1158_v27  ;;  %v1156_v29 = vpop.permute.xlu0 %1155  ;;  %v3527_v30 = vld [vmem:[#allocation3 + $0x28] sm:$0xff]  }
 0x18c   : > { %1190 = vst.msk [vmem:[#allocation3 + $0x38] sm:$0xf] %vm1175_vm1, %v1156_v29  ;;  %3412 = vmatmul.mubr.bf16.vlgmr.msra.gmra.mxu1 %v3527_v30  ;;  %v4868_v29 = vld [vmem:[%s4997_s3] ss:$0 sm:$0xff] }
 0x18e   : > { %v1310_v51 = vpop.permute.xlu1 %1309 }
 0x18f   : > { %1353 = vst.msk [vmem:[#allocation3 + $0x14] sm:$0xf] %vm1347_vm2, %v1310_v51  ;;  %v1308_v31 = vpop.permute.xlu0 %1307 }
 0x190   : > { %1352 = vst.msk [vmem:[#allocation3 + $0x10] sm:$0xf] %vm1347_vm2, %v1308_v31 }
 0x192   : > { %v1326_v32 = vpop.permute.xlu1 %1325 }
 0x193   : > { %1361 = vst.msk [vmem:[#allocation3 + $0x34] sm:$0xf] %vm1347_vm2, %v1326_v32  ;;  %v1324_v33 = vpop.permute.xlu0 %1323 }
 0x194   : > { %1360 = vst.msk [vmem:[#allocation3 + $0x30] sm:$0xf] %vm1347_vm2, %v1324_v33 }
 0x196   : > { %v1314_v15 = vpop.permute.xlu1 %1313 }
 0x197   : > { %1355 = vst.msk [vmem:[#allocation3 + $0x1c] sm:$0xf] %vm1347_vm2, %v1314_v15  ;;  %v1312_v20 = vpop.permute.xlu0 %1311 }
 0x198   : > { %1354 = vst.msk [vmem:[#allocation3 + $0x18] sm:$0xf] %vm1347_vm2, %v1312_v20 }
 0x19a   : > { %v1330_v1 = vpop.permute.xlu1 %1329 }
 0x19b   : > { %1363 = vst.msk [vmem:[#allocation3 + $0x3c] sm:$0xf] %vm1347_vm2, %v1330_v1  ;;  %v1328_v35 = vpop.permute.xlu0 %1327 }
 0x19c   : > { %1362 = vst.msk [vmem:[#allocation3 + $0x38] sm:$0xf] %vm1347_vm2, %v1328_v35 }
 0x19e   : > { %v1411_v36 = vpop.permute.xlu1 %1410 }
 0x19f   : > { %1454 = vst.msk [vmem:[#allocation3 + $0x14] sm:$0xf] %vm1448_vm3, %v1411_v36  ;;  %v1409_v37 = vpop.permute.xlu0 %1408 }
 0x1a0   : > { %1453 = vst.msk [vmem:[#allocation3 + $0x10] sm:$0xf] %vm1448_vm3, %v1409_v37 }
 0x1a2   : > { %v1427_v39 = vpop.permute.xlu1 %1426 }
 0x1a3   : > { %1462 = vst.msk [vmem:[#allocation3 + $0x34] sm:$0xf] %vm1448_vm3, %v1427_v39  ;;  %v1425_v28 = vpop.permute.xlu0 %1424 }
 0x1a4   : > { %1461 = vst.msk [vmem:[#allocation3 + $0x30] sm:$0xf] %vm1448_vm3, %v1425_v28 }
 0x1a6   : > { %v1415_v40 = vpop.permute.xlu1 %1414 }
 0x1a7   : > { %1456 = vst.msk [vmem:[#allocation3 + $0x1c] sm:$0xf] %vm1448_vm3, %v1415_v40  ;;  %v1413_v34 = vpop.permute.xlu0 %1412 }
 0x1a8   : > { %1455 = vst.msk [vmem:[#allocation3 + $0x18] sm:$0xf] %vm1448_vm3, %v1413_v34 }
 0x1aa   : > { %v1431_v38 = vpop.permute.xlu1 %1430 }
 0x1ab   : > { %1464 = vst.msk [vmem:[#allocation3 + $0x3c] sm:$0xf] %vm1448_vm3, %v1431_v38  ;;  %v1429_v41 = vpop.permute.xlu0 %1428 }
 0x1ac   : > { %1463 = vst.msk [vmem:[#allocation3 + $0x38] sm:$0xf] %vm1448_vm3, %v1429_v41 }
 0x1ae   : > { %v1692_v42 = vpop.permute.xlu1 %1691 }
 0x1af   : > { %1735 = vst.msk [vmem:[#allocation3 + $0x14] sm:$0xf] %vm1729_vm4, %v1692_v42  ;;  %v1690_v43 = vpop.permute.xlu0 %1689 }
 0x1b0   : > { %1734 = vst.msk [vmem:[#allocation3 + $0x10] sm:$0xf] %vm1729_vm4, %v1690_v43 }
 0x1b2   : > { %v1708_v44 = vpop.permute.xlu1 %1707 }
 0x1b3   : > { %1743 = vst.msk [vmem:[#allocation3 + $0x34] sm:$0xf] %vm1729_vm4, %v1708_v44  ;;  %v1706_v45 = vpop.permute.xlu0 %1705 }
 0x1b4   : > { %1742 = vst.msk [vmem:[#allocation3 + $0x30] sm:$0xf] %vm1729_vm4, %v1706_v45 }
 0x1b6   : > { %v1696_v46 = vpop.permute.xlu1 %1695 }
 0x1b7   : > { %1737 = vst.msk [vmem:[#allocation3 + $0x1c] sm:$0xf] %vm1729_vm4, %v1696_v46  ;;  %v1694_v47 = vpop.permute.xlu0 %1693 }
 0x1b8   : > { %1736 = vst.msk [vmem:[#allocation3 + $0x18] sm:$0xf] %vm1729_vm4, %v1694_v47 }
 0x1ba   : > { %v1712_v48 = vpop.permute.xlu1 %1711 }
 0x1bb   : > { %1745 = vst.msk [vmem:[#allocation3 + $0x3c] sm:$0xf] %vm1729_vm4, %v1712_v48  ;;  %v1710_v49 = vpop.permute.xlu0 %1709 }
 0x1bc   : > { %1744 = vst.msk [vmem:[#allocation3 + $0x38] sm:$0xf] %vm1729_vm4, %v1710_v49 }
 0x1be   : > { %v1861_v50 = vpop.permute.xlu1 %1860 }
 0x1bf   : > { %1904 = vst.msk [vmem:[#allocation3 + $0x14] sm:$0xf] %vm1898_vm5, %v1861_v50  ;;  %v1859_v52 = vpop.permute.xlu0 %1858 }
 0x1c0   : > { %1903 = vst.msk [vmem:[#allocation3 + $0x10] sm:$0xf] %vm1898_vm5, %v1859_v52 }
 0x1c2   : > { %v1877_v53 = vpop.permute.xlu1 %1876 }
 0x1c3   : > { %1912 = vst.msk [vmem:[#allocation3 + $0x34] sm:$0xf] %vm1898_vm5, %v1877_v53  ;;  %v1875_v54 = vpop.permute.xlu0 %1874 }
 0x1c4   : > { %1911 = vst.msk [vmem:[#allocation3 + $0x30] sm:$0xf] %vm1898_vm5, %v1875_v54 }
 0x1c6   : > { %v1865_v58 = vpop.permute.xlu1 %1864 }
 0x1c7   : > { %1906 = vst.msk [vmem:[#allocation3 + $0x1c] sm:$0xf] %vm1898_vm5, %v1865_v58  ;;  %v1863_v55 = vpop.permute.xlu0 %1862 }
 0x1c8   : > { %1905 = vst.msk [vmem:[#allocation3 + $0x18] sm:$0xf] %vm1898_vm5, %v1863_v55 }
 0x1ca   : > { %v1881_v56 = vpop.permute.xlu1 %1880 }
 0x1cb   : > { %1914 = vst.msk [vmem:[#allocation3 + $0x3c] sm:$0xf] %vm1898_vm5, %v1881_v56  ;;  %v1879_v57 = vpop.permute.xlu0 %1878 }
 0x1cc   : > { %1913 = vst.msk [vmem:[#allocation3 + $0x38] sm:$0xf] %vm1898_vm5, %v1879_v57 }
 0x1ce   : > { %v1962_v59 = vpop.permute.xlu1 %1961 }
 0x1cf   : > { %2005 = vst.msk [vmem:[#allocation3 + $0x14] sm:$0xf] %vm1999_vm6, %v1962_v59  ;;  %v1960_v60 = vpop.permute.xlu0 %1959 }
 0x1d0   : > { %2004 = vst.msk [vmem:[#allocation3 + $0x10] sm:$0xf] %vm1999_vm6, %v1960_v60 }
 0x1d2   : > { %v1978_v62 = vpop.permute.xlu1 %1977 }
 0x1d3   : > { %2013 = vst.msk [vmem:[#allocation3 + $0x34] sm:$0xf] %vm1999_vm6, %v1978_v62  ;;  %v1976_v63 = vpop.permute.xlu0 %1975 }
 0x1d4   : > { %2012 = vst.msk [vmem:[#allocation3 + $0x30] sm:$0xf] %vm1999_vm6, %v1976_v63 }
 0x1d6   : > { %v1966_v61 = vpop.permute.xlu1 %1965 }
 0x1d7   : > { %2007 = vst.msk [vmem:[#allocation3 + $0x1c] sm:$0xf] %vm1999_vm6, %v1966_v61  ;;  %v1964_v0 = vpop.permute.xlu0 %1963 }
 0x1d8   : > { %2006 = vst.msk [vmem:[#allocation3 + $0x18] sm:$0xf] %vm1999_vm6, %v1964_v0 }
 0x1da   : > { %v1982_v2 = vpop.permute.xlu1 %1981 }
 0x1db   : > { %2015 = vst.msk [vmem:[#allocation3 + $0x3c] sm:$0xf] %vm1999_vm6, %v1982_v2  ;;  %v1980_v3 = vpop.permute.xlu0 %1979 }
 0x1dc   : > { %2014 = vst.msk [vmem:[#allocation3 + $0x38] sm:$0xf] %vm1999_vm6, %v1980_v3 }
 0x1de   : > { %v2243_v4 = vpop.permute.xlu1 %2242 }
 0x1df   : > { %2286 = vst.msk [vmem:[#allocation3 + $0x14] sm:$0xf] %vm2280_vm7, %v2243_v4  ;;  %v2241_v5 = vpop.permute.xlu0 %2240 }
 0x1e0   : > { %2285 = vst.msk [vmem:[#allocation3 + $0x10] sm:$0xf] %vm2280_vm7, %v2241_v5 }
 0x1e2   : > { %v2259_v6 = vpop.permute.xlu1 %2258 }
 0x1e3   : > { %2294 = vst.msk [vmem:[#allocation3 + $0x34] sm:$0xf] %vm2280_vm7, %v2259_v6  ;;  %v2257_v7 = vpop.permute.xlu0 %2256 }
 0x1e4   : > { %2293 = vst.msk [vmem:[#allocation3 + $0x30] sm:$0xf] %vm2280_vm7, %v2257_v7 }
 0x1e6   : > { %v2247_v8 = vpop.permute.xlu1 %2246 }
 0x1e7   : > { %2288 = vst.msk [vmem:[#allocation3 + $0x1c] sm:$0xf] %vm2280_vm7, %v2247_v8  ;;  %v2245_v9 = vpop.permute.xlu0 %2244 }
 0x1e8   : > { %2287 = vst.msk [vmem:[#allocation3 + $0x18] sm:$0xf] %vm2280_vm7, %v2245_v9 }
 0x1ea   : > { %v2263_v11 = vpop.permute.xlu1 %2262 }
 0x1eb   : > { %2296 = vst.msk [vmem:[#allocation3 + $0x3c] sm:$0xf] %vm2280_vm7, %v2263_v11  ;;  %v2261_v12 = vpop.permute.xlu0 %2260 }
 0x1ec   : > { %2295 = vst.msk [vmem:[#allocation3 + $0x38] sm:$0xf] %vm2280_vm7, %v2261_v12 }
 0x1ee   : > { %v2412_v13 = vpop.permute.xlu1 %2411 }
 0x1ef   : > { %2455 = vst.msk [vmem:[#allocation3 + $0x14] sm:$0xf] %vm2449_vm8, %v2412_v13  ;;  %v2410_v10 = vpop.permute.xlu0 %2409 }
 0x1f0   : > { %2454 = vst.msk [vmem:[#allocation3 + $0x10] sm:$0xf] %vm2449_vm8, %v2410_v10 }
 0x1f2   : > { %v2428_v14 = vpop.permute.xlu1 %2427 }
 0x1f3   : > { %2463 = vst.msk [vmem:[#allocation3 + $0x34] sm:$0xf] %vm2449_vm8, %v2428_v14  ;;  %v2426_v17 = vpop.permute.xlu0 %2425 }
 0x1f4   : > { %2462 = vst.msk [vmem:[#allocation3 + $0x30] sm:$0xf] %vm2449_vm8, %v2426_v17 }
 0x1f6   : > { %v2416_v19 = vpop.permute.xlu1 %2415 }
 0x1f7   : > { %2457 = vst.msk [vmem:[#allocation3 + $0x1c] sm:$0xf] %vm2449_vm8, %v2416_v19  ;;  %v2414_v22 = vpop.permute.xlu0 %2413  ;;  %v3528_v23 = vld [vmem:[#allocation3 + $0x10] sm:$0xff]  }
 0x1f8   : > { %2456 = vst.msk [vmem:[#allocation3 + $0x18] sm:$0xf] %vm2449_vm8, %v2414_v22  ;;  %3407 = vmatprep.mubr.bf16.mxu0 %v3528_v23 }
 0x1fa   : > { %v2432_v21 = vpop.permute.xlu1 %2431 }
 0x1fb   : > { %2465 = vst.msk [vmem:[#allocation3 + $0x3c] sm:$0xf] %vm2449_vm8, %v2432_v21  ;;  %v2430_v16 = vpop.permute.xlu0 %2429  ;;  %v3529_v24 = vld [vmem:[#allocation3 + $0x30] sm:$0xff]  }
 0x1fc   : > { %2464 = vst.msk [vmem:[#allocation3 + $0x38] sm:$0xf] %vm2449_vm8, %v2430_v16  ;;  %3415 = vmatprep.mubr.bf16.mxu1 %v3529_v24 }
 0x1ff   : > { %v3530_v18 = vld [vmem:[#allocation3 + $0x18] sm:$0xff]  }
 0x200   : > { %3408 = vmatmul.mubr.bf16.gmra.mxu0 %v3530_v18 }
 0x203   : > { %v3531_v25 = vld [vmem:[#allocation3 + $0x38] sm:$0xff]  }
 0x204   : > { %3416 = vmatmul.mubr.bf16.gmra.mxu1 %v3531_v25 }
 0x248   : > { %v3405_v27 = vpop.f32.mrf.mxu0 }
 0x249   : > { %v2700_v30 = vmul.f32 %v3405_v27, %v4863_v26 }
 0x24a   : > { %v2628_v51 = vpop.f32.mrf.mxu0 }
 0x24b   : > { %v4872_v31 = vadd.f32 %v4868_v29, %v2700_v30  ;;  %v2698_v32 = vmul.f32 %v4863_v26, %v2628_v51 }
 0x24c   : > { %v3406_v33 = vpop.f32.mrf.mxu0  ;;  %v3413_v15 = vpop.f32.mrf.mxu1 }
 0x24d   : > { %v3267_v20 = vmul.f32 -1.442695, %v4872_v31  ;;  %v4877_v1 = vadd.f32 %v4868_v29, %v2698_v32  ;;  %v2701_v35 = vmul.f32 %v3406_v33, %v4863_v26  ;;  %v2708_v36 = vmul.f32 %v3413_v15, %v4863_v26 }
 0x24e   : > { %v2631_v37 = vpop.f32.mrf.mxu0  ;;  %v2660_v39 = vpop.f32.mrf.mxu1 }
 0x24f   : > { %3532 = vpow2.f32 %v3267_v20  ;;  %v3265_v28 = vmul.f32 -1.442695, %v4877_v1  ;;  %v2724_v40 = vadd.f32 %v4868_v29, %v2701_v35  ;;  %v2731_v34 = vadd.f32 %v4868_v29, %v2708_v36 }
 0x250   : > { %v2699_v38 = vmul.f32 %v4863_v26, %v2631_v37  ;;  %v2706_v41 = vmul.f32 %v4863_v26, %v2660_v39  ;;  %v3414_v42 = vpop.f32.mrf.mxu1 }
 0x251   : > { %3534 = vpow2.f32 %v3265_v28  ;;  %v3268_v43 = vmul.f32 -1.442695, %v2724_v40  ;;  %v3275_v44 = vmul.f32 -1.442695, %v2731_v34  ;;  %v2709_v45 = vmul.f32 %v3414_v42, %v4863_v26 }
 0x252   : > { %v2722_v46 = vadd.f32 %v4868_v29, %v2699_v38  ;;  %v2729_v47 = vadd.f32 %v4868_v29, %v2706_v41  ;;  %v2663_v48 = vpop.f32.mrf.mxu1 }
 0x253   : > { %3536 = vpow2.f32 %v3268_v43  ;;  %v2732_v49 = vadd.f32 %v4868_v29, %v2709_v45  ;;  %v2707_v50 = vmul.f32 %v4863_v26, %v2663_v48 }
 0x254   : > { %3538 = vpow2.f32 %v3275_v44  ;;  %v3266_v52 = vmul.f32 -1.442695, %v2722_v46  ;;  %v3273_v53 = vmul.f32 -1.442695, %v2729_v47 }
 0x255   : > { %v3276_v54 = vmul.f32 -1.442695, %v2732_v49  ;;  %v2730_v58 = vadd.f32 %v4868_v29, %v2707_v50 }
 0x256   : > { %3540 = vpow2.f32 %v3266_v52 }
 0x257   : > { %3542 = vpow2.f32 %v3273_v53  ;;  %v3274_v55 = vmul.f32 -1.442695, %v2730_v58 }
 0x258   : > { %3544 = vpow2.f32 %v3276_v54 }
 0x259   : > { %3546 = vpow2.f32 %v3274_v55 }
 0x25c   : > { %v3533_v56 = vpop.eup %3532 }
 0x25d   : > { %v2787_v57 = vadd.f32 1.0, %v3533_v56 }
 0x25e   : > { %v3535_v59 = vpop.eup %3534 }
 0x25f   : > { %v2785_v62 = vadd.f32 1.0, %v3535_v59  ;;  %3548 = vrcp.f32 %v2787_v57 }
 0x260   : > { %v3537_v60 = vpop.eup %3536 }
 0x261   : > { %v3539_v63 = vpop.eup %3538  ;;  %v2788_v61 = vadd.f32 1.0, %v3537_v60 }
 0x262   : > { %v2795_v0 = vadd.f32 1.0, %v3539_v63 }
 0x263   : > { %v3541_v2 = vpop.eup %3540  ;;  %3550 = vrcp.f32 %v2788_v61 }
 0x264   : > { %v3543_v3 = vpop.eup %3542  ;;  %3552 = vrcp.f32 %v2785_v62  ;;  %v2786_v4 = vadd.f32 1.0, %v3541_v2 }
 0x265   : > { %v3545_v5 = vpop.eup %3544  ;;  %3554 = vrcp.f32 %v2795_v0  ;;  %v2793_v6 = vadd.f32 1.0, %v3543_v3 }
 0x266   : > { %v3547_v7 = vpop.eup %3546  ;;  %3556 = vrcp.f32 %v2786_v4  ;;  %v2796_v8 = vadd.f32 1.0, %v3545_v5 }
 0x267   : > { %3558 = vrcp.f32 %v2793_v6  ;;  %v2794_v9 = vadd.f32 1.0, %v3547_v7 }
 0x268   : > { %3560 = vrcp.f32 %v2796_v8 }
 0x269   : > { %3562 = vrcp.f32 %v2794_v9 }
 0x26c   : > { %v3549_v11 = vpop.eup %3548 }
 0x26d   : > { %v2835_v10 = vmul.f32 %v3549_v11, %v4872_v31 }
 0x270   : > { %v3551_v12 = vpop.eup %3550 }
 0x271   : > { %v3553_v13 = vpop.eup %3552  ;;  %v2836_v14 = vmul.f32 %v3551_v12, %v2724_v40 }
 0x272   : > { %v3555_v17 = vpop.eup %3554  ;;  %v2833_v21 = vmul.f32 %v3553_v13, %v4877_v1 }
 0x273   : > { %v3557_v19 = vpop.eup %3556  ;;  %v3332_v22 = vpack.c.bf16 %v2836_v14, %v2835_v10  ;;  %v2843_v25 = vmul.f32 %v3555_v17, %v2731_v34 }
 0x274   : > { %v3559_v23 = vpop.eup %3558  ;;  %v2834_v16 = vmul.f32 %v3557_v19, %v2722_v46 }
 0x275   : > { %v3561_v24 = vpop.eup %3560  ;;  %3364 = vst [vmem:[%s3808_s23 + $0x8] sm:$0xff] %v3332_v22   ;;  %v2841_v51 = vmul.f32 %v3559_v23, %v2729_v47 }
 0x276   : > { %v3563_v18 = vpop.eup %3562  ;;  %v3327_v27 = vpack.c.bf16 %v2834_v16, %v2833_v21  ;;  %v2844_v30 = vmul.f32 %v3561_v24, %v2732_v49 }
 0x277   : > { %v2842_v32 = vmul.f32 %v3563_v18, %v2730_v58 }
 0x278   : > { %3328 = vst [vmem:[%s3808_s23] sm:$0xff] %v3327_v27   ;;  %v3352_v31 = vpack.c.bf16 %v2844_v30, %v2843_v25 }
 0x279   : > { %v3347_v33 = vpack.c.bf16 %v2842_v32, %v2841_v51 }
 0x27a   : > { %3368 = vst [vmem:[%s3808_s23 + $0x28] sm:$0xff] %v3352_v31  }
 0x27b   : > { %3367 = vst [vmem:[%s3808_s23 + $0x20] sm:$0xff] %v3347_v33  }
 0x2c0   : > { %v3409_v15 = vpop.f32.mrf.mxu0 }
 0x2c1   : > { %v2704_v20 = vmul.f32 %v3409_v15, %v4863_v26 }
 0x2c2   : > { %v2644_v35 = vpop.f32.mrf.mxu0 }
 0x2c3   : > { %v4900_v1 = vadd.f32 %v4868_v29, %v2704_v20  ;;  %v2702_v36 = vmul.f32 %v4863_v26, %v2644_v35 }
 0x2c4   : > { %v3410_v37 = vpop.f32.mrf.mxu0  ;;  %v3417_v39 = vpop.f32.mrf.mxu1 }
 0x2c5   : > { %v3271_v28 = vmul.f32 -1.442695, %v4900_v1  ;;  %v4905_v40 = vadd.f32 %v4868_v29, %v2702_v36  ;;  %v2705_v34 = vmul.f32 %v3410_v37, %v4863_v26  ;;  %v2712_v38 = vmul.f32 %v3417_v39, %v4863_v26 }
 0x2c6   : > { %v2647_v41 = vpop.f32.mrf.mxu0  ;;  %v2676_v42 = vpop.f32.mrf.mxu1 }
 0x2c7   : > { %3564 = vpow2.f32 %v3271_v28  ;;  %v3269_v43 = vmul.f32 -1.442695, %v4905_v40  ;;  %v2728_v44 = vadd.f32 %v4868_v29, %v2705_v34  ;;  %v4912_v45 = vadd.f32 %v4868_v29, %v2712_v38 }
 0x2c8   : > { %v2703_v46 = vmul.f32 %v4863_v26, %v2647_v41  ;;  %v2710_v47 = vmul.f32 %v4863_v26, %v2676_v42  ;;  %v3418_v48 = vpop.f32.mrf.mxu1 }
 0x2c9   : > { %3566 = vpow2.f32 %v3269_v43  ;;  %v3272_v49 = vmul.f32 -1.442695, %v2728_v44  ;;  %v3279_v50 = vmul.f32 -1.442695, %v4912_v45  ;;  %v2713_v52 = vmul.f32 %v3418_v48, %v4863_v26 }
 0x2ca   : > { %v2726_v53 = vadd.f32 %v4868_v29, %v2703_v46  ;;  %v2733_v54 = vadd.f32 %v4868_v29, %v2710_v47  ;;  %v2679_v58 = vpop.f32.mrf.mxu1 }
 0x2cb   : > { %3568 = vpow2.f32 %v3272_v49  ;;  %v2736_v55 = vadd.f32 %v4868_v29, %v2713_v52  ;;  %v2711_v56 = vmul.f32 %v4863_v26, %v2679_v58 }
 0x2cc   : > { %3570 = vpow2.f32 %v3279_v50  ;;  %v3270_v57 = vmul.f32 -1.442695, %v2726_v53  ;;  %v3277_v59 = vmul.f32 -1.442695, %v2733_v54 }
 0x2cd   : > { %v3280_v60 = vmul.f32 -1.442695, %v2736_v55  ;;  %v2734_v62 = vadd.f32 %v4868_v29, %v2711_v56 }
 0x2ce   : > { %3572 = vpow2.f32 %v3270_v57 }
 0x2cf   : > { %3574 = vpow2.f32 %v3277_v59  ;;  %v3278_v63 = vmul.f32 -1.442695, %v2734_v62 }
 0x2d0   : > { %3576 = vpow2.f32 %v3280_v60 }
 0x2d1   : > { %3578 = vpow2.f32 %v3278_v63 }
 0x2d4   : > { %v3565_v61 = vpop.eup %3564 }
 0x2d5   : > { %v2791_v0 = vadd.f32 1.0, %v3565_v61 }
 0x2d6   : > { %v3567_v2 = vpop.eup %3566 }
 0x2d7   : > { %v2789_v4 = vadd.f32 1.0, %v3567_v2  ;;  %3580 = vrcp.f32 %v2791_v0 }
 0x2d8   : > { %v3569_v3 = vpop.eup %3568 }
 0x2d9   : > { %v3571_v5 = vpop.eup %3570  ;;  %v2792_v6 = vadd.f32 1.0, %v3569_v3 }
 0x2da   : > { %v2799_v26 = vadd.f32 1.0, %v3571_v5 }
 0x2db   : > { %v3573_v7 = vpop.eup %3572  ;;  %3582 = vrcp.f32 %v2792_v6 }
 0x2dc   : > { %v3575_v8 = vpop.eup %3574  ;;  %3584 = vrcp.f32 %v2789_v4  ;;  %v2790_v29 = vadd.f32 1.0, %v3573_v7 }
 0x2dd   : > { %v3577_v9 = vpop.eup %3576  ;;  %3586 = vrcp.f32 %v2799_v26  ;;  %v2797_v11 = vadd.f32 1.0, %v3575_v8 }
 0x2de   : > { %v3579_v12 = vpop.eup %3578  ;;  %3588 = vrcp.f32 %v2790_v29  ;;  %v2800_v13 = vadd.f32 1.0, %v3577_v9 }
 0x2df   : > { %3590 = vrcp.f32 %v2797_v11  ;;  %v2798_v10 = vadd.f32 1.0, %v3579_v12 }
 0x2e0   : > { %3592 = vrcp.f32 %v2800_v13 }
 0x2e1   : > { %3594 = vrcp.f32 %v2798_v10 }
 0x2e4   : > { %v3581_v14 = vpop.eup %3580 }
 0x2e5   : > { %v2839_v22 = vmul.f32 %v3581_v14, %v4900_v1 }
 0x2e8   : > { %v3583_v17 = vpop.eup %3582 }
 0x2e9   : > { %v3585_v19 = vpop.eup %3584  ;;  %v2840_v23 = vmul.f32 %v3583_v17, %v2728_v44 }
 0x2ea   : > { %v3587_v21 = vpop.eup %3586  ;;  %v2837_v25 = vmul.f32 %v3585_v19, %v4905_v40 }
 0x2eb   : > { %v3589_v16 = vpop.eup %3588  ;;  %v3342_v24 = vpack.c.bf16 %v2840_v23, %v2839_v22  ;;  %v2847_v32 = vmul.f32 %v3587_v21, %v4912_v45 }
 0x2ec   : > { %v3591_v18 = vpop.eup %3590  ;;  %v2838_v27 = vmul.f32 %v3589_v16, %v2726_v53 }
 0x2ed   : > { %v3593_v30 = vpop.eup %3592  ;;  %3366 = vst [vmem:[%s3808_s23 + $0x18] sm:$0xff] %v3342_v24   ;;  %v2845_v15 = vmul.f32 %v3591_v18, %v2733_v54 }
 0x2ee   : > { %v3595_v51 = vpop.eup %3594  ;;  %v3337_v31 = vpack.c.bf16 %v2838_v27, %v2837_v25  ;;  %v2848_v33 = vmul.f32 %v3593_v30, %v2736_v55 }
 0x2ef   : > { %v2846_v20 = vmul.f32 %v3595_v51, %v2734_v62 }
 0x2f0   : > { %3365 = vst [vmem:[%s3808_s23 + $0x10] sm:$0xff] %v3337_v31   ;;  %v3362_v35 = vpack.c.bf16 %v2848_v33, %v2847_v32 }
 0x2f1   : > { %v3357_v1 = vpack.c.bf16 %v2846_v20, %v2845_v15 }
 0x2f2   : > { %3370 = vst [vmem:[%s3808_s23 + $0x38] sm:$0xff] %v3362_v35  }
 0x2f3   : > { %3369 = vst [vmem:[%s3808_s23 + $0x30] sm:$0xff] %v3357_v1  }
 0x2f4   : > { %3609 = shalt.err (!%p3606_p7)
}
 0x2f5   : > { %s3610_s8 = scalar_lea.hbm %s4934_s24, 1024  ;;  %s3614_s14 = scalar_lea.hbm %s4998_s4, 4096 }
 0x2f6   : > { %p3611_p9 = scmp.ne.s32.totalorder %s4934_s24, %s3610_s8  ;;  %p3615_p12 = scmp.lt.s32.totalorder %s4934_s24, %s4998_s4 }
 0x2f7   : > { %p3616_p13 = scmp.lt.s32.totalorder %s3614_s14, %s3610_s8 }
 0x2f8   : > { %p3612_p10 = pnand %p3611_p9, %p3777_p3 }
 0x2f9   : > { %p3617_p0 = por %p3616_p13, %p3615_p12 }
 0x2fa   : > { %p3613_p11 = pneg %p3612_p10 }
 0x2fc   : > { %p3618_p1 = pnand %p3617_p0, %p3613_p11 }
 0x2fe   : > { %3621 = shalt.err (!%p3618_p1)
}
 0x2ff   : > { %s3700_s13 = smov 64  }
 0x300   : > { %3435 = dma.vmem_to_hbm [thread:$0]  (%p3777_p3), %s4936_s19, 1024, %s4934_s24, %s4942_s27, %s3700_s13, %s3700_s13, %s3691_s30  }
 0x301 PF: > { %p3441_p2 = scmp.ge.s32.totalorder %s3688_s22, 2  ;;  %s2962_s5 = sand.u32 1, %s3660_s15  }
 0x302   : > { %s2963_s6 = scalar_lea.sflag [#allocation5], %s2962_s5 }
 0x303   : > { %p3438_p4 = pnand %p3441_p2, %p3786_p8 }
 0x305   : > { %p3439_p5 = pneg %p3438_p4 }
 0x307   : > { %3655 = dma.done.wait (%p3439_p5), %s2963_s6, 1024  }
 0x308   : > { %3657 = vsyncadd (%p3439_p5), %s2963_s6, 4294966272  ;;  %s17_s22 = sadd.s32 1, %s3688_s22   ;;  %s5013_s15 = smov %s3664_s16 }
 0x309   : > { %p14_p6 = scmp.ge.s32.totalorder %s17_s22, 6   ;;  %s5014_s16 = smov %s3668_s17 }
 0x30a   : > { %s5015_s17 = smov %s3795_s7  ;;  %s5016_s18 = smov %s3680_s20 }
 0x30b   : > { %s5017_s19 = smov %s3684_s21  ;;  %s5018_s20 = smov %s5021_s25 }
 0x30c   : > { %s5019_s21 = smov %s5025_s26  ;;  %16 = sbr.rel (!%p14_p6) target bundleno = 5 (0x5), region = 93 }
 0x311   :  { %2968 = vsyncpa [#allocation5], 1 }
 0x312   :  { %2970 = vsyncpa [#allocation5 + $0x1], 1 }

</bundles_post_ra>
